<compile_context>
chip_gen: v5e
topology: v5e:2x2
jax: 0.10.0
libtpu: 0.0.40
codegen_flags: <defaults>
</compile_context>

<pallas_src>
import functools

import jax
import jax.numpy as jnp
from jax import lax
from jax.experimental import pallas as pl
from jax.experimental.pallas import tpu as pltpu


# ---------------------------------------------------------------------------
# Per-generation VMEM budget / tile-size selection
# ---------------------------------------------------------------------------

def _vmem_limit_bytes():
    cap = 128 * 1024 * 1024
    try:
        cap = int(pltpu.get_tpu_info().vmem_capacity_bytes)
    except Exception:
        pass
    # v5e/v6e (128 MiB physical) -> ~96 MiB scoped; v7x (64 MiB) -> 48 MiB.
    return min((cap * 3) // 4, 100 * 1024 * 1024)


def _divisors_desc(n):
    return [d for d in range(n, 0, -1) if n % d == 0]


def _pick_td_fused(D, H, W, Cin, P, C4, budget):
    """Largest depth tile TD (divisor of D) whose fused-kernel VMEM estimate fits."""
    HW = H * W
    wbytes = 2 * (Cin * P + 27 * P * P + P * C4) * 4      # weights, double-buffered
    for td in _divisors_desc(D):
        m = td * HW
        est = (
            2 * 2 * (td + 2) * HW * Cin * 4                # x main+halo blocks, 2x buffered
            + (td + 2) * (H + 2) * (W + 2) * P * 4         # padded conv1 slab (scratch)
            + m * 9 * P * 4                                # one kd tap-concat
            + m * (P + C4) * 4                             # conv2 acc + conv3 result (f32)
            + 2 * m * C4 * 4                               # out3 block, double-buffered
            + wbytes
        )
        if est <= budget:
            return td
    return 1


def _pick_td_ew(D, HW, C, budget):
    for td in _divisors_desc(D):
        if 2 * td * HW * C * (2 + 2 + 4) <= budget:
            return td
    return 1


# ---------------------------------------------------------------------------
# Kernels
# ---------------------------------------------------------------------------

def _fused_bottleneck_kernel(x_top_ref, x_main_ref, x_bot_ref,
                             w1_ref, b1_ref, w2_ref, b2_ref, w3_ref, b3_ref,
                             out_ref, pool_ref, slab_ref, *, H, W, TD):
    """conv1+bn1+relu -> conv2(3x3x3)+bn2+relu -> conv3+bn3 (+ fused SE pool)."""
    t = pl.program_id(1)
    nt = pl.num_programs(1)
    HW = H * W
    Cin = x_main_ref.shape[-1]
    P = w1_ref.shape[1]
    C4 = w3_ref.shape[1]
    M = TD * HW
    cdt = slab_ref.dtype

    # --- fused conv1 (1x1x1, BN1 scale pre-folded into w1) + bias + ReLU on the
    #     (TD+2)-slice halo of x (halo slices recomputed: ~2/TD redundant FLOPs).
    x_ext = jnp.concatenate([x_top_ref[0], x_main_ref[0], x_bot_ref[0]], axis=0)
    t1 = jnp.dot(x_ext.reshape((TD + 2) * HW, Cin), w1_ref[...],
                 preferred_element_type=jnp.float32)
    t1 = jnp.maximum(t1 + b1_ref[...], 0.0)
    t1 = t1.reshape(TD + 2, H, W, P).astype(cdt)

    # --- build the zero-padded (depth, H, W) slab in VMEM; the zero borders are
    #     exactly Conv3d(padding=1)'s zero padding.  Depth-halo slices are only
    #     written for interior tiles (boundary tiles keep zeros).
    slab_ref[...] = jnp.zeros(slab_ref.shape, cdt)
    slab_ref[1:TD + 1, 1:H + 1, 1:W + 1, :] = t1[1:TD + 1]

    @pl.when(t > 0)
    def _():
        slab_ref[0:1, 1:H + 1, 1:W + 1, :] = t1[0:1]

    @pl.when(t < nt - 1)
    def _():
        slab_ref[TD + 1:TD + 2, 1:H + 1, 1:W + 1, :] = t1[TD + 1:TD + 2]

    # --- conv2 (3x3x3, BN2 folded): 3 accumulated dots of K = 9*P (one per kd).
    #     Tap order (kh, kw, Cin) must match the (3, 9*P, P) weight reshape.
    acc = jnp.zeros((M, P), jnp.float32)
    for kd in range(3):
        taps = []
        for kh in range(3):
            for kw in range(3):
                taps.append(
                    slab_ref[kd:kd + TD, kh:kh + H, kw:kw + W, :].reshape(M, P))
        xk = jnp.concatenate(taps, axis=1)                  # (M, 9*P)
        acc = acc + jnp.dot(xk, w2_ref[kd], preferred_element_type=jnp.float32)
    out2 = jnp.maximum(acc + b2_ref[...], 0.0).astype(cdt)

    # --- conv3 (1x1x1, BN3 folded) + bias (no relu); fused SE channel-sum pool.
    y3 = jnp.dot(out2, w3_ref[...], preferred_element_type=jnp.float32)
    y3 = y3 + b3_ref[...]

    @pl.when(t == 0)
    def _():
        pool_ref[...] = jnp.zeros(pool_ref.shape, pool_ref.dtype)
    pool_ref[0] += jnp.sum(y3, axis=0, keepdims=True)

    out_ref[0] = y3.reshape(TD, HW, C4).astype(out_ref.dtype)


def _se_apply_kernel(x_ref, res_ref, gate_ref, o_ref):
    # x_ref/res_ref: (1, TD, HW, C); gate_ref: (1, 1, C) precomputed sigmoid gate.
    x = x_ref[0].astype(jnp.float32)
    r = res_ref[0].astype(jnp.float32)
    g = gate_ref[0].reshape(1, 1, -1)
    o_ref[0] = jnp.maximum(x * g + r, 0.0).astype(o_ref.dtype)


# ---------------------------------------------------------------------------
# pallas_call wrappers
# ---------------------------------------------------------------------------

def fused_convs_and_pool(x, w1, b1, w2, b2, w3, b3, *, out_dtype):
    """x: (B, D, H, W, Cin).  Returns (out3 (B,D,HW,C4), pool_sum (B,1,C4) f32)."""
    B, D, H, W, Cin = x.shape
    P = w1.shape[1]
    C4 = w3.shape[1]
    HW = H * W
    vlim = _vmem_limit_bytes()
    TD = _pick_td_fused(D, H, W, Cin, P, C4, budget=vlim // 2)
    NT = D // TD

    kern = functools.partial(_fused_bottleneck_kernel, H=H, W=W, TD=TD)

    out3, pool = pl.pallas_call(
        kern,
        out_shape=(jax.ShapeDtypeStruct((B, D, HW, C4), out_dtype),
                   jax.ShapeDtypeStruct((B, 1, C4), jnp.float32)),
        grid=(B, NT),
        in_specs=[
            # single-slice top halo (element-level depth index, clamped at 0)
            pl.BlockSpec((1, 1, H, W, Cin),
                         lambda b, t: (b, jnp.maximum(t * TD - 1, 0), 0, 0, 0)),
            # TD-deep main block
            pl.BlockSpec((1, TD, H, W, Cin), lambda b, t: (b, t, 0, 0, 0)),
            # single-slice bottom halo (clamped at D-1)
            pl.BlockSpec((1, 1, H, W, Cin),
                         lambda b, t: (b, jnp.minimum(t * TD + TD, D - 1), 0, 0, 0)),
            pl.BlockSpec((Cin, P), lambda b, t: (0, 0)),
            pl.BlockSpec((1, P), lambda b, t: (0, 0)),
            pl.BlockSpec((3, 9 * P, P), lambda b, t: (0, 0, 0)),
            pl.BlockSpec((1, P), lambda b, t: (0, 0)),
            pl.BlockSpec((P, C4), lambda b, t: (0, 0)),
            pl.BlockSpec((1, C4), lambda b, t: (0, 0)),
        ],
        out_specs=(pl.BlockSpec((1, TD, HW, C4), lambda b, t: (b, t, 0, 0)),
                   pl.BlockSpec((1, 1, C4), lambda b, t: (b, 0, 0))),
        scratch_shapes=[pltpu.VMEM((TD + 2, H + 2, W + 2, P), x.dtype)],
        compiler_params=pltpu.CompilerParams(
            # depth-tile axis carries the resident SE-pool accumulator -> 'arbitrary'
            dimension_semantics=("parallel", "arbitrary"),
            vmem_limit_bytes=vlim),
    )(x, x, x, w1, b1, w2, b2, w3, b3)
    return out3, pool


def se_apply_residual_relu(x, residual, gate):
    # x/residual: (B, D, HW, C); gate: (B, 1, C) f32.  Output f32.
    B, D, HW, C = x.shape
    vlim = _vmem_limit_bytes()
    TD = _pick_td_ew(D, HW, C, budget=vlim // 2)
    return pl.pallas_call(
        _se_apply_kernel,
        out_shape=jax.ShapeDtypeStruct((B, D, HW, C), jnp.float32),
        grid=(B, D // TD),
        in_specs=[
            pl.BlockSpec((1, TD, HW, C), lambda b, t: (b, t, 0, 0)),
            pl.BlockSpec((1, TD, HW, C), lambda b, t: (b, t, 0, 0)),
            pl.BlockSpec((1, 1, C), lambda b, t: (b, 0, 0)),
        ],
        out_specs=pl.BlockSpec((1, TD, HW, C), lambda b, t: (b, t, 0, 0)),
        compiler_params=pltpu.CompilerParams(
            dimension_semantics=("parallel", "parallel"),
            vmem_limit_bytes=vlim),
    )(x, residual, gate)


# ---------------------------------------------------------------------------
# SEBottleneck forward (Pallas) + parameter init + pure-JAX reference
# ---------------------------------------------------------------------------

def se_bottleneck_forward(x_ncdhw, p, compute_dtype=jnp.bfloat16):
    B, Cin, D, H, W = x_ncdhw.shape
    HW = H * W
    planes = p["conv1_w"].shape[1]
    c4 = planes * 4
    assert Cin == c4  # downsample=None, stride=1 => residual requires inplanes == planes*4
    cdt = compute_dtype

    # Fold BN scales into the conv weights (one-time, plain JAX); bias stays separate.
    w1 = (p["conv1_w"] * p["bn1_scale"]).astype(cdt)                           # (Cin, P)
    w2 = (p["conv2_w"] * p["bn2_scale"].reshape(1, 1, 1, 1, -1)
          ).reshape(3, 9 * planes, planes).astype(cdt)                         # (3, 9P, P)
    w3 = (p["conv3_w"] * p["bn3_scale"]).astype(cdt)                           # (P, C4)

    x = jnp.transpose(x_ncdhw, (0, 2, 3, 4, 1)).astype(cdt)                    # (B,D,H,W,C)

    # Fused conv1 -> conv2 -> conv3 (+BN, +ReLU) with SE channel-sum pooling.
    out3, pool = fused_convs_and_pool(
        x, w1, p["bn1_bias"], w2, p["bn2_bias"], w3, p["bn3_bias"], out_dtype=cdt)

    # SE gate MLP on (B, C4): tiny matmuls, plain JAX, f32.
    y = pool[:, 0, :] / float(D * HW)                                          # AdaptiveAvgPool3d(1)
    y = jnp.maximum(y @ p["se_w1"], 0.0)
    gate = jax.nn.sigmoid(y @ p["se_w2"])                                      # (B, C4)

    # SE scale + residual add + final ReLU (streaming element-wise kernel).
    res = x.reshape(B, D, HW, c4)
    out = se_apply_residual_relu(out3, res, gate.reshape(B, 1, c4))            # f32
    return jnp.transpose(out.reshape(B, D, H, W, c4), (0, 4, 1, 2, 3))         # back to NCDHW


def init_params(key, inplanes, planes, reduction=16, eps=1e-5):
    c4 = planes * 4
    cr = c4 // reduction
    ks = jax.random.split(key, 17)

    def bn(kg, kb, km, kv, c):
        gamma = jax.random.uniform(kg, (1, c), jnp.float32, 0.5, 1.5)
        beta = 0.1 * jax.random.normal(kb, (1, c), jnp.float32)
        mean = 0.1 * jax.random.normal(km, (1, c), jnp.float32)
        var = jax.random.uniform(kv, (1, c), jnp.float32, 0.5, 1.5)
        scale = gamma * lax.rsqrt(var + eps)
        return scale, beta - mean * scale

    bn1_s, bn1_b = bn(ks[0], ks[1], ks[2], ks[3], planes)
    bn2_s, bn2_b = bn(ks[4], ks[5], ks[6], ks[7], planes)
    bn3_s, bn3_b = bn(ks[8], ks[9], ks[10], ks[11], c4)

    return {
        "conv1_w": 0.1 * jax.random.normal(ks[12], (inplanes, planes), jnp.float32),
        "conv2_w": 0.1 * jax.random.normal(ks[13], (3, 3, 3, planes, planes), jnp.float32),
        "conv3_w": 0.1 * jax.random.normal(ks[14], (planes, c4), jnp.float32),
        "se_w1": 0.3 * jax.random.normal(ks[15], (c4, cr), jnp.float32),
        "se_w2": 0.3 * jax.random.normal(ks[16], (cr, c4), jnp.float32),
        "bn1_scale": bn1_s, "bn1_bias": bn1_b,
        "bn2_scale": bn2_s, "bn2_bias": bn2_b,
        "bn3_scale": bn3_s, "bn3_bias": bn3_b,
    }


def reference_forward(x_ncdhw, p):
    x = jnp.transpose(x_ncdhw, (0, 2, 3, 4, 1))
    out = jnp.einsum("bdhwi,io->bdhwo", x, p["conv1_w"])
    out = jnp.maximum(out * p["bn1_scale"] + p["bn1_bias"], 0.0)
    out = lax.conv_general_dilated(
        out, p["conv2_w"], window_strides=(1, 1, 1), padding="SAME",
        dimension_numbers=("NDHWC", "DHWIO", "NDHWC"))
    out = jnp.maximum(out * p["bn2_scale"] + p["bn2_bias"], 0.0)
    out = jnp.einsum("bdhwi,io->bdhwo", out, p["conv3_w"])
    out = out * p["bn3_scale"] + p["bn3_bias"]
    y = jnp.mean(out, axis=(1, 2, 3))                       # (B, C)
    y = jnp.maximum(y @ p["se_w1"], 0.0)
    y = jax.nn.sigmoid(y @ p["se_w2"])
    out = out * y[:, None, None, None, :]
    out = jnp.maximum(out + x, 0.0)
    return jnp.transpose(out, (0, 4, 1, 2, 3))


if __name__ == "__main__":
    import numpy as np

    B, planes = 2, 32
    inplanes = planes * 4        # downsample=None => residual requires inplanes == planes*4
    D = H = W = 4

    key = jax.random.PRNGKey(0)
    kx, kp = jax.random.split(key)
    x = jax.random.normal(kx, (B, inplanes, D, H, W), jnp.float32)   # PyTorch NCDHW
    params = init_params(kp, inplanes, planes)

    ref = jax.block_until_ready(reference_forward(x, params))

    # Exactness check: f32 compute path.
    fwd_f32 = jax.jit(functools.partial(se_bottleneck_forward, compute_dtype=jnp.float32))
    out_f32 = jax.block_until_ready(fwd_f32(x, params))
    assert out_f32.shape == (B, planes * 4, D, H, W)
    np.testing.assert_allclose(np.asarray(out_f32), np.asarray(ref), rtol=2e-3, atol=2e-3)

    # Fast path: bf16 activations/weights, f32 MXU accumulation & BN/SE math.
    fwd_bf16 = jax.jit(functools.partial(se_bottleneck_forward, compute_dtype=jnp.bfloat16))
    out_bf16 = jax.block_until_ready(fwd_bf16(x, params))
    assert out_bf16.shape == (B, planes * 4, D, H, W)
    np.testing.assert_allclose(np.asarray(out_bf16), np.asarray(ref), rtol=1e-1, atol=1e-1)

    print("KERNEL_OK")
</pallas_src>

<mosaic_0001>
module attributes {stable_mosaic.version = 11 : i64} {
  func.func @_se_apply_kernel(%arg0: i32, %arg1: i32, %arg2: memref<1x4x16x128xf32, #tpu.memory_space<vmem>>, %arg3: memref<1x4x16x128xf32, #tpu.memory_space<vmem>>, %arg4: memref<1x1x128xf32, #tpu.memory_space<vmem>>, %arg5: memref<1x4x16x128xf32, #tpu.memory_space<vmem>>) attributes {dimension_semantics = [#tpu.dimension_semantics<parallel>, #tpu.dimension_semantics<parallel>], iteration_bounds = array<i64: 2, 1>, scalar_prefetch = 0 : i64, scratch_operands = 0 : i64, tpu.core_type = #tpu.core_type<tc>, window_params = [{transform_indices = @transform_0, window_bounds = array<i64: 1, 4, 16, 128>}, {transform_indices = @transform_1, window_bounds = array<i64: 1, 4, 16, 128>}, {transform_indices = @transform_2, window_bounds = array<i64: 1, 1, 128>}, {transform_indices = @transform_3, window_bounds = array<i64: 1, 4, 16, 128>}]} {
    %c0 = arith.constant 0 : index
    %c0_0 = arith.constant 0 : index
    %c0_1 = arith.constant 0 : index
    %c0_2 = arith.constant 0 : index
    %0 = vector.load %arg2[%c0, %c0_0, %c0_1, %c0_2] : memref<1x4x16x128xf32, #tpu.memory_space<vmem>>, vector<1x4x16x128xf32>
    %1 = vector.shape_cast %0 : vector<1x4x16x128xf32> to vector<4x16x128xf32>
    %c0_3 = arith.constant 0 : index
    %c0_4 = arith.constant 0 : index
    %c0_5 = arith.constant 0 : index
    %c0_6 = arith.constant 0 : index
    %2 = vector.load %arg3[%c0_3, %c0_4, %c0_5, %c0_6] : memref<1x4x16x128xf32, #tpu.memory_space<vmem>>, vector<1x4x16x128xf32>
    %3 = vector.shape_cast %2 : vector<1x4x16x128xf32> to vector<4x16x128xf32>
    %c0_7 = arith.constant 0 : index
    %c0_8 = arith.constant 0 : index
    %c0_9 = arith.constant 0 : index
    %4 = vector.load %arg4[%c0_7, %c0_8, %c0_9] : memref<1x1x128xf32, #tpu.memory_space<vmem>>, vector<1x1x128xf32>
    %5 = vector.shape_cast %4 : vector<1x1x128xf32> to vector<1x128xf32>
    %6 = vector.shape_cast %5 : vector<1x128xf32> to vector<1x1x128xf32>
    %7 = vector.broadcast %6 : vector<1x1x128xf32> to vector<4x16x128xf32>
    %8 = arith.mulf %1, %7 : vector<4x16x128xf32>
    %9 = arith.addf %8, %3 : vector<4x16x128xf32>
    %cst = arith.constant 0.000000e+00 : f32
    %10 = vector.broadcast %cst : f32 to vector<4x16x128xf32>
    %11 = arith.maximumf %9, %10 : vector<4x16x128xf32>
    %c0_10 = arith.constant 0 : index
    %c0_11 = arith.constant 0 : index
    %c0_12 = arith.constant 0 : index
    %c0_13 = arith.constant 0 : index
    %12 = vector.load %arg5[%c0_10, %c0_11, %c0_12, %c0_13] : memref<1x4x16x128xf32, #tpu.memory_space<vmem>>, vector<1x4x16x128xf32>
    %13 = vector.shape_cast %12 : vector<1x4x16x128xf32> to vector<4x16x128xf32>
    %14 = vector.shape_cast %11 : vector<4x16x128xf32> to vector<1x4x16x128xf32>
    tpu.vector_store %arg5[%c0_10, %c0_11, %c0_12, %c0_13], %14 {strides = array<i32>} : memref<1x4x16x128xf32, #tpu.memory_space<vmem>>, vector<1x4x16x128xf32>,
    return
  }
  func.func @transform_0(%arg0: i32, %arg1: i32) -> (i32, i32, i32, i32) {
    %c0_i32 = arith.constant 0 : i32
    %c0_i32_0 = arith.constant 0 : i32
    %c0_i32_1 = arith.constant 0 : i32
    return %arg0, %arg1, %c0_i32, %c0_i32_0 : i32, i32, i32, i32
  }
  func.func @transform_1(%arg0: i32, %arg1: i32) -> (i32, i32, i32, i32) {
    %c0_i32 = arith.constant 0 : i32
    %c0_i32_0 = arith.constant 0 : i32
    %c0_i32_1 = arith.constant 0 : i32
    return %arg0, %arg1, %c0_i32, %c0_i32_0 : i32, i32, i32, i32
  }
  func.func @transform_2(%arg0: i32, %arg1: i32) -> (i32, i32, i32) {
    %c0_i32 = arith.constant 0 : i32
    %c0_i32_0 = arith.constant 0 : i32
    %c0_i32_1 = arith.constant 0 : i32
    return %arg0, %c0_i32, %c0_i32_0 : i32, i32, i32
  }
  func.func @transform_3(%arg0: i32, %arg1: i32) -> (i32, i32, i32, i32) {
    %c0_i32 = arith.constant 0 : i32
    %c0_i32_0 = arith.constant 0 : i32
    %c0_i32_1 = arith.constant 0 : i32
    return %arg0, %arg1, %c0_i32, %c0_i32_0 : i32, i32, i32, i32
  }
}

module attributes {stable_mosaic.version = 11 : i64} {
  func.func @_fused_bottleneck_kernel(%arg0: i32, %arg1: i32, %arg2: memref<1x1x4x4x128xf32, #tpu.memory_space<vmem>>, %arg3: memref<1x4x4x4x128xf32, #tpu.memory_space<vmem>>, %arg4: memref<1x1x4x4x128xf32, #tpu.memory_space<vmem>>, %arg5: memref<128x32xf32, #tpu.memory_space<vmem>>, %arg6: memref<1x32xf32, #tpu.memory_space<vmem>>, %arg7: memref<3x288x32xf32, #tpu.memory_space<vmem>>, %arg8: memref<1x32xf32, #tpu.memory_space<vmem>>, %arg9: memref<32x128xf32, #tpu.memory_space<vmem>>, %arg10: memref<1x128xf32, #tpu.memory_space<vmem>>, %arg11: memref<1x4x16x128xf32, #tpu.memory_space<vmem>>, %arg12: memref<1x1x128xf32, #tpu.memory_space<vmem>>, %arg13: memref<6x6x6x32xf32, #tpu.memory_space<vmem>>) attributes {dimension_semantics = [#tpu.dimension_semantics<parallel>, #tpu.dimension_semantics<arbitrary>], iteration_bounds = array<i64: 2, 1>, scalar_prefetch = 0 : i64, scratch_operands = 1 : i64, tpu.core_type = #tpu.core_type<tc>, window_params = [{transform_indices = @transform_0, window_bounds = array<i64: 1, 1, 4, 4, 128>}, {transform_indices = @transform_1, window_bounds = array<i64: 1, 4, 4, 4, 128>}, {transform_indices = @transform_2, window_bounds = array<i64: 1, 1, 4, 4, 128>}, {pipeline_mode = #tpu.pipeline_mode<synchronous>, transform_indices = @transform_3, window_bounds = array<i64: 128, 32>}, {pipeline_mode = #tpu.pipeline_mode<synchronous>, transform_indices = @transform_4, window_bounds = array<i64: 1, 32>}, {pipeline_mode = #tpu.pipeline_mode<synchronous>, transform_indices = @transform_5, window_bounds = array<i64: 3, 288, 32>}, {pipeline_mode = #tpu.pipeline_mode<synchronous>, transform_indices = @transform_6, window_bounds = array<i64: 1, 32>}, {pipeline_mode = #tpu.pipeline_mode<synchronous>, transform_indices = @transform_7, window_bounds = array<i64: 32, 128>}, {pipeline_mode = #tpu.pipeline_mode<synchronous>, transform_indices = @transform_8, window_bounds = array<i64: 1, 128>}, {transform_indices = @transform_9, window_bounds = array<i64: 1, 4, 16, 128>}, {transform_indices = @transform_10, window_bounds = array<i64: 1, 1, 128>}]} {
    %c0 = arith.constant 0 : index
    %c0_0 = arith.constant 0 : index
    %c0_1 = arith.constant 0 : index
    %c0_2 = arith.constant 0 : index
    %c0_3 = arith.constant 0 : index
    %0 = vector.load %arg2[%c0, %c0_0, %c0_1, %c0_2, %c0_3] : memref<1x1x4x4x128xf32, #tpu.memory_space<vmem>>, vector<1x1x4x4x128xf32>
    %1 = vector.shape_cast %0 : vector<1x1x4x4x128xf32> to vector<1x4x4x128xf32>
    %c0_4 = arith.constant 0 : index
    %c0_5 = arith.constant 0 : index
    %c0_6 = arith.constant 0 : index
    %c0_7 = arith.constant 0 : index
    %c0_8 = arith.constant 0 : index
    %2 = vector.load %arg3[%c0_4, %c0_5, %c0_6, %c0_7, %c0_8] : memref<1x4x4x4x128xf32, #tpu.memory_space<vmem>>, vector<1x4x4x4x128xf32>
    %3 = vector.shape_cast %2 : vector<1x4x4x4x128xf32> to vector<4x4x4x128xf32>
    %c0_9 = arith.constant 0 : index
    %c0_10 = arith.constant 0 : index
    %c0_11 = arith.constant 0 : index
    %c0_12 = arith.constant 0 : index
    %c0_13 = arith.constant 0 : index
    %4 = vector.load %arg4[%c0_9, %c0_10, %c0_11, %c0_12, %c0_13] : memref<1x1x4x4x128xf32, #tpu.memory_space<vmem>>, vector<1x1x4x4x128xf32>
    %5 = vector.shape_cast %4 : vector<1x1x4x4x128xf32> to vector<1x4x4x128xf32>
    %6 = tpu.concatenate %1, %3, %5 in 0 : vector<1x4x4x128xf32>, vector<4x4x4x128xf32>, vector<1x4x4x128xf32> -> vector<6x4x4x128xf32>
    %7 = vector.shape_cast %6 : vector<6x4x4x128xf32> to vector<96x128xf32>
    %c0_14 = arith.constant 0 : index
    %c0_15 = arith.constant 0 : index
    %8 = vector.load %arg5[%c0_14, %c0_15] : memref<128x32xf32, #tpu.memory_space<vmem>>, vector<128x32xf32>
    %cst = arith.constant dense<0.000000e+00> : vector<96x32xf32>
    %9 = tpu.matmul %7, %8, %cst {dimension_numbers = #tpu.dot_dimension_numbers<[1], [0], [0], [1], [0, 0, 1, 1], [], []>} : vector<96x128xf32>, vector<128x32xf32>, vector<96x32xf32> -> vector<96x32xf32>
    %c0_16 = arith.constant 0 : index
    %c0_17 = arith.constant 0 : index
    %10 = vector.load %arg6[%c0_16, %c0_17] : memref<1x32xf32, #tpu.memory_space<vmem>>, vector<1x32xf32>
    %11 = vector.broadcast %10 : vector<1x32xf32> to vector<96x32xf32>
    %12 = arith.addf %9, %11 : vector<96x32xf32>
    %cst_18 = arith.constant 0.000000e+00 : f32
    %13 = vector.broadcast %cst_18 : f32 to vector<96x32xf32>
    %14 = arith.maximumf %12, %13 : vector<96x32xf32>
    %15 = vector.shape_cast %14 : vector<96x32xf32> to vector<6x4x4x32xf32>
    %cst_19 = arith.constant 0.000000e+00 : f32
    %16 = vector.broadcast %cst_19 : f32 to vector<6x6x6x32xf32>
    %c0_20 = arith.constant 0 : index
    %c0_21 = arith.constant 0 : index
    %c0_22 = arith.constant 0 : index
    %c0_23 = arith.constant 0 : index
    %17 = vector.load %arg13[%c0_20, %c0_21, %c0_22, %c0_23] : memref<6x6x6x32xf32, #tpu.memory_space<vmem>>, vector<6x6x6x32xf32>
    tpu.vector_store %arg13[%c0_20, %c0_21, %c0_22, %c0_23], %16 {strides = array<i32>} : memref<6x6x6x32xf32, #tpu.memory_space<vmem>>, vector<6x6x6x32xf32>,
    %18 = vector.extract_strided_slice %15 {offsets = [1, 0, 0, 0], sizes = [4, 4, 4, 32], strides = [1, 1, 1, 1]} : vector<6x4x4x32xf32> to vector<4x4x4x32xf32>
    %c1 = arith.constant 1 : index
    %c1_24 = arith.constant 1 : index
    %c1_25 = arith.constant 1 : index
    %c0_26 = arith.constant 0 : index
    %19 = vector.load %arg13[%c1, %c1_24, %c1_25, %c0_26] : memref<6x6x6x32xf32, #tpu.memory_space<vmem>>, vector<4x4x4x32xf32>
    tpu.vector_store %arg13[%c1, %c1_24, %c1_25, %c0_26], %18 {strides = array<i32>} : memref<6x6x6x32xf32, #tpu.memory_space<vmem>>, vector<4x4x4x32xf32>,
    %c0_i32 = arith.constant 0 : i32
    %20 = arith.cmpi sgt, %arg1, %c0_i32 : i32
    %21 = arith.extui %20 : i1 to i32
    %c0_i32_27 = arith.constant 0 : i32
    %22 = arith.cmpi ne, %21, %c0_i32_27 : i32
    scf.if %22 {
      %121 = vector.extract_strided_slice %15 {offsets = [0, 0, 0, 0], sizes = [1, 4, 4, 32], strides = [1, 1, 1, 1]} : vector<6x4x4x32xf32> to vector<1x4x4x32xf32>
      %c0_171 = arith.constant 0 : index
      %c1_172 = arith.constant 1 : index
      %c1_173 = arith.constant 1 : index
      %c0_174 = arith.constant 0 : index
      %122 = vector.load %arg13[%c0_171, %c1_172, %c1_173, %c0_174] : memref<6x6x6x32xf32, #tpu.memory_space<vmem>>, vector<1x4x4x32xf32>
      tpu.vector_store %arg13[%c0_171, %c1_172, %c1_173, %c0_174], %121 {strides = array<i32>} : memref<6x6x6x32xf32, #tpu.memory_space<vmem>>, vector<1x4x4x32xf32>,
    } else {
    }
    %c0_i32_28 = arith.constant 0 : i32
    %23 = arith.cmpi slt, %arg1, %c0_i32_28 : i32
    %24 = arith.extui %23 : i1 to i32
    %c0_i32_29 = arith.constant 0 : i32
    %25 = arith.cmpi ne, %24, %c0_i32_29 : i32
    scf.if %25 {
      %121 = vector.extract_strided_slice %15 {offsets = [5, 0, 0, 0], sizes = [1, 4, 4, 32], strides = [1, 1, 1, 1]} : vector<6x4x4x32xf32> to vector<1x4x4x32xf32>
      %c5 = arith.constant 5 : index
      %c1_171 = arith.constant 1 : index
      %c1_172 = arith.constant 1 : index
      %c0_173 = arith.constant 0 : index
      %122 = vector.load %arg13[%c5, %c1_171, %c1_172, %c0_173] : memref<6x6x6x32xf32, #tpu.memory_space<vmem>>, vector<1x4x4x32xf32>
      tpu.vector_store %arg13[%c5, %c1_171, %c1_172, %c0_173], %121 {strides = array<i32>} : memref<6x6x6x32xf32, #tpu.memory_space<vmem>>, vector<1x4x4x32xf32>,
    } else {
    }
    %cst_30 = arith.constant 0.000000e+00 : f32
    %26 = vector.broadcast %cst_30 : f32 to vector<64x32xf32>
    %c0_31 = arith.constant 0 : index
    %c0_32 = arith.constant 0 : index
    %c0_33 = arith.constant 0 : index
    %c0_34 = arith.constant 0 : index
    %27 = vector.load %arg13[%c0_31, %c0_32, %c0_33, %c0_34] : memref<6x6x6x32xf32, #tpu.memory_space<vmem>>, vector<4x4x4x32xf32>
    %28 = vector.shape_cast %27 : vector<4x4x4x32xf32> to vector<64x32xf32>
    %c0_35 = arith.constant 0 : index
    %c0_36 = arith.constant 0 : index
    %c1_37 = arith.constant 1 : index
    %c0_38 = arith.constant 0 : index
    %29 = vector.load %arg13[%c0_35, %c0_36, %c1_37, %c0_38] : memref<6x6x6x32xf32, #tpu.memory_space<vmem>>, vector<4x4x4x32xf32>
    %30 = vector.shape_cast %29 : vector<4x4x4x32xf32> to vector<64x32xf32>
    %c0_39 = arith.constant 0 : index
    %c0_40 = arith.constant 0 : index
    %c2 = arith.constant 2 : index
    %c0_41 = arith.constant 0 : index
    %31 = vector.load %arg13[%c0_39, %c0_40, %c2, %c0_41] : memref<6x6x6x32xf32, #tpu.memory_space<vmem>>, vector<4x4x4x32xf32>
    %32 = vector.shape_cast %31 : vector<4x4x4x32xf32> to vector<64x32xf32>
    %c0_42 = arith.constant 0 : index
    %c1_43 = arith.constant 1 : index
    %c0_44 = arith.constant 0 : index
    %c0_45 = arith.constant 0 : index
    %33 = vector.load %arg13[%c0_42, %c1_43, %c0_44, %c0_45] : memref<6x6x6x32xf32, #tpu.memory_space<vmem>>, vector<4x4x4x32xf32>
    %34 = vector.shape_cast %33 : vector<4x4x4x32xf32> to vector<64x32xf32>
    %c0_46 = arith.constant 0 : index
    %c1_47 = arith.constant 1 : index
    %c1_48 = arith.constant 1 : index
    %c0_49 = arith.constant 0 : index
    %35 = vector.load %arg13[%c0_46, %c1_47, %c1_48, %c0_49] : memref<6x6x6x32xf32, #tpu.memory_space<vmem>>, vector<4x4x4x32xf32>
    %36 = vector.shape_cast %35 : vector<4x4x4x32xf32> to vector<64x32xf32>
    %c0_50 = arith.constant 0 : index
    %c1_51 = arith.constant 1 : index
    %c2_52 = arith.constant 2 : index
    %c0_53 = arith.constant 0 : index
    %37 = vector.load %arg13[%c0_50, %c1_51, %c2_52, %c0_53] : memref<6x6x6x32xf32, #tpu.memory_space<vmem>>, vector<4x4x4x32xf32>
    %38 = vector.shape_cast %37 : vector<4x4x4x32xf32> to vector<64x32xf32>
    %c0_54 = arith.constant 0 : index
    %c2_55 = arith.constant 2 : index
    %c0_56 = arith.constant 0 : index
    %c0_57 = arith.constant 0 : index
    %39 = vector.load %arg13[%c0_54, %c2_55, %c0_56, %c0_57] : memref<6x6x6x32xf32, #tpu.memory_space<vmem>>, vector<4x4x4x32xf32>
    %40 = vector.shape_cast %39 : vector<4x4x4x32xf32> to vector<64x32xf32>
    %c0_58 = arith.constant 0 : index
    %c2_59 = arith.constant 2 : index
    %c1_60 = arith.constant 1 : index
    %c0_61 = arith.constant 0 : index
    %41 = vector.load %arg13[%c0_58, %c2_59, %c1_60, %c0_61] : memref<6x6x6x32xf32, #tpu.memory_space<vmem>>, vector<4x4x4x32xf32>
    %42 = vector.shape_cast %41 : vector<4x4x4x32xf32> to vector<64x32xf32>
    %c0_62 = arith.constant 0 : index
    %c2_63 = arith.constant 2 : index
    %c2_64 = arith.constant 2 : index
    %c0_65 = arith.constant 0 : index
    %43 = vector.load %arg13[%c0_62, %c2_63, %c2_64, %c0_65] : memref<6x6x6x32xf32, #tpu.memory_space<vmem>>, vector<4x4x4x32xf32>
    %44 = vector.shape_cast %43 : vector<4x4x4x32xf32> to vector<64x32xf32>
    %45 = tpu.concatenate %28, %30, %32, %34, %36, %38, %40, %42, %44 in 1 : vector<64x32xf32>, vector<64x32xf32>, vector<64x32xf32>, vector<64x32xf32>, vector<64x32xf32>, vector<64x32xf32>, vector<64x32xf32>, vector<64x32xf32>, vector<64x32xf32> -> vector<64x288xf32>
    %c0_66 = arith.constant 0 : index
    %c0_67 = arith.constant 0 : index
    %c0_68 = arith.constant 0 : index
    %46 = vector.load %arg7[%c0_66, %c0_67, %c0_68] : memref<3x288x32xf32, #tpu.memory_space<vmem>>, vector<1x288x32xf32>
    %47 = vector.shape_cast %46 : vector<1x288x32xf32> to vector<288x32xf32>
    %cst_69 = arith.constant dense<0.000000e+00> : vector<64x32xf32>
    %48 = tpu.matmul %45, %47, %cst_69 {dimension_numbers = #tpu.dot_dimension_numbers<[1], [0], [0], [1], [0, 0, 1, 1], [], []>} : vector<64x288xf32>, vector<288x32xf32>, vector<64x32xf32> -> vector<64x32xf32>
    %49 = arith.addf %26, %48 : vector<64x32xf32>
    %c1_70 = arith.constant 1 : index
    %c0_71 = arith.constant 0 : index
    %c0_72 = arith.constant 0 : index
    %c0_73 = arith.constant 0 : index
    %50 = vector.load %arg13[%c1_70, %c0_71, %c0_72, %c0_73] : memref<6x6x6x32xf32, #tpu.memory_space<vmem>>, vector<4x4x4x32xf32>
    %51 = vector.shape_cast %50 : vector<4x4x4x32xf32> to vector<64x32xf32>
    %c1_74 = arith.constant 1 : index
    %c0_75 = arith.constant 0 : index
    %c1_76 = arith.constant 1 : index
    %c0_77 = arith.constant 0 : index
    %52 = vector.load %arg13[%c1_74, %c0_75, %c1_76, %c0_77] : memref<6x6x6x32xf32, #tpu.memory_space<vmem>>, vector<4x4x4x32xf32>
    %53 = vector.shape_cast %52 : vector<4x4x4x32xf32> to vector<64x32xf32>
    %c1_78 = arith.constant 1 : index
    %c0_79 = arith.constant 0 : index
    %c2_80 = arith.constant 2 : index
    %c0_81 = arith.constant 0 : index
    %54 = vector.load %arg13[%c1_78, %c0_79, %c2_80, %c0_81] : memref<6x6x6x32xf32, #tpu.memory_space<vmem>>, vector<4x4x4x32xf32>
    %55 = vector.shape_cast %54 : vector<4x4x4x32xf32> to vector<64x32xf32>
    %c1_82 = arith.constant 1 : index
    %c1_83 = arith.constant 1 : index
    %c0_84 = arith.constant 0 : index
    %c0_85 = arith.constant 0 : index
    %56 = vector.load %arg13[%c1_82, %c1_83, %c0_84, %c0_85] : memref<6x6x6x32xf32, #tpu.memory_space<vmem>>, vector<4x4x4x32xf32>
    %57 = vector.shape_cast %56 : vector<4x4x4x32xf32> to vector<64x32xf32>
    %c1_86 = arith.constant 1 : index
    %c1_87 = arith.constant 1 : index
    %c1_88 = arith.constant 1 : index
    %c0_89 = arith.constant 0 : index
    %58 = vector.load %arg13[%c1_86, %c1_87, %c1_88, %c0_89] : memref<6x6x6x32xf32, #tpu.memory_space<vmem>>, vector<4x4x4x32xf32>
    %59 = vector.shape_cast %58 : vector<4x4x4x32xf32> to vector<64x32xf32>
    %c1_90 = arith.constant 1 : index
    %c1_91 = arith.constant 1 : index
    %c2_92 = arith.constant 2 : index
    %c0_93 = arith.constant 0 : index
    %60 = vector.load %arg13[%c1_90, %c1_91, %c2_92, %c0_93] : memref<6x6x6x32xf32, #tpu.memory_space<vmem>>, vector<4x4x4x32xf32>
    %61 = vector.shape_cast %60 : vector<4x4x4x32xf32> to vector<64x32xf32>
    %c1_94 = arith.constant 1 : index
    %c2_95 = arith.constant 2 : index
    %c0_96 = arith.constant 0 : index
    %c0_97 = arith.constant 0 : index
    %62 = vector.load %arg13[%c1_94, %c2_95, %c0_96, %c0_97] : memref<6x6x6x32xf32, #tpu.memory_space<vmem>>, vector<4x4x4x32xf32>
    %63 = vector.shape_cast %62 : vector<4x4x4x32xf32> to vector<64x32xf32>
    %c1_98 = arith.constant 1 : index
    %c2_99 = arith.constant 2 : index
    %c1_100 = arith.constant 1 : index
    %c0_101 = arith.constant 0 : index
    %64 = vector.load %arg13[%c1_98, %c2_99, %c1_100, %c0_101] : memref<6x6x6x32xf32, #tpu.memory_space<vmem>>, vector<4x4x4x32xf32>
    %65 = vector.shape_cast %64 : vector<4x4x4x32xf32> to vector<64x32xf32>
    %c1_102 = arith.constant 1 : index
    %c2_103 = arith.constant 2 : index
    %c2_104 = arith.constant 2 : index
    %c0_105 = arith.constant 0 : index
    %66 = vector.load %arg13[%c1_102, %c2_103, %c2_104, %c0_105] : memref<6x6x6x32xf32, #tpu.memory_space<vmem>>, vector<4x4x4x32xf32>
    %67 = vector.shape_cast %66 : vector<4x4x4x32xf32> to vector<64x32xf32>
    %68 = tpu.concatenate %51, %53, %55, %57, %59, %61, %63, %65, %67 in 1 : vector<64x32xf32>, vector<64x32xf32>, vector<64x32xf32>, vector<64x32xf32>, vector<64x32xf32>, vector<64x32xf32>, vector<64x32xf32>, vector<64x32xf32>, vector<64x32xf32> -> vector<64x288xf32>
    %c1_106 = arith.constant 1 : index
    %c0_107 = arith.constant 0 : index
    %c0_108 = arith.constant 0 : index
    %69 = vector.load %arg7[%c1_106, %c0_107, %c0_108] : memref<3x288x32xf32, #tpu.memory_space<vmem>>, vector<1x288x32xf32>
    %70 = vector.shape_cast %69 : vector<1x288x32xf32> to vector<288x32xf32>
    %cst_109 = arith.constant dense<0.000000e+00> : vector<64x32xf32>
    %71 = tpu.matmul %68, %70, %cst_109 {dimension_numbers = #tpu.dot_dimension_numbers<[1], [0], [0], [1], [0, 0, 1, 1], [], []>} : vector<64x288xf32>, vector<288x32xf32>, vector<64x32xf32> -> vector<64x32xf32>
    %72 = arith.addf %49, %71 : vector<64x32xf32>
    %c2_110 = arith.constant 2 : index
    %c0_111 = arith.constant 0 : index
    %c0_112 = arith.constant 0 : index
    %c0_113 = arith.constant 0 : index
    %73 = vector.load %arg13[%c2_110, %c0_111, %c0_112, %c0_113] : memref<6x6x6x32xf32, #tpu.memory_space<vmem>>, vector<4x4x4x32xf32>
    %74 = vector.shape_cast %73 : vector<4x4x4x32xf32> to vector<64x32xf32>
    %c2_114 = arith.constant 2 : index
    %c0_115 = arith.constant 0 : index
    %c1_116 = arith.constant 1 : index
    %c0_117 = arith.constant 0 : index
    %75 = vector.load %arg13[%c2_114, %c0_115, %c1_116, %c0_117] : memref<6x6x6x32xf32, #tpu.memory_space<vmem>>, vector<4x4x4x32xf32>
    %76 = vector.shape_cast %75 : vector<4x4x4x32xf32> to vector<64x32xf32>
    %c2_118 = arith.constant 2 : index
    %c0_119 = arith.constant 0 : index
    %c2_120 = arith.constant 2 : index
    %c0_121 = arith.constant 0 : index
    %77 = vector.load %arg13[%c2_118, %c0_119, %c2_120, %c0_121] : memref<6x6x6x32xf32, #tpu.memory_space<vmem>>, vector<4x4x4x32xf32>
    %78 = vector.shape_cast %77 : vector<4x4x4x32xf32> to vector<64x32xf32>
    %c2_122 = arith.constant 2 : index
    %c1_123 = arith.constant 1 : index
    %c0_124 = arith.constant 0 : index
    %c0_125 = arith.constant 0 : index
    %79 = vector.load %arg13[%c2_122, %c1_123, %c0_124, %c0_125] : memref<6x6x6x32xf32, #tpu.memory_space<vmem>>, vector<4x4x4x32xf32>
    %80 = vector.shape_cast %79 : vector<4x4x4x32xf32> to vector<64x32xf32>
    %c2_126 = arith.constant 2 : index
    %c1_127 = arith.constant 1 : index
    %c1_128 = arith.constant 1 : index
    %c0_129 = arith.constant 0 : index
    %81 = vector.load %arg13[%c2_126, %c1_127, %c1_128, %c0_129] : memref<6x6x6x32xf32, #tpu.memory_space<vmem>>, vector<4x4x4x32xf32>
    %82 = vector.shape_cast %81 : vector<4x4x4x32xf32> to vector<64x32xf32>
    %c2_130 = arith.constant 2 : index
    %c1_131 = arith.constant 1 : index
    %c2_132 = arith.constant 2 : index
    %c0_133 = arith.constant 0 : index
    %83 = vector.load %arg13[%c2_130, %c1_131, %c2_132, %c0_133] : memref<6x6x6x32xf32, #tpu.memory_space<vmem>>, vector<4x4x4x32xf32>
    %84 = vector.shape_cast %83 : vector<4x4x4x32xf32> to vector<64x32xf32>
    %c2_134 = arith.constant 2 : index
    %c2_135 = arith.constant 2 : index
    %c0_136 = arith.constant 0 : index
    %c0_137 = arith.constant 0 : index
    %85 = vector.load %arg13[%c2_134, %c2_135, %c0_136, %c0_137] : memref<6x6x6x32xf32, #tpu.memory_space<vmem>>, vector<4x4x4x32xf32>
    %86 = vector.shape_cast %85 : vector<4x4x4x32xf32> to vector<64x32xf32>
    %c2_138 = arith.constant 2 : index
    %c2_139 = arith.constant 2 : index
    %c1_140 = arith.constant 1 : index
    %c0_141 = arith.constant 0 : index
    %87 = vector.load %arg13[%c2_138, %c2_139, %c1_140, %c0_141] : memref<6x6x6x32xf32, #tpu.memory_space<vmem>>, vector<4x4x4x32xf32>
    %88 = vector.shape_cast %87 : vector<4x4x4x32xf32> to vector<64x32xf32>
    %c2_142 = arith.constant 2 : index
    %c2_143 = arith.constant 2 : index
    %c2_144 = arith.constant 2 : index
    %c0_145 = arith.constant 0 : index
    %89 = vector.load %arg13[%c2_142, %c2_143, %c2_144, %c0_145] : memref<6x6x6x32xf32, #tpu.memory_space<vmem>>, vector<4x4x4x32xf32>
    %90 = vector.shape_cast %89 : vector<4x4x4x32xf32> to vector<64x32xf32>
    %91 = tpu.concatenate %74, %76, %78, %80, %82, %84, %86, %88, %90 in 1 : vector<64x32xf32>, vector<64x32xf32>, vector<64x32xf32>, vector<64x32xf32>, vector<64x32xf32>, vector<64x32xf32>, vector<64x32xf32>, vector<64x32xf32>, vector<64x32xf32> -> vector<64x288xf32>
    %c2_146 = arith.constant 2 : index
    %c0_147 = arith.constant 0 : index
    %c0_148 = arith.constant 0 : index
    %92 = vector.load %arg7[%c2_146, %c0_147, %c0_148] : memref<3x288x32xf32, #tpu.memory_space<vmem>>, vector<1x288x32xf32>
    %93 = vector.shape_cast %92 : vector<1x288x32xf32> to vector<288x32xf32>
    %cst_149 = arith.constant dense<0.000000e+00> : vector<64x32xf32>
    %94 = tpu.matmul %91, %93, %cst_149 {dimension_numbers = #tpu.dot_dimension_numbers<[1], [0], [0], [1], [0, 0, 1, 1], [], []>} : vector<64x288xf32>, vector<288x32xf32>, vector<64x32xf32> -> vector<64x32xf32>
    %95 = arith.addf %72, %94 : vector<64x32xf32>
    %c0_150 = arith.constant 0 : index
    %c0_151 = arith.constant 0 : index
    %96 = vector.load %arg8[%c0_150, %c0_151] : memref<1x32xf32, #tpu.memory_space<vmem>>, vector<1x32xf32>
    %97 = vector.broadcast %96 : vector<1x32xf32> to vector<64x32xf32>
    %98 = arith.addf %95, %97 : vector<64x32xf32>
    %cst_152 = arith.constant 0.000000e+00 : f32
    %99 = vector.broadcast %cst_152 : f32 to vector<64x32xf32>
    %100 = arith.maximumf %98, %99 : vector<64x32xf32>
    %c0_153 = arith.constant 0 : index
    %c0_154 = arith.constant 0 : index
    %101 = vector.load %arg9[%c0_153, %c0_154] : memref<32x128xf32, #tpu.memory_space<vmem>>, vector<32x128xf32>
    %cst_155 = arith.constant dense<0.000000e+00> : vector<64x128xf32>
    %102 = tpu.matmul %100, %101, %cst_155 {dimension_numbers = #tpu.dot_dimension_numbers<[1], [0], [0], [1], [0, 0, 1, 1], [], []>} : vector<64x32xf32>, vector<32x128xf32>, vector<64x128xf32> -> vector<64x128xf32>
    %c0_156 = arith.constant 0 : index
    %c0_157 = arith.constant 0 : index
    %103 = vector.load %arg10[%c0_156, %c0_157] : memref<1x128xf32, #tpu.memory_space<vmem>>, vector<1x128xf32>
    %104 = vector.broadcast %103 : vector<1x128xf32> to vector<64x128xf32>
    %105 = arith.addf %102, %104 : vector<64x128xf32>
    %c0_i32_158 = arith.constant 0 : i32
    %106 = arith.cmpi eq, %arg1, %c0_i32_158 : i32
    %107 = arith.extui %106 : i1 to i32
    %c0_i32_159 = arith.constant 0 : i32
    %108 = arith.cmpi ne, %107, %c0_i32_159 : i32
    scf.if %108 {
      %cst_171 = arith.constant 0.000000e+00 : f32
      %121 = vector.broadcast %cst_171 : f32 to vector<1x1x128xf32>
      %c0_172 = arith.constant 0 : index
      %c0_173 = arith.constant 0 : index
      %c0_174 = arith.constant 0 : index
      %122 = vector.load %arg12[%c0_172, %c0_173, %c0_174] : memref<1x1x128xf32, #tpu.memory_space<vmem>>, vector<1x1x128xf32>
      tpu.vector_store %arg12[%c0_172, %c0_173, %c0_174], %121 {strides = array<i32>} : memref<1x1x128xf32, #tpu.memory_space<vmem>>, vector<1x1x128xf32>,
    } else {
    }
    %c0_160 = arith.constant 0 : index
    %c0_161 = arith.constant 0 : index
    %c0_162 = arith.constant 0 : index
    %109 = vector.load %arg12[%c0_160, %c0_161, %c0_162] : memref<1x1x128xf32, #tpu.memory_space<vmem>>, vector<1x1x128xf32>
    %110 = vector.shape_cast %109 : vector<1x1x128xf32> to vector<1x128xf32>
    %cst_163 = arith.constant dense<0.000000e+00> : vector<128xf32>
    %111 = vector.multi_reduction <add>, %105, %cst_163 [0] : vector<64x128xf32> to vector<128xf32>
    %112 = vector.shape_cast %111 : vector<128xf32> to vector<1x128xf32>
    %113 = arith.addf %110, %112 : vector<1x128xf32>
    %c0_164 = arith.constant 0 : index
    %c0_165 = arith.constant 0 : index
    %c0_166 = arith.constant 0 : index
    %114 = vector.load %arg12[%c0_164, %c0_165, %c0_166] : memref<1x1x128xf32, #tpu.memory_space<vmem>>, vector<1x1x128xf32>
    %115 = vector.shape_cast %114 : vector<1x1x128xf32> to vector<1x128xf32>
    %116 = vector.shape_cast %113 : vector<1x128xf32> to vector<1x1x128xf32>
    tpu.vector_store %arg12[%c0_164, %c0_165, %c0_166], %116 {strides = array<i32>} : memref<1x1x128xf32, #tpu.memory_space<vmem>>, vector<1x1x128xf32>,
    %117 = vector.shape_cast %105 : vector<64x128xf32> to vector<4x16x128xf32>
    %c0_167 = arith.constant 0 : index
    %c0_168 = arith.constant 0 : index
    %c0_169 = arith.constant 0 : index
    %c0_170 = arith.constant 0 : index
    %118 = vector.load %arg11[%c0_167, %c0_168, %c0_169, %c0_170] : memref<1x4x16x128xf32, #tpu.memory_space<vmem>>, vector<1x4x16x128xf32>
    %119 = vector.shape_cast %118 : vector<1x4x16x128xf32> to vector<4x16x128xf32>
    %120 = vector.shape_cast %117 : vector<4x16x128xf32> to vector<1x4x16x128xf32>
    tpu.vector_store %arg11[%c0_167, %c0_168, %c0_169, %c0_170], %120 {strides = array<i32>} : memref<1x4x16x128xf32, #tpu.memory_space<vmem>>, vector<1x4x16x128xf32>,
    return
  }
  func.func @transform_0(%arg0: i32, %arg1: i32) -> (i32, i32, i32, i32, i32) {
    %c4_i32 = arith.constant 4 : i32
    %0 = arith.muli %arg1, %c4_i32 : i32
    %c1_i32 = arith.constant 1 : i32
    %1 = arith.subi %0, %c1_i32 : i32
    %c0_i32 = arith.constant 0 : i32
    %2 = arith.maxsi %1, %c0_i32 : i32
    %c0_i32_0 = arith.constant 0 : i32
    %c0_i32_1 = arith.constant 0 : i32
    %c0_i32_2 = arith.constant 0 : i32
    %c0_i32_3 = arith.constant 0 : i32
    return %arg0, %2, %c0_i32_0, %c0_i32_1, %c0_i32_2 : i32, i32, i32, i32, i32
  }
  func.func @transform_1(%arg0: i32, %arg1: i32) -> (i32, i32, i32, i32, i32) {
    %c0_i32 = arith.constant 0 : i32
    %c0_i32_0 = arith.constant 0 : i32
    %c0_i32_1 = arith.constant 0 : i32
    %c0_i32_2 = arith.constant 0 : i32
    return %arg0, %arg1, %c0_i32, %c0_i32_0, %c0_i32_1 : i32, i32, i32, i32, i32
  }
  func.func @transform_2(%arg0: i32, %arg1: i32) -> (i32, i32, i32, i32, i32) {
    %c4_i32 = arith.constant 4 : i32
    %0 = arith.muli %arg1, %c4_i32 : i32
    %c4_i32_0 = arith.constant 4 : i32
    %1 = arith.addi %0, %c4_i32_0 : i32
    %c3_i32 = arith.constant 3 : i32
    %2 = arith.minsi %1, %c3_i32 : i32
    %c0_i32 = arith.constant 0 : i32
    %c0_i32_1 = arith.constant 0 : i32
    %c0_i32_2 = arith.constant 0 : i32
    %c0_i32_3 = arith.constant 0 : i32
    return %arg0, %2, %c0_i32, %c0_i32_1, %c0_i32_2 : i32, i32, i32, i32, i32
  }
  func.func @transform_3(%arg0: i32, %arg1: i32) -> (i32, i32) {
    %c0_i32 = arith.constant 0 : i32
    %c0_i32_0 = arith.constant 0 : i32
    %c0_i32_1 = arith.constant 0 : i32
    return %c0_i32, %c0_i32_0 : i32, i32
  }
  func.func @transform_4(%arg0: i32, %arg1: i32) -> (i32, i32) {
    %c0_i32 = arith.constant 0 : i32
    %c0_i32_0 = arith.constant 0 : i32
    %c0_i32_1 = arith.constant 0 : i32
    return %c0_i32, %c0_i32_0 : i32, i32
  }
  func.func @transform_5(%arg0: i32, %arg1: i32) -> (i32, i32, i32) {
    %c0_i32 = arith.constant 0 : i32
    %c0_i32_0 = arith.constant 0 : i32
    %c0_i32_1 = arith.constant 0 : i32
    %c0_i32_2 = arith.constant 0 : i32
    return %c0_i32, %c0_i32_0, %c0_i32_1 : i32, i32, i32
  }
  func.func @transform_6(%arg0: i32, %arg1: i32) -> (i32, i32) {
    %c0_i32 = arith.constant 0 : i32
    %c0_i32_0 = arith.constant 0 : i32
    %c0_i32_1 = arith.constant 0 : i32
    return %c0_i32, %c0_i32_0 : i32, i32
  }
  func.func @transform_7(%arg0: i32, %arg1: i32) -> (i32, i32) {
    %c0_i32 = arith.constant 0 : i32
    %c0_i32_0 = arith.constant 0 : i32
    %c0_i32_1 = arith.constant 0 : i32
    return %c0_i32, %c0_i32_0 : i32, i32
  }
  func.func @transform_8(%arg0: i32, %arg1: i32) -> (i32, i32) {
    %c0_i32 = arith.constant 0 : i32
    %c0_i32_0 = arith.constant 0 : i32
    %c0_i32_1 = arith.constant 0 : i32
    return %c0_i32, %c0_i32_0 : i32, i32
  }
  func.func @transform_9(%arg0: i32, %arg1: i32) -> (i32, i32, i32, i32) {
    %c0_i32 = arith.constant 0 : i32
    %c0_i32_0 = arith.constant 0 : i32
    %c0_i32_1 = arith.constant 0 : i32
    return %arg0, %arg1, %c0_i32, %c0_i32_0 : i32, i32, i32, i32
  }
  func.func @transform_10(%arg0: i32, %arg1: i32) -> (i32, i32, i32) {
    %c0_i32 = arith.constant 0 : i32
    %c0_i32_0 = arith.constant 0 : i32
    %c0_i32_1 = arith.constant 0 : i32
    return %arg0, %c0_i32, %c0_i32_0 : i32, i32, i32
  }
}

</mosaic_0001>

<bundles_post_ra>
// kernel: se_bottleneck_forward.3
= control target key start
LH: loop header
LB: loop body
LE: loop exit
PB: predicated region body
PF: predicated region fallthrough
CT: control target
= control target key end

     0   :  { %8 = vsyncpa [#allocation3], 0  ;;  %s737_s0 = inlined_call_operand.vmem [shape: f32[2,4,16,128], index: 0, kind: input, shape index: {}]   ;;  %s738_s1 = inlined_call_operand.vmem [shape: f32[2,4,16,128], index: 1, kind: input, shape index: {}]   ;;  %s739_s2 = inlined_call_operand.vmem [shape: f32[2,1,128], index: 2, kind: input, shape index: {}]   ;;  %s740_s3 = inlined_call_operand.hbm [shape: f32[2,4,16,128], index: 3, kind: output, shape index: {}]  }
   0x1   :  { %10 = vsyncpa [#allocation3 + $0x1], 0  ;;  %s617_s12 = smov 0   ;;  %s619_s13 = smov 0  }
   0x2   :  { %s621_s14 = smov 0   ;;  %s623_s15 = smov 0  }
   0x3   :  { %s625_s16 = smov 0   ;;  %s627_s17 = smov 0  }
   0x4 LB: > { %s439_s18 = sadd.s32 4294967295, %s593_s17   ;;  %s440_s19 = sadd.s32 4294967294, %s593_s17   ;;  %s593_s17 = sphi %s627_s17, %s16_s17   ;;  %s589_s16 = sphi %s625_s16, %s747_s16   ;;  %s585_s15 = sphi %s623_s15, %s746_s15   ;;  %s581_s14 = sphi %s621_s14, %s745_s14   ;;  %s577_s13 = sphi %s619_s13, %s744_s13   ;;  %s573_s12 = sphi %s617_s12, %s743_s12  }
   0x5   : > { %s28_s20 = sadd.s32 1, %s589_s16  ;;  %s119_s21 = sadd.s32 1, %s581_s14 }
   0x6   : > { %p30_p0 = scmp.ge.s32.totalorder %s28_s20, 2  ;;  %p129_p1 = scmp.ne.s32.totalorder %s581_s14, %s577_s13 }
   0x7   : > { %p130_p2 = scmp.eq.s32.totalorder %s439_s18, 1  ;;  %p135_p3 = scmp.ne.s32.totalorder %s577_s13, %s573_s12 }
   0x8   : > { %s749_s20 = smov (%p30_p0, %s28_s20), 0  ;;  %p136_p5 = scmp.eq.s32.totalorder %s440_s19, 1 }
   0x9   : > { %p657_p4 = por %p130_p2, %p129_p1  ;;  %s114_s23 = ssub.s32 %s589_s16, %s749_s20 }
   0xa   : > { %p443_p6 = scmp.ge.s32.totalorder %s593_s17, 1  ;;  %p117_p7 = scmp.eq.s32.totalorder %s114_s23, 0 }
   0xb   : > { %p664_p8 = por %p136_p5, %p135_p3  ;;  %p188_p9 = scmp.lt.s32.totalorder %s593_s17, 3 }
   0xc   : > { %s670_s25 = scalar_select %p117_p7, %s581_s14, %s119_s21  }
   0xd   : > { %p189_p10 = pnand %p443_p6, %p188_p9 }
   0xe   : > { %p231_p11 = scmp.lt.s32.totalorder (!%p189_p10), %s585_s15, 1  ;;  %s227_s27 = sand.u32 (!%p189_p10), 1, %s577_s13  }
   0xf   : > { %192 = sbr.rel (%p189_p10) target bundleno = 42 (0x2a), region = 32  ;;  %s689_s11 = sshll.u32 (!%p189_p10), %s227_s27, 6 }
  0x10   : > { %s456_s18 = sshll.u32 (!%p189_p10), %s585_s15, 6  ;;  %s229_s23 = scalar_lea.vmem (!%p189_p10), [#allocation2], %s689_s11 }
  0x11   : > { %s323_s21 = scalar_lea.hbm (!%p189_p10), %s740_s3, %s456_s18  ;;  %s309_s29 = scalar_lea.sflag (!%p189_p10), [#allocation3], %s227_s27 }
  0x14   : > { %s232_s26 = scalar_select %p231_p11, %s585_s15, 1 }
  0x16   : > { %s454_s28 = sshll.u32 %s232_s26, 6  ;;  %s254_s4 = scalar_lea.vmem %s739_s2, %s232_s26 }
  0x17   : > { %s239_s7 = scalar_lea.vmem %s737_s0, %s454_s28  ;;  %s684_s10 = scalar_lea.vmem %s738_s1, %s454_s28  ;;  %v514_v0 = vld [vmem:[%s254_s4] ss:$0 sm:$0xff] }
  0x18   : > { %v256_v1 = vld [vmem:[%s239_s7] sm:$0xff]  ;;  %v257_v3 = vld [vmem:[%s239_s7 + $0x8] sm:$0xff]  ;;  %v258_v7 = vld [vmem:[%s239_s7 + $0x10] sm:$0xff]  ;;  %s324_s26 = sshll.u32 %s229_s23, 4  ;;  %s326_s28 = sshll.u32 %s323_s21, 4  ;;  %s325_s26 = int_to_ptr.vmem [resolvable:$true] %s324_s26  ;;  %s327_s28 = int_to_ptr.hbm [resolvable:$true] %s326_s28 }
  0x19   : > { %v264_v2 = vld [vmem:[%s684_s10] sm:$0xff]  ;;  %v276_v4 = vmul.f32 %v514_v0, %v256_v1  ;;  %v265_v5 = vld [vmem:[%s684_s10 + $0x8] sm:$0xff]  ;;  %v277_v6 = vmul.f32 %v514_v0, %v257_v3  ;;  %v266_v8 = vld [vmem:[%s684_s10 + $0x10] sm:$0xff]  ;;  %v278_v9 = vmul.f32 %v514_v0, %v258_v7  ;;  %s529_s30 = sshra.s32 %s327_s28, 4  ;;  %s530_s30 = int_to_ptr.hbm [resolvable:$true] %s529_s30 }
  0x1a   : > { %v259_v10 = vld [vmem:[%s239_s7 + $0x18] sm:$0xff]  ;;  %v260_v12 = vld [vmem:[%s239_s7 + $0x20] sm:$0xff]  ;;  %v261_v18 = vld [vmem:[%s239_s7 + $0x28] sm:$0xff]  ;;  %s531_s4 = scalar_lea.hbm %s530_s30, 64  ;;  %p536_p1 = scmp.lt.s32.totalorder %s530_s30, %s740_s3 }
  0x1b   : > { %v267_v11 = vld [vmem:[%s684_s10 + $0x18] sm:$0xff]  ;;  %v284_v13 = vadd.f32 %v276_v4, %v264_v2  ;;  %v285_v14 = vadd.f32 %v277_v6, %v265_v5  ;;  %v279_v15 = vmul.f32 %v514_v0, %v259_v10  ;;  %v268_v16 = vld [vmem:[%s684_s10 + $0x20] sm:$0xff]  ;;  %v280_v17 = vmul.f32 %v514_v0, %v260_v12  ;;  %v269_v19 = vld [vmem:[%s684_s10 + $0x28] sm:$0xff]  ;;  %p532_p12 = scmp.ne.s32.totalorder %s530_s30, %s531_s4 }
  0x1c   : > { %v286_v20 = vadd.f32 %v278_v9, %v266_v8  ;;  %v281_v21 = vmul.f32 %v514_v0, %v261_v18  ;;  %v262_v22 = vld [vmem:[%s239_s7 + $0x30] sm:$0xff]  ;;  %v263_v23 = vld [vmem:[%s239_s7 + $0x38] sm:$0xff]  ;;  %s535_s7 = scalar_lea.hbm %s740_s3, 128 }
  0x1d   : > { %v292_v24 = vmax.f32 %v284_v13, 0.0  ;;  %v293_v25 = vmax.f32 %v285_v14, 0.0  ;;  %v287_v26 = vadd.f32 %v279_v15, %v267_v11  ;;  %v288_v27 = vadd.f32 %v280_v17, %v268_v16  ;;  %v270_v28 = vld [vmem:[%s684_s10 + $0x30] sm:$0xff]  ;;  %v271_v29 = vld [vmem:[%s684_s10 + $0x38] sm:$0xff]  ;;  %p533_p13 = pnand %p532_p12, %p657_p4  ;;  %p537_p2 = scmp.lt.s32.totalorder %s535_s7, %s531_s4 }
  0x1e   : > { %v294_v30 = vmax.f32 %v286_v20, 0.0  ;;  %v289_v31 = vadd.f32 %v281_v21, %v269_v19  ;;  %v282_v32 = vmul.f32 %v514_v0, %v262_v22  ;;  %v283_v33 = vmul.f32 %v514_v0, %v263_v23 }
  0x1f   : > { %300 = vst [vmem:[%s229_s23] sm:$0xff] %v292_v24  ;;  %v295_v34 = vmax.f32 %v287_v26, 0.0  ;;  %v296_v35 = vmax.f32 %v288_v27, 0.0  ;;  %p534_p0 = pneg %p533_p13  ;;  %p538_p3 = por %p537_p2, %p536_p1 }
  0x20   : > { %301 = vst [vmem:[%s229_s23 + $0x8] sm:$0xff] %v293_v25  ;;  %v297_v36 = vmax.f32 %v289_v31, 0.0  ;;  %v290_v37 = vadd.f32 %v282_v32, %v270_v28  ;;  %v291_v38 = vadd.f32 %v283_v33, %v271_v29 }
  0x21   : > { %302 = vst [vmem:[%s229_s23 + $0x10] sm:$0xff] %v294_v30  ;;  %p539_p5 = pnand %p538_p3, %p534_p0 }
  0x22   : > { %303 = vst [vmem:[%s229_s23 + $0x18] sm:$0xff] %v295_v34  ;;  %v298_v39 = vmax.f32 %v290_v37, 0.0  ;;  %v299_v40 = vmax.f32 %v291_v38, 0.0 }
  0x23   : > { %304 = vst [vmem:[%s229_s23 + $0x20] sm:$0xff] %v296_v35 }
  0x24   : > { %305 = vst [vmem:[%s229_s23 + $0x28] sm:$0xff] %v297_v36 }
  0x25   : > { %306 = vst [vmem:[%s229_s23 + $0x30] sm:$0xff] %v298_v39 }
  0x26   : > { %307 = vst [vmem:[%s229_s23 + $0x38] sm:$0xff] %v299_v40 }
  0x27   : > { %542 = shalt.err (!%p539_p5)
}
  0x28   : > { %s595_s27 = smov 128   ;;  %s596_s10 = smov 8  }
  0x29   : > { %457 = dma.vmem_to_hbm [thread:$0]  (%p657_p4), %s325_s26, 1024, %s327_s28, %s309_s29, %s595_s27, %s595_s27, %s596_s10  }
  0x2a PF: > { %p463_p6 = scmp.ge.s32.totalorder %s593_s17, 2  ;;  %s341_s11 = sand.u32 1, %s573_s12  }
  0x2b   : > { %s342_s18 = scalar_lea.sflag [#allocation3], %s341_s11 }
  0x2c   : > { %p460_p7 = pnand %p463_p6, %p664_p8 }
  0x2e   : > { %p461_p9 = pneg %p460_p7 }
  0x30   : > { %568 = dma.done.wait (%p461_p9), %s342_s18, 1024  }
  0x31   : > { %570 = vsyncadd (%p461_p9), %s342_s18, 4294966272  ;;  %s16_s17 = sadd.s32 1, %s593_s17   ;;  %s743_s12 = smov %s577_s13 }
  0x32   : > { %p13_p10 = scmp.ge.s32.totalorder %s16_s17, 4   ;;  %s744_s13 = smov %s581_s14 }
  0x33   : > { %s745_s14 = smov %s670_s25  ;;  %s746_s15 = smov %s589_s16 }
  0x34   : > { %s747_s16 = smov %s749_s20  ;;  %15 = sbr.rel (!%p13_p10) target bundleno = 4 (0x4), region = 73 }
  0x39   :  { %348 = vsyncpa [#allocation3], 1 }
  0x3a   :  { %350 = vsyncpa [#allocation3 + $0x1], 1 }

// kernel: se_bottleneck_forward.2
= control target key start
LH: loop header
LB: loop body
LE: loop exit
PB: predicated region body
PF: predicated region fallthrough
CT: control target
= control target key end

     0   :  { %s4587_s13 = smov 0   ;;  %s4589_s14 = smov 0   ;;  %s6165_s0 = inlined_call_operand.vmem [shape: f32[2,4,4,4,128], index: 0, kind: input, shape index: {}, may-alias: {0,1,2}]   ;;  %s6166_s1 = inlined_call_operand.vmem [shape: f32[2,4,4,4,128], index: 1, kind: input, shape index: {}, may-alias: {0,1,2}]   ;;  %s6167_s2 = inlined_call_operand.vmem [shape: f32[2,4,4,4,128], index: 2, kind: input, shape index: {}, may-alias: {0,1,2}]   ;;  %s6168_s3 = inlined_call_operand.vmem [shape: f32[128,32], index: 3, kind: input, shape index: {}]   ;;  %s6169_s4 = inlined_call_operand.vmem [shape: f32[1,32], index: 4, kind: input, shape index: {}]   ;;  %s6170_s5 = inlined_call_operand.vmem [shape: f32[3,288,32], index: 5, kind: input, shape index: {}]   ;;  %s6171_s6 = inlined_call_operand.vmem [shape: f32[1,32], index: 6, kind: input, shape index: {}]   ;;  %s6172_s7 = inlined_call_operand.vmem [shape: f32[32,128], index: 7, kind: input, shape index: {}]   ;;  %s6173_s8 = inlined_call_operand.vmem [shape: f32[1,128], index: 8, kind: input, shape index: {}]   ;;  %s6174_s9 = inlined_call_operand.vmem [shape: f32[2,4,16,128], index: 9, kind: output, shape index: {0}]   ;;  %s6175_s10 = inlined_call_operand.vmem [shape: f32[2,1,128], index: 10, kind: output, shape index: {1}]  }
   0x1   :  { %s4591_s15 = smov 0  }
   0x2 LB: > { %s33_s16 = sadd.s32 1, %s4522_s14  ;;  %p3993_p0 = scmp.ge.s32.totalorder %s4526_s15, 1  ;;  %s4526_s15 = sphi %s4591_s15, %s21_s15   ;;  %s4522_s14 = sphi %s4589_s14, %s6257_s14   ;;  %s4518_s13 = sphi %s4587_s13, %s6256_s13  }
   0x3   : > { %p35_p1 = scmp.ge.s32.totalorder %s33_s16, 2  ;;  %p401_p2 = scmp.lt.s32.totalorder %s4526_s15, 3 }
   0x5   : > { %s6259_s16 = smov (%p35_p1, %s33_s16), 0  ;;  %p402_p3 = pnand %p3993_p0, %p401_p2 }
   0x7   : > { %405 = sbr.rel (%p402_p3) target bundleno = 1229 (0x4cd), region = 56 }
   0xc   : > { %v576_v0 = vld [vmem:[%s6168_s3 + $0x78] sm:$0xff]  ;;  %v575_v1 = vld [vmem:[%s6168_s3 + $0x70] sm:$0xff]  ;;  %p482_p4 = scmp.lt.s32.totalorder %s4518_s13, 1  ;;  %v574_v2 = vld [vmem:[%s6168_s3 + $0x68] sm:$0xff]  ;;  %vm761_vm0 = vcmask 259072   ;;  %v6176_v44 = vmov 0.0  }
   0xd   : > { %660 = vmatpush.msra.mxu0 %v576_v0  ;;  %v573_v3 = vld [vmem:[%s6168_s3 + $0x60] sm:$0xff]  ;;  %v572_v4 = vld [vmem:[%s6168_s3 + $0x58] sm:$0xff]  ;;  %v571_v8 = vld [vmem:[%s6168_s3 + $0x50] sm:$0xff]  ;;  %768 = vst.msk [vmem:[#allocation2 + $0x30] sm:$0x3f] %vm761_vm0, %v6176_v44  ;;  %vm799_vm1 = vcmask 257024  }
   0xe   : > { %s6261_s13 = smov (!%p482_p4, %s4518_s13), 1  ;;  %v570_v12 = vld [vmem:[%s6168_s3 + $0x48] sm:$0xff]  ;;  %v569_v13 = vld [vmem:[%s6168_s3 + $0x40] sm:$0xff]  ;;  %v568_v14 = vld [vmem:[%s6168_s3 + $0x38] sm:$0xff]  ;;  %769 = vst.msk [vmem:[#allocation2 + $0x38] sm:$0x3f] %vm761_vm0, %v6176_v44 }
   0xf   : > { %661 = vmatpush.msra.mxu0 %v575_v1  ;;  %s4620_s25 = sshll.u32 %s6261_s13, 6  ;;  %v567_v16 = vld [vmem:[%s6168_s3 + $0x30] sm:$0xff]  ;;  %v566_v18 = vld [vmem:[%s6168_s3 + $0x28] sm:$0xff]  ;;  %v565_v19 = vld [vmem:[%s6168_s3 + $0x20] sm:$0xff]  ;;  %770 = vst.msk [vmem:[#allocation2 + $0x40] sm:$0x3f] %vm761_vm0, %v6176_v44 }
  0x10   : > { %s490_s30 = scalar_lea.vmem %s6165_s0, %s4620_s25  ;;  %s4633_s17 = scalar_lea.vmem %s6166_s1, %s4620_s25  ;;  %v564_v20 = vld [vmem:[%s6168_s3 + $0x18] sm:$0xff]  ;;  %v563_v24 = vld [vmem:[%s6168_s3 + $0x10] sm:$0xff]  ;;  %v562_v25 = vld [vmem:[%s6168_s3 + $0x8] sm:$0xff]  ;;  %780 = vst.msk [vmem:[#allocation2 + $0x90] sm:$0x3f] %vm761_vm0, %v6176_v44  ;;  %vm1563_vm2 = vcmask 261120  }
  0x11   : > { %662 = vmatpush.msra.mxu0 %v574_v2  ;;  %v537_v5 = vld [vmem:[%s490_s30] sm:$0xf]  ;;  %v538_v6 = vld [vmem:[%s490_s30 + $0x4] sm:$0xf]  ;;  %v539_v7 = vld [vmem:[%s490_s30 + $0x8] sm:$0xf] }
  0x12   : > { %605 = vst [vmem:[#allocation1] ss:$2 sm:$0xff] %v537_v5  ;;  %v540_v9 = vld [vmem:[%s490_s30 + $0xc] sm:$0xf]  ;;  %v541_v10 = vld [vmem:[%s4633_s17] sm:$0xf] }
  0x13   : > { %663 = vmatpush.msra.mxu0 %v573_v3  ;;  %607 = vst [vmem:[#allocation1 + $0x1] ss:$2 sm:$0xff] %v538_v6  ;;  %v542_v11 = vld [vmem:[%s4633_s17 + $0x4] sm:$0xf]  ;;  %v543_v15 = vld [vmem:[%s4633_s17 + $0x8] sm:$0xf] }
  0x14   : > { %609 = vst [vmem:[#allocation1 + $0x10] ss:$2 sm:$0xff] %v539_v7  ;;  %v544_v17 = vld [vmem:[%s4633_s17 + $0xc] sm:$0xf]  ;;  %v545_v22 = vld [vmem:[%s4633_s17 + $0x10] sm:$0xf] }
  0x15   : > { %664 = vmatpush.msra.mxu0 %v572_v4  ;;  %611 = vst [vmem:[#allocation1 + $0x11] ss:$2 sm:$0xff] %v540_v9  ;;  %v546_v23 = vld [vmem:[%s4633_s17 + $0x14] sm:$0xf]  ;;  %v561_v26 = vld [vmem:[%s6168_s3] sm:$0xff]  ;;  %s4111_s27 = sadd.s32 48, %s4620_s25 }
  0x16   : > { %613 = vst [vmem:[#allocation1 + $0x20] ss:$2 sm:$0xff] %v541_v10  ;;  %v547_v28 = vld [vmem:[%s4633_s17 + $0x18] sm:$0xf]  ;;  %v548_v29 = vld [vmem:[%s4633_s17 + $0x1c] sm:$0xf]  ;;  %s518_s30 = scalar_lea.vmem %s6167_s2, %s4111_s27 }
  0x17   : > { %665 = vmatpush.msra.mxu0 %v571_v8  ;;  %615 = vst [vmem:[#allocation1 + $0x21] ss:$2 sm:$0xff] %v542_v11  ;;  %v549_v31 = vld [vmem:[%s4633_s17 + $0x20] sm:$0xf]  ;;  %v550_v32 = vld [vmem:[%s4633_s17 + $0x24] sm:$0xf] }
  0x18   : > { %617 = vst [vmem:[#allocation1 + $0x30] ss:$2 sm:$0xff] %v543_v15  ;;  %v551_v34 = vld [vmem:[%s4633_s17 + $0x28] sm:$0xf]  ;;  %v552_v35 = vld [vmem:[%s4633_s17 + $0x2c] sm:$0xf] }
  0x19   : > { %666 = vmatpush.msra.mxu0 %v570_v12  ;;  %619 = vst [vmem:[#allocation1 + $0x31] ss:$2 sm:$0xff] %v544_v17  ;;  %v557_v40 = vld [vmem:[%s518_s30] sm:$0xf]  ;;  %v558_v41 = vld [vmem:[%s518_s30 + $0x4] sm:$0xf] }
  0x1a   : > { %v620_v21 = vld.sshfl [vmem:[#allocation1] sm:$0xff pattern:$0x75316420]  ;;  %v559_v42 = vld [vmem:[%s518_s30 + $0x8] sm:$0xf]  ;;  %s4530_s18 = smov 64  }
  0x1b   : > { %667 = vmatpush.msra.mxu0 %v569_v13  ;;  %624 = vst [vmem:[#allocation1] ss:$2 sm:$0xff] %v545_v22  ;;  %v560_v43 = vld [vmem:[%s518_s30 + $0xc] sm:$0xf]  ;;  %v838_v46 = vld [vmem:[#allocation2 + $0x30] sm:$0xf]  ;;  %s6142_s30 = scalar_lea.vmem %s6175_s10, %s6261_s13 }
  0x1c   : > { %625 = vst [vmem:[#allocation1 + $0x1] ss:$2 sm:$0xff] %v546_v23  ;;  %v621_v27 = vld.sshfl [vmem:[#allocation1 + $0x10] sm:$0xff pattern:$0x75316420]  ;;  %s4531_s19 = smov 96  }
  0x1d   : > { %668 = vmatpush.msra.mxu0 %v568_v14  ;;  %626 = vst [vmem:[#allocation1 + $0x10] ss:$2 sm:$0xff] %v547_v28  ;;  %v4729_v49 = vld [vmem:[%s6169_s4] ss:$0 sm:$0xff]  ;;  %v846_v61 = vld [vmem:[#allocation2 + $0x90] sm:$0xf] }
  0x1e   : > { %627 = vst [vmem:[#allocation1 + $0x11] ss:$2 sm:$0xff] %v548_v29  ;;  %v622_v30 = vld.sshfl [vmem:[#allocation1 + $0x20] sm:$0xff pattern:$0x75316420]  ;;  %vm1572_vm3 = vcmask 523264  }
  0x1f   : > { %669 = vmatpush.msra.mxu0 %v567_v16  ;;  %628 = vst [vmem:[#allocation1 + $0x20] ss:$2 sm:$0xff] %v549_v31  ;;  %v553_v1 = vld [vmem:[%s4633_s17 + $0x30] sm:$0xf]  ;;  %v554_v2 = vld [vmem:[%s4633_s17 + $0x34] sm:$0xf] }
  0x20   : > { %629 = vst [vmem:[#allocation1 + $0x21] ss:$2 sm:$0xff] %v550_v32  ;;  %v623_v33 = vld.sshfl [vmem:[#allocation1 + $0x30] sm:$0xff pattern:$0x75316420]  ;;  %vm1581_vm4 = vcmask 785408  }
  0x21   : > { %670 = vmatpush.msra.mxu0 %v566_v18  ;;  %630 = vst [vmem:[#allocation1 + $0x30] ss:$2 sm:$0xff] %v551_v34  ;;  %v555_v3 = vld [vmem:[%s4633_s17 + $0x38] sm:$0xf]  ;;  %v556_v4 = vld [vmem:[%s4633_s17 + $0x3c] sm:$0xf] }
  0x22   : > { %631 = vst [vmem:[#allocation1 + $0x31] ss:$2 sm:$0xff] %v552_v35  ;;  %s4529_s17 = smov 32  }
  0x23   : > { %671 = vmatpush.msra.mxu0 %v565_v19  ;;  %v632_v36 = vld.sshfl [vmem:[#allocation1] sm:$0xff pattern:$0x75316420]  ;;  %762 = vst.msk [vmem:[#allocation2] sm:$0x3f] %vm761_vm0, %v6176_v44 }
  0x24   : > { %763 = vst.msk [vmem:[#allocation2 + $0x8] sm:$0x3f] %vm761_vm0, %v6176_v44 }
  0x25   : > { %672 = vmatpush.msra.mxu0 %v564_v20  ;;  %v633_v37 = vld.sshfl [vmem:[#allocation1 + $0x10] sm:$0xff pattern:$0x75316420]  ;;  %764 = vst.msk [vmem:[#allocation2 + $0x10] sm:$0x3f] %vm761_vm0, %v6176_v44 }
  0x26   : > { %765 = vst.msk [vmem:[#allocation2 + $0x18] sm:$0x3f] %vm761_vm0, %v6176_v44 }
  0x27   : > { %673 = vmatpush.msra.mxu0 %v563_v24  ;;  %v634_v38 = vld.sshfl [vmem:[#allocation1 + $0x20] sm:$0xff pattern:$0x75316420]  ;;  %766 = vst.msk [vmem:[#allocation2 + $0x20] sm:$0x3f] %vm761_vm0, %v6176_v44 }
  0x28   : > { %640 = vst [vmem:[#allocation1 + $0x20] ss:$2 sm:$0xff] %v557_v40 }
  0x29   : > { %674 = vmatpush.msra.mxu0 %v562_v25  ;;  %v635_v39 = vld.sshfl [vmem:[#allocation1 + $0x30] sm:$0xff pattern:$0x75316420]  ;;  %641 = vst [vmem:[#allocation1 + $0x21] ss:$2 sm:$0xff] %v558_v41 }
  0x2a   : > { %642 = vst [vmem:[#allocation1 + $0x30] ss:$2 sm:$0xff] %v559_v42  ;;  %v834_v9 = vld [vmem:[#allocation2] sm:$0xf] }
  0x2b   : > { %675 = vmatpush.msra.mxu0 %v561_v26  ;;  %643 = vst [vmem:[#allocation1 + $0x31] ss:$2 sm:$0xff] %v560_v43  ;;  %v835_v10 = vld [vmem:[#allocation2 + $0x8] sm:$0xf]  ;;  %v850_v22 = vld [vmem:[#allocation2 + $0x1] sm:$0xf] }
  0x2c   : > { %676 = vmatmul.f32.vlgmr.msra.gmra.mxu0 %v620_v21  ;;  %767 = vst.msk [vmem:[#allocation2 + $0x28] sm:$0x3f] %vm761_vm0, %v6176_v44  ;;  %v836_v12 = vld [vmem:[#allocation2 + $0x10] sm:$0xf]  ;;  %v851_v23 = vld [vmem:[#allocation2 + $0x9] sm:$0xf] }
  0x2d   : > { %771 = vst.msk [vmem:[#allocation2 + $0x48] sm:$0x3f] %vm761_vm0, %v6176_v44  ;;  %v837_v13 = vld [vmem:[#allocation2 + $0x18] sm:$0xf]  ;;  %v866_v34 = vld [vmem:[#allocation2 + $0x2] sm:$0xf] }
  0x2e   : > { %772 = vst.msk [vmem:[#allocation2 + $0x50] sm:$0x3f] %vm761_vm0, %v6176_v44  ;;  %v867_v35 = vld [vmem:[#allocation2 + $0xa] sm:$0xf] }
  0x2f   : > { %773 = vst.msk [vmem:[#allocation2 + $0x58] sm:$0x3f] %vm761_vm0, %v6176_v44 }
  0x30   : > { %v4694_v45 = vld.sshfl [vmem:[#allocation1 + $0x20] sm:$0xff pattern:$0x75316420]  ;;  %774 = vst.msk [vmem:[#allocation2 + $0x60] sm:$0x3f] %vm761_vm0, %v6176_v44 }
  0x31   : > { %1004 = vst [vmem:[#allocation1 + $0x20] ss:$2 sm:$0xff] %v838_v46 }
  0x32   : > { %775 = vst.msk [vmem:[#allocation2 + $0x68] sm:$0x3f] %vm761_vm0, %v6176_v44  ;;  %v647_v56 = vld.sshfl [vmem:[#allocation1 + $0x30] sm:$0xff pattern:$0x75316420] }
  0x33   : > { %776 = vst.msk [vmem:[#allocation2 + $0x70] sm:$0x3f] %vm761_vm0, %v6176_v44 }
  0x34   : > { %679 = vmatmul.f32.gmra.mxu0 %v621_v27  ;;  %777 = vst.msk [vmem:[#allocation2 + $0x78] sm:$0x3f] %vm761_vm0, %v6176_v44 }
  0x35   : > { %778 = vst.msk [vmem:[#allocation2 + $0x80] sm:$0x3f] %vm761_vm0, %v6176_v44 }
  0x36   : > { %779 = vst.msk [vmem:[#allocation2 + $0x88] sm:$0x3f] %vm761_vm0, %v6176_v44 }
  0x37   : > { %781 = vst.msk [vmem:[#allocation2 + $0x98] sm:$0x3f] %vm761_vm0, %v6176_v44  ;;  %v842_v14 = vld [vmem:[#allocation2 + $0x60] sm:$0xf] }
  0x38   : > { %782 = vst.msk [vmem:[#allocation2 + $0xa0] sm:$0x3f] %vm761_vm0, %v6176_v44  ;;  %v858_v29 = vld [vmem:[#allocation2 + $0x61] sm:$0xf] }
  0x39   : > { %783 = vst.msk [vmem:[#allocation2 + $0xa8] sm:$0x3f] %vm761_vm0, %v6176_v44  ;;  %v874_v40 = vld [vmem:[#allocation2 + $0x62] sm:$0xf] }
  0x3a   : > { %784 = vst.msk [vmem:[#allocation2 + $0xb0] sm:$0x3f] %vm761_vm0, %v6176_v44 }
  0x3b   : > { %785 = vst.msk [vmem:[#allocation2 + $0xb8] sm:$0x3f] %vm761_vm0, %v6176_v44 }
  0x3c   : > { %682 = vmatmul.f32.gmra.mxu0 %v622_v30  ;;  %786 = vst.msk [vmem:[#allocation2 + $0xc0] sm:$0x3f] %vm761_vm0, %v6176_v44 }
  0x3d   : > { %787 = vst.msk [vmem:[#allocation2 + $0xc8] sm:$0x3f] %vm761_vm0, %v6176_v44 }
  0x3e   : > { %788 = vst.msk [vmem:[#allocation2 + $0xd0] sm:$0x3f] %vm761_vm0, %v6176_v44 }
  0x3f   : > { %789 = vst.msk [vmem:[#allocation2 + $0xd8] sm:$0x3f] %vm761_vm0, %v6176_v44 }
  0x40   : > { %790 = vst.msk [vmem:[#allocation2 + $0xe0] sm:$0x3f] %vm761_vm0, %v6176_v44 }
  0x41   : > { %791 = vst.msk [vmem:[#allocation2 + $0xe8] sm:$0x3f] %vm761_vm0, %v6176_v44 }
  0x42   : > { %792 = vst.msk [vmem:[#allocation2 + $0xf0] sm:$0x3f] %vm761_vm0, %v6176_v44 }
  0x43   : > { %793 = vst.msk [vmem:[#allocation2 + $0xf8] sm:$0x3f] %vm761_vm0, %v6176_v44 }
  0x44   : > { %685 = vmatmul.f32.gmra.mxu0 %v623_v33  ;;  %794 = vst.msk [vmem:[#allocation2 + $0x100] sm:$0x3f] %vm761_vm0, %v6176_v44 }
  0x45   : > { %795 = vst.msk [vmem:[#allocation2 + $0x108] sm:$0x3f] %vm761_vm0, %v6176_v44 }
  0x46   : > { %796 = vst.msk [vmem:[#allocation2 + $0x110] sm:$0x3f] %vm761_vm0, %v6176_v44 }
  0x47   : > { %797 = vst.msk [vmem:[#allocation2 + $0x118] sm:$0x3f] %vm761_vm0, %v6176_v44 }
  0x48   : > { %636 = vst [vmem:[#allocation1] ss:$2 sm:$0xff] %v553_v1 }
  0x49   : > { %637 = vst [vmem:[#allocation1 + $0x1] ss:$2 sm:$0xff] %v554_v2 }
  0x4a   : > { %638 = vst [vmem:[#allocation1 + $0x10] ss:$2 sm:$0xff] %v555_v3 }
  0x4b   : > { %639 = vst [vmem:[#allocation1 + $0x11] ss:$2 sm:$0xff] %v556_v4 }
  0x4c   : > { %688 = vmatmul.f32.gmra.mxu0 %v632_v36 }
  0x50   : > { %v644_v8 = vld.sshfl [vmem:[#allocation1] sm:$0xff pattern:$0x75316420] }
  0x51   : > { %996 = vst [vmem:[#allocation1] ss:$2 sm:$0xff] %v834_v9 }
  0x52   : > { %998 = vst [vmem:[#allocation1 + $0x1] ss:$2 sm:$0xff] %v835_v10  ;;  %v645_v11 = vld.sshfl [vmem:[#allocation1 + $0x10] sm:$0xff pattern:$0x75316420] }
  0x53   : > { %1000 = vst [vmem:[#allocation1 + $0x10] ss:$2 sm:$0xff] %v836_v12  ;;  %v885_v10 = vld [vmem:[#allocation2 + $0x18] sm:$0xf]  ;;  %v886_v12 = vld [vmem:[#allocation2 + $0x20] sm:$0xf] }
  0x54   : > { %691 = vmatmul.f32.gmra.mxu0 %v633_v37  ;;  %1002 = vst [vmem:[#allocation1 + $0x11] ss:$2 sm:$0xff] %v837_v13  ;;  %v852_v37 = vld [vmem:[#allocation2 + $0x11] sm:$0xf] }
  0x59   : > { %v4778_v17 = vld.sshfl [vmem:[#allocation1] sm:$0xff pattern:$0x75316420] }
  0x5a   : > { %6178 = vst [vmem:[#allocation4_spill] sm:$0xff] %v4778_v17 }
  0x5b   : > { %1015 = vst [vmem:[#allocation1] ss:$2 sm:$0xff] %v842_v14  ;;  %v4782_v20 = vld.sshfl [vmem:[#allocation1 + $0x10] sm:$0xff pattern:$0x75316420] }
  0x5c   : > { %694 = vmatmul.f32.gmra.mxu0 %v634_v38  ;;  %6179 = vst [vmem:[#allocation5_spill] sm:$0xff] %v4782_v20  ;;  %v853_v38 = vld [vmem:[#allocation2 + $0x19] sm:$0xf] }
  0x64   : > { %697 = vmatmul.f32.gmra.mxu0 %v635_v39 }
  0x6c   : > { %700 = vmatmul.f32.gmra.mxu0 %v644_v8 }
  0x74   : > { %703 = vmatmul.f32.gmra.mxu0 %v645_v11 }
  0x7c   : > { %706 = vmatmul.f32.gmra.mxu0 %v4694_v45 }
  0x84   : > { %709 = vmatmul.f32.gmra.mxu0 %v647_v56 }
  0xa9   : > { %v677_v47 = vpop.f32.mrf.mxu0 }
  0xaa   : > { %v883_v47 = vld [vmem:[#allocation2 + $0x8] sm:$0xf] }
  0xb1   : > { %v680_v48 = vpop.f32.mrf.mxu0 }
  0xb2   : > { %v884_v48 = vld [vmem:[#allocation2 + $0x10] sm:$0xf] }
  0xb9   : > { %v683_v50 = vpop.f32.mrf.mxu0 }
  0xba   : > { %v684_v51 = vadd.f32 %v4729_v49, %v683_v50 }
  0xbc   : > { %v715_v52 = vmax.f32 %v684_v51, 0.0 }
  0xbe   : > { %v739_v53 = vrot.slane %v715_v52, 4  ;;  %800 = vst.msk [vmem:[#allocation2 + $0x39] sm:$0xf] %vm799_vm1, %v715_v52  ;;  %v868_v52 = vld [vmem:[#allocation2 + $0x12] sm:$0xf] }
  0xc0   : > { %801 = vst.msk [vmem:[#allocation2 + $0x41] sm:$0xf] %vm799_vm1, %v739_v53 }
  0xc1   : > { %v686_v54 = vpop.f32.mrf.mxu0 }
  0xc2   : > { %v687_v58 = vadd.f32 %v4729_v49, %v686_v54 }
  0xc4   : > { %v716_v59 = vmax.f32 %v687_v58, 0.0 }
  0xc5   : > { %v839_v55 = vld [vmem:[#allocation2 + $0x38] sm:$0xf] }
  0xc6   : > { %1006 = vst [vmem:[#allocation1 + $0x21] ss:$2 sm:$0xff] %v839_v55  ;;  %v740_v62 = vrot.slane %v716_v59, 4  ;;  %v869_v55 = vld [vmem:[#allocation2 + $0x1a] sm:$0xf] }
  0xc7   : > { %v840_v57 = vld [vmem:[#allocation2 + $0x40] sm:$0xf]  ;;  %802 = vst.msk [vmem:[#allocation2 + $0x49] sm:$0xf] %vm799_vm1, %v716_v59 }
  0xc8   : > { %1008 = vst [vmem:[#allocation1 + $0x30] ss:$2 sm:$0xff] %v840_v57  ;;  %v854_v57 = vld [vmem:[#allocation2 + $0x31] sm:$0xf]  ;;  %v1685_v20 = vld [vmem:[#allocation2 + $0x42] sm:$0xf] }
  0xc9   : > { %v689_v60 = vpop.f32.mrf.mxu0  ;;  %803 = vst.msk [vmem:[#allocation2 + $0x51] sm:$0xf] %vm799_vm1, %v740_v62 }
  0xca   : > { %v690_v0 = vadd.f32 %v4729_v49, %v689_v60 }
  0xcc   : > { %v717_v5 = vmax.f32 %v690_v0, 0.0  ;;  %v855_v0 = vld [vmem:[#allocation2 + $0x39] sm:$0xf] }
  0xcd   : > { %v4765_v63 = vld.sshfl [vmem:[#allocation1 + $0x20] sm:$0xff pattern:$0x75316420] }
  0xce   : > { %6177 = vst [vmem:[#allocation3_spill] sm:$0xff] %v4765_v63  ;;  %v841_v6 = vld [vmem:[#allocation2 + $0x48] sm:$0xf]  ;;  %v741_v7 = vrot.slane %v717_v5, 4  ;;  %v971_v63 = vld [vmem:[#allocation2 + $0x5a] sm:$0xf] }
  0xcf   : > { %1019 = vst [vmem:[#allocation1 + $0x20] ss:$2 sm:$0xff] %v846_v61 }
  0xd0   : > { %804 = vst.msk [vmem:[#allocation2 + $0x69] sm:$0xf] %vm799_vm1, %v717_v5  ;;  %v899_v5 = vld [vmem:[#allocation2 + $0x9] sm:$0xf] }
  0xd1   : > { %1010 = vst [vmem:[#allocation1 + $0x31] ss:$2 sm:$0xff] %v841_v6  ;;  %v692_v15 = vpop.f32.mrf.mxu0  ;;  %v900_v6 = vld [vmem:[#allocation2 + $0x11] sm:$0xf] }
  0xd2   : > { %805 = vst.msk [vmem:[#allocation2 + $0x71] sm:$0xf] %vm799_vm1, %v741_v7  ;;  %v693_v18 = vadd.f32 %v4729_v49, %v692_v15  ;;  %v862_v7 = vld [vmem:[#allocation2 + $0x91] sm:$0xf] }
  0xd4   : > { %v718_v21 = vmax.f32 %v693_v18, 0.0 }
  0xd6   : > { %v742_v25 = vrot.slane %v718_v21, 4  ;;  %806 = vst.msk [vmem:[#allocation2 + $0x79] sm:$0xf] %vm799_vm1, %v718_v21 }
  0xd7   : > { %v843_v16 = vld [vmem:[#allocation2 + $0x68] sm:$0xf] }
  0xd8   : > { %1016 = vst [vmem:[#allocation1 + $0x1] ss:$2 sm:$0xff] %v843_v16  ;;  %v859_v32 = vld [vmem:[#allocation2 + $0x69] sm:$0xf]  ;;  %v870_v16 = vld [vmem:[#allocation2 + $0x32] sm:$0xf] }
  0xd9   : > { %v844_v19 = vld [vmem:[#allocation2 + $0x70] sm:$0xf]  ;;  %v695_v26 = vpop.f32.mrf.mxu0  ;;  %807 = vst.msk [vmem:[#allocation2 + $0x81] sm:$0xf] %vm799_vm1, %v742_v25  ;;  %v875_v42 = vld [vmem:[#allocation2 + $0x6a] sm:$0xf] }
  0xda   : > { %1017 = vst [vmem:[#allocation1 + $0x10] ss:$2 sm:$0xff] %v844_v19  ;;  %v696_v27 = vadd.f32 %v4729_v49, %v695_v26  ;;  %v860_v43 = vld [vmem:[#allocation2 + $0x71] sm:$0xf]  ;;  %v891_v58 = vld [vmem:[#allocation2 + $0x68] sm:$0xf] }
  0xdb   : > { %v4803_v54 = vld.sshfl [vmem:[#allocation1 + $0x30] sm:$0xff pattern:$0x75316420]  ;;  %v892_v59 = vld [vmem:[#allocation2 + $0x70] sm:$0xf] }
  0xdc   : > { %v719_v28 = vmax.f32 %v696_v27, 0.0  ;;  %6182 = vst [vmem:[#allocation8_spill] sm:$0xff] %v4803_v54  ;;  %v876_v1 = vld [vmem:[#allocation2 + $0x72] sm:$0xf]  ;;  %v907_v18 = vld [vmem:[#allocation2 + $0x69] sm:$0xf] }
  0xdd   : > { %v845_v33 = vld [vmem:[#allocation2 + $0x78] sm:$0xf]  ;;  %v908_v21 = vld [vmem:[#allocation2 + $0x71] sm:$0xf]  ;;  %v915_v25 = vld [vmem:[#allocation2 + $0xa] sm:$0xf] }
  0xde   : > { %v743_v30 = vrot.slane %v719_v28, 4  ;;  %808 = vst.msk [vmem:[#allocation2 + $0x99] sm:$0xf] %vm799_vm1, %v719_v28  ;;  %v861_v46 = vld [vmem:[#allocation2 + $0x79] sm:$0xf] }
  0xdf   : > { %v4784_v24 = vld.sshfl [vmem:[#allocation1] sm:$0xff pattern:$0x75316420]  ;;  %1018 = vst [vmem:[#allocation1 + $0x11] ss:$2 sm:$0xff] %v845_v33 }
  0xe0   : > { %6180 = vst [vmem:[#allocation6_spill] sm:$0xff] %v4784_v24  ;;  %v877_v3 = vld [vmem:[#allocation2 + $0x7a] sm:$0xf]  ;;  %v916_v26 = vld [vmem:[#allocation2 + $0x12] sm:$0xf] }
  0xe1   : > { %1051 = vst [vmem:[#allocation1] ss:$2 sm:$0xff] %v850_v22  ;;  %v698_v62 = vpop.f32.mrf.mxu0 }
  0xe2   : > { %1053 = vst [vmem:[#allocation1 + $0x1] ss:$2 sm:$0xff] %v851_v23  ;;  %v699_v4 = vadd.f32 %v4729_v49, %v698_v62  ;;  %v871_v23 = vld [vmem:[#allocation2 + $0x3a] sm:$0xf] }
  0xe3   : > { %809 = vst.msk [vmem:[#allocation2 + $0xa1] sm:$0xf] %vm799_vm1, %v743_v30  ;;  %v893_v30 = vld [vmem:[#allocation2 + $0x78] sm:$0xf] }
  0xe4   : > { %v720_v9 = vmax.f32 %v699_v4, 0.0  ;;  %v856_v4 = vld [vmem:[#allocation2 + $0x41] sm:$0xf] }
  0xe5   : > { %v847_v51 = vld [vmem:[#allocation2 + $0x98] sm:$0xf] }
  0xe6   : > { %v4795_v39 = vld.sshfl [vmem:[#allocation1 + $0x10] sm:$0xff pattern:$0x75316420]  ;;  %1020 = vst [vmem:[#allocation1 + $0x21] ss:$2 sm:$0xff] %v847_v51  ;;  %v744_v15 = vrot.slane %v720_v9, 4 }
  0xe7   : > { %6181 = vst [vmem:[#allocation7_spill] sm:$0xff] %v4795_v39  ;;  %v863_v13 = vld [vmem:[#allocation2 + $0x99] sm:$0xf]  ;;  %v888_v51 = vld [vmem:[#allocation2 + $0x40] sm:$0xf] }
  0xe8   : > { %1055 = vst [vmem:[#allocation1 + $0x10] ss:$2 sm:$0xff] %v852_v37  ;;  %v895_v62 = vld [vmem:[#allocation2 + $0x98] sm:$0xf]  ;;  %v954_v39 = vld [vmem:[#allocation2 + $0x51] sm:$0xf] }
  0xe9   : > { %v4790_v31 = vld.sshfl [vmem:[#allocation1] sm:$0xff pattern:$0x75316420]  ;;  %1057 = vst [vmem:[#allocation1 + $0x11] ss:$2 sm:$0xff] %v853_v38 }
  0xea   : > { %1070 = vst [vmem:[#allocation1] ss:$2 sm:$0xff] %v858_v29  ;;  %v848_v53 = vld [vmem:[#allocation2 + $0xa0] sm:$0xf]  ;;  %v878_v29 = vld [vmem:[#allocation2 + $0x92] sm:$0xf] }
  0xeb   : > { %1071 = vst [vmem:[#allocation1 + $0x1] ss:$2 sm:$0xff] %v859_v32  ;;  %v894_v32 = vld [vmem:[#allocation2 + $0x80] sm:$0xf]  ;;  %v901_v38 = vld [vmem:[#allocation2 + $0x19] sm:$0xf] }
  0xec   : > { %1021 = vst [vmem:[#allocation1 + $0x30] ss:$2 sm:$0xff] %v848_v53  ;;  %v933_v53 = vld [vmem:[#allocation2 + $0x18] sm:$0xf]  ;;  %v1724_v54 = vld [vmem:[#allocation2 + $0xa1] sm:$0xf] }
  0xed   : > { %v4809_v61 = vld.sshfl [vmem:[#allocation1 + $0x20] sm:$0xff pattern:$0x75316420]  ;;  %810 = vst.msk [vmem:[#allocation2 + $0xa9] sm:$0xf] %vm799_vm1, %v720_v9 }
  0xee   : > { %6183 = vst [vmem:[#allocation9_spill] sm:$0xff] %v4809_v61  ;;  %v917_v9 = vld [vmem:[#allocation2 + $0x1a] sm:$0xf]  ;;  %v701_v61 = vpop.f32.mrf.mxu0 }
  0xef   : > { %1059 = vst [vmem:[#allocation1 + $0x20] ss:$2 sm:$0xff] %v854_v57  ;;  %v909_v57 = vld [vmem:[#allocation2 + $0x79] sm:$0xf] }
  0xf0   : > { %v4799_v45 = vld.sshfl [vmem:[#allocation1 + $0x10] sm:$0xff pattern:$0x75316420]  ;;  %1061 = vst [vmem:[#allocation1 + $0x21] ss:$2 sm:$0xff] %v855_v0 }
  0xf1   : > { %1072 = vst [vmem:[#allocation1 + $0x10] ss:$2 sm:$0xff] %v860_v43  ;;  %v896_v0 = vld [vmem:[#allocation2 + $0xa0] sm:$0xf] }
  0xf2   : > { %v4793_v36 = vld.sshfl [vmem:[#allocation1] sm:$0xff pattern:$0x75316420]  ;;  %1073 = vst [vmem:[#allocation1 + $0x11] ss:$2 sm:$0xff] %v861_v46 }
  0xf3   : > { %1122 = vst [vmem:[#allocation1] ss:$2 sm:$0xff] %v866_v34  ;;  %v879_v34 = vld [vmem:[#allocation2 + $0x9a] sm:$0xf] }
  0xf4   : > { %1124 = vst [vmem:[#allocation1 + $0x1] ss:$2 sm:$0xff] %v867_v35  ;;  %v923_v35 = vld [vmem:[#allocation2 + $0x6a] sm:$0xf]  ;;  %v887_v46 = vld [vmem:[#allocation2 + $0x38] sm:$0xf] }
  0xf5   : > { %811 = vst.msk [vmem:[#allocation2 + $0xb1] sm:$0xf] %vm799_vm1, %v744_v15  ;;  %v903_v15 = vld [vmem:[#allocation2 + $0x39] sm:$0xf] }
  0xf7   : > { %v4816_v11 = vld.sshfl [vmem:[#allocation1 + $0x20] sm:$0xff pattern:$0x75316420] }
  0xf8   : > { %1074 = vst [vmem:[#allocation1 + $0x20] ss:$2 sm:$0xff] %v862_v7 }
  0xf9   : > { %v4805_v56 = vld.sshfl [vmem:[#allocation1 + $0x10] sm:$0xff pattern:$0x75316420]  ;;  %1075 = vst [vmem:[#allocation1 + $0x21] ss:$2 sm:$0xff] %v863_v13 }
  0xfa   : > { %1126 = vst [vmem:[#allocation1 + $0x10] ss:$2 sm:$0xff] %v868_v52  ;;  %v932_v52 = vld [vmem:[#allocation2 + $0x10] sm:$0xf] }
  0xfb   : > { %v4797_v41 = vld.sshfl [vmem:[#allocation1] sm:$0xff pattern:$0x75316420]  ;;  %1128 = vst [vmem:[#allocation1 + $0x11] ss:$2 sm:$0xff] %v869_v55 }
  0xfc   : > { %1141 = vst [vmem:[#allocation1] ss:$2 sm:$0xff] %v874_v40  ;;  %v924_v40 = vld [vmem:[#allocation2 + $0x72] sm:$0xf] }
  0xfd   : > { %1142 = vst [vmem:[#allocation1 + $0x1] ss:$2 sm:$0xff] %v875_v42  ;;  %v902_v42 = vld [vmem:[#allocation2 + $0x21] sm:$0xf] }
 0x100   : > { %v4824_v22 = vld.sshfl [vmem:[#allocation1 + $0x20] sm:$0xff pattern:$0x75316420] }
 0x101   : > { %1130 = vst [vmem:[#allocation1 + $0x20] ss:$2 sm:$0xff] %v870_v16 }
 0x102   : > { %v4811_v2 = vld.sshfl [vmem:[#allocation1 + $0x10] sm:$0xff pattern:$0x75316420]  ;;  %1132 = vst [vmem:[#allocation1 + $0x21] ss:$2 sm:$0xff] %v871_v23 }
 0x103   : > { %1143 = vst [vmem:[#allocation1 + $0x10] ss:$2 sm:$0xff] %v876_v1 }
 0x104   : > { %v4801_v50 = vld.sshfl [vmem:[#allocation1] sm:$0xff pattern:$0x75316420]  ;;  %1144 = vst [vmem:[#allocation1 + $0x11] ss:$2 sm:$0xff] %v877_v3 }
 0x105   : > { %1193 = vst [vmem:[#allocation1] ss:$2 sm:$0xff] %v883_v47  ;;  %v849_v47 = vld [vmem:[#allocation2 + $0xa8] sm:$0xf] }
 0x106   : > { %1195 = vst [vmem:[#allocation1 + $0x1] ss:$2 sm:$0xff] %v884_v48 }
 0x107   : > { %1022 = vst [vmem:[#allocation1 + $0x31] ss:$2 sm:$0xff] %v849_v47 }
 0x109   : > { %v4830_v33 = vld.sshfl [vmem:[#allocation1 + $0x20] sm:$0xff pattern:$0x75316420] }
 0x10a   : > { %1145 = vst [vmem:[#allocation1 + $0x20] ss:$2 sm:$0xff] %v878_v29  ;;  %v949_v29 = vld [vmem:[#allocation2 + $0x19] sm:$0xf] }
 0x10b   : > { %v4818_v14 = vld.sshfl [vmem:[#allocation1 + $0x10] sm:$0xff pattern:$0x75316420]  ;;  %1146 = vst [vmem:[#allocation1 + $0x21] ss:$2 sm:$0xff] %v879_v34 }
 0x10c   : > { %1197 = vst [vmem:[#allocation1 + $0x10] ss:$2 sm:$0xff] %v885_v10  ;;  %v918_v10 = vld [vmem:[#allocation2 + $0x22] sm:$0xf] }
 0x10d   : > { %v4807_v60 = vld.sshfl [vmem:[#allocation1] sm:$0xff pattern:$0x75316420]  ;;  %1199 = vst [vmem:[#allocation1 + $0x11] ss:$2 sm:$0xff] %v886_v12 }
 0x10e   : > { %1212 = vst [vmem:[#allocation1] ss:$2 sm:$0xff] %v891_v58  ;;  %v910_v58 = vld [vmem:[#allocation2 + $0x81] sm:$0xf]  ;;  %v941_v12 = vld [vmem:[#allocation2 + $0x78] sm:$0xf] }
 0x10f   : > { %1213 = vst [vmem:[#allocation1 + $0x1] ss:$2 sm:$0xff] %v892_v59  ;;  %v4844_v3 = vld.sshfl [vmem:[#allocation1 + $0x30] sm:$0xff pattern:$0x75316420] }
 0x110   : > { %6187 = vst [vmem:[#allocation13_spill] sm:$0xff] %v4844_v3 }
 0x111   : > { %1063 = vst [vmem:[#allocation1 + $0x30] ss:$2 sm:$0xff] %v856_v4  ;;  %v919_v4 = vld [vmem:[#allocation2 + $0x3a] sm:$0xf] }
 0x112   : > { %v4836_v48 = vld.sshfl [vmem:[#allocation1 + $0x20] sm:$0xff pattern:$0x75316420] }
 0x113   : > { %1201 = vst [vmem:[#allocation1 + $0x20] ss:$2 sm:$0xff] %v887_v46  ;;  %v912_v46 = vld [vmem:[#allocation2 + $0xa1] sm:$0xf] }
 0x114   : > { %v4828_v28 = vld.sshfl [vmem:[#allocation1 + $0x10] sm:$0xff pattern:$0x75316420]  ;;  %1203 = vst [vmem:[#allocation1 + $0x21] ss:$2 sm:$0xff] %v888_v51 }
 0x115   : > { %1214 = vst [vmem:[#allocation1 + $0x10] ss:$2 sm:$0xff] %v893_v30  ;;  %v873_v51 = vld [vmem:[#allocation2 + $0x4a] sm:$0xf] }
 0x116   : > { %v4814_v8 = vld.sshfl [vmem:[#allocation1] sm:$0xff pattern:$0x75316420]  ;;  %1215 = vst [vmem:[#allocation1 + $0x11] ss:$2 sm:$0xff] %v894_v32 }
 0x117   : > { %1264 = vst [vmem:[#allocation1] ss:$2 sm:$0xff] %v899_v5  ;;  %v857_v5 = vld [vmem:[#allocation2 + $0x49] sm:$0xf]  ;;  %v925_v32 = vld [vmem:[#allocation2 + $0x7a] sm:$0xf] }
 0x118   : > { %1266 = vst [vmem:[#allocation1 + $0x1] ss:$2 sm:$0xff] %v900_v6  ;;  %v940_v6 = vld [vmem:[#allocation2 + $0x70] sm:$0xf] }
 0x119   : > { %1065 = vst [vmem:[#allocation1 + $0x31] ss:$2 sm:$0xff] %v857_v5 }
 0x11b   : > { %v4842_v1 = vld.sshfl [vmem:[#allocation1 + $0x20] sm:$0xff pattern:$0x75316420] }
 0x11c   : > { %1216 = vst [vmem:[#allocation1 + $0x20] ss:$2 sm:$0xff] %v895_v62  ;;  %v957_v62 = vld [vmem:[#allocation2 + $0x79] sm:$0xf] }
 0x11d   : > { %v4834_v43 = vld.sshfl [vmem:[#allocation1 + $0x10] sm:$0xff pattern:$0x75316420]  ;;  %1217 = vst [vmem:[#allocation1 + $0x21] ss:$2 sm:$0xff] %v896_v0 }
 0x11e   : > { %1268 = vst [vmem:[#allocation1 + $0x10] ss:$2 sm:$0xff] %v901_v38  ;;  %v911_v38 = vld [vmem:[#allocation2 + $0x99] sm:$0xf] }
 0x11f   : > { %v4822_v19 = vld.sshfl [vmem:[#allocation1] sm:$0xff pattern:$0x75316420]  ;;  %1270 = vst [vmem:[#allocation1 + $0x11] ss:$2 sm:$0xff] %v902_v42 }
 0x120   : > { %6184 = vst [vmem:[#allocation10_spill] sm:$0xff] %v4822_v19  ;;  %v4852_v23 = vld.sshfl [vmem:[#allocation1 + $0x30] sm:$0xff pattern:$0x75316420]  ;;  %v872_v42 = vld [vmem:[#allocation2 + $0x42] sm:$0xf] }
 0x121   : > { %1283 = vst [vmem:[#allocation1] ss:$2 sm:$0xff] %v907_v18  ;;  %v904_v18 = vld [vmem:[#allocation2 + $0x41] sm:$0xf]  ;;  %v1723_v19 = vld [vmem:[#allocation2 + $0x99] sm:$0xf] }
 0x122   : > { %1284 = vst [vmem:[#allocation1 + $0x1] ss:$2 sm:$0xff] %v908_v21  ;;  %v864_v21 = vld [vmem:[#allocation2 + $0xa1] sm:$0xf] }
 0x123   : > { %1076 = vst [vmem:[#allocation1 + $0x30] ss:$2 sm:$0xff] %v864_v21 }
 0x124   : > { %v4850_v16 = vld.sshfl [vmem:[#allocation1 + $0x20] sm:$0xff pattern:$0x75316420] }
 0x125   : > { %1272 = vst [vmem:[#allocation1 + $0x20] ss:$2 sm:$0xff] %v903_v15  ;;  %v881_v15 = vld [vmem:[#allocation2 + $0xaa] sm:$0xf] }
 0x126   : > { %v4840_v59 = vld.sshfl [vmem:[#allocation1 + $0x10] sm:$0xff pattern:$0x75316420]  ;;  %1274 = vst [vmem:[#allocation1 + $0x21] ss:$2 sm:$0xff] %v904_v18 }
 0x127   : > { %6186 = vst [vmem:[#allocation12_spill] sm:$0xff] %v4840_v59  ;;  %v965_v18 = vld [vmem:[#allocation2 + $0x1a] sm:$0xf] }
 0x128   : > { %1285 = vst [vmem:[#allocation1 + $0x10] ss:$2 sm:$0xff] %v909_v57 }
 0x129   : > { %v4826_v27 = vld.sshfl [vmem:[#allocation1] sm:$0xff pattern:$0x75316420]  ;;  %1286 = vst [vmem:[#allocation1 + $0x11] ss:$2 sm:$0xff] %v910_v58 }
 0x12a   : > { %6185 = vst [vmem:[#allocation11_spill] sm:$0xff] %v4826_v27  ;;  %v935_v58 = vld [vmem:[#allocation2 + $0x28] sm:$0xf] }
 0x12b   : > { %1319 = vst [vmem:[#allocation1] ss:$2 sm:$0xff] %v915_v25  ;;  %v948_v25 = vld [vmem:[#allocation2 + $0x11] sm:$0xf] }
 0x12c   : > { %1321 = vst [vmem:[#allocation1 + $0x1] ss:$2 sm:$0xff] %v916_v26  ;;  %v865_v26 = vld [vmem:[#allocation2 + $0xa9] sm:$0xf] }
 0x12d   : > { %1077 = vst [vmem:[#allocation1 + $0x31] ss:$2 sm:$0xff] %v865_v26  ;;  %v943_v26 = vld [vmem:[#allocation2 + $0x88] sm:$0xf] }
 0x130   : > { %v4848_v13 = vld.sshfl [vmem:[#allocation1 + $0x10] sm:$0xff pattern:$0x75316420] }
 0x131   : > { %6188 = vst [vmem:[#allocation14_spill] sm:$0xff] %v4848_v13  ;;  %v1661_v13 = vld [vmem:[#allocation2 + $0xa0] sm:$0xf] }
 0x132   : > { %1323 = vst [vmem:[#allocation1 + $0x10] ss:$2 sm:$0xff] %v917_v9  ;;  %v880_v9 = vld [vmem:[#allocation2 + $0xa2] sm:$0xf] }
 0x133   : > { %v4832_v37 = vld.sshfl [vmem:[#allocation1] sm:$0xff pattern:$0x75316420]  ;;  %1325 = vst [vmem:[#allocation1 + $0x11] ss:$2 sm:$0xff] %v918_v10 }
 0x134   : > { %1338 = vst [vmem:[#allocation1] ss:$2 sm:$0xff] %v923_v35  ;;  %v926_v35 = vld [vmem:[#allocation2 + $0x82] sm:$0xf] }
 0x135   : > { %1339 = vst [vmem:[#allocation1 + $0x1] ss:$2 sm:$0xff] %v924_v40  ;;  %v4858_v40 = vld.sshfl [vmem:[#allocation1 + $0x20] sm:$0xff pattern:$0x75316420] }
 0x136   : > { %6189 = vst [vmem:[#allocation15_spill] sm:$0xff] %v4858_v40  ;;  %v4860_v47 = vld.sshfl [vmem:[#allocation1 + $0x30] sm:$0xff pattern:$0x75316420]  ;;  %v1679_v40 = vld [vmem:[#allocation2 + $0xc1] sm:$0xf] }
 0x137   : > { %1287 = vst [vmem:[#allocation1 + $0x20] ss:$2 sm:$0xff] %v911_v38  ;;  %v889_v38 = vld [vmem:[#allocation2 + $0x48] sm:$0xf] }
 0x138   : > { %1288 = vst [vmem:[#allocation1 + $0x21] ss:$2 sm:$0xff] %v912_v46 }
 0x139   : > { %1134 = vst [vmem:[#allocation1 + $0x30] ss:$2 sm:$0xff] %v872_v42  ;;  %v928_v42 = vld [vmem:[#allocation2 + $0xa2] sm:$0xf] }
 0x13a   : > { %v4856_v34 = vld.sshfl [vmem:[#allocation1 + $0x10] sm:$0xff pattern:$0x75316420]  ;;  %1136 = vst [vmem:[#allocation1 + $0x31] ss:$2 sm:$0xff] %v873_v51 }
 0x13b   : > { %1340 = vst [vmem:[#allocation1 + $0x10] ss:$2 sm:$0xff] %v925_v32  ;;  %v927_v32 = vld [vmem:[#allocation2 + $0x9a] sm:$0xf]  ;;  %v890_v51 = vld [vmem:[#allocation2 + $0x50] sm:$0xf] }
 0x13c   : > { %v4838_v55 = vld.sshfl [vmem:[#allocation1] sm:$0xff pattern:$0x75316420]  ;;  %1341 = vst [vmem:[#allocation1 + $0x11] ss:$2 sm:$0xff] %v926_v35 }
 0x13d   : > { %1390 = vst [vmem:[#allocation1] ss:$2 sm:$0xff] %v932_v52  ;;  %v956_v52 = vld [vmem:[#allocation2 + $0x71] sm:$0xf] }
 0x13e   : > { %1392 = vst [vmem:[#allocation1 + $0x1] ss:$2 sm:$0xff] %v933_v53  ;;  %v934_v53 = vld [vmem:[#allocation2 + $0x20] sm:$0xf] }
 0x13f   : > { %v4866_v5 = vld.sshfl [vmem:[#allocation1 + $0x20] sm:$0xff pattern:$0x75316420] }
 0x140   : > { %6190 = vst [vmem:[#allocation16_spill] sm:$0xff] %v4866_v5  ;;  %v1654_v5 = vld [vmem:[#allocation2 + $0x48] sm:$0xf] }
 0x141   : > { %1327 = vst [vmem:[#allocation1 + $0x20] ss:$2 sm:$0xff] %v919_v4  ;;  %v4868_v10 = vld.sshfl [vmem:[#allocation1 + $0x30] sm:$0xff pattern:$0x75316420] }
 0x142   : > { %1147 = vst [vmem:[#allocation1 + $0x30] ss:$2 sm:$0xff] %v880_v9  ;;  %v973_v4 = vld [vmem:[#allocation2 + $0x7a] sm:$0xf]  ;;  %v936_v9 = vld [vmem:[#allocation2 + $0x40] sm:$0xf] }
 0x143   : > { %v4864_v0 = vld.sshfl [vmem:[#allocation1 + $0x10] sm:$0xff pattern:$0x75316420]  ;;  %1148 = vst [vmem:[#allocation1 + $0x31] ss:$2 sm:$0xff] %v881_v15 }
 0x144   : > { %1394 = vst [vmem:[#allocation1 + $0x10] ss:$2 sm:$0xff] %v934_v53  ;;  %v950_v53 = vld [vmem:[#allocation2 + $0x21] sm:$0xf] }
 0x145   : > { %v4846_v7 = vld.sshfl [vmem:[#allocation1] sm:$0xff pattern:$0x75316420]  ;;  %1396 = vst [vmem:[#allocation1 + $0x11] ss:$2 sm:$0xff] %v935_v58 }
 0x146   : > { %1409 = vst [vmem:[#allocation1] ss:$2 sm:$0xff] %v940_v6  ;;  %v920_v6 = vld [vmem:[#allocation2 + $0x42] sm:$0xf] }
 0x147   : > { %1410 = vst [vmem:[#allocation1 + $0x1] ss:$2 sm:$0xff] %v941_v12  ;;  %v964_v12 = vld [vmem:[#allocation2 + $0x12] sm:$0xf] }
 0x148   : > { %1329 = vst [vmem:[#allocation1 + $0x21] ss:$2 sm:$0xff] %v920_v6 }
 0x14a   : > { %v4876_v46 = vld.sshfl [vmem:[#allocation1 + $0x30] sm:$0xff pattern:$0x75316420] }
 0x14b   : > { %1205 = vst [vmem:[#allocation1 + $0x30] ss:$2 sm:$0xff] %v889_v38  ;;  %v1652_v38 = vld [vmem:[#allocation2 + $0x38] sm:$0xf] }
 0x14c   : > { %1207 = vst [vmem:[#allocation1 + $0x31] ss:$2 sm:$0xff] %v890_v51  ;;  %v958_v51 = vld [vmem:[#allocation2 + $0x81] sm:$0xf] }
 0x14e   : > { %v4854_v30 = vld.sshfl [vmem:[#allocation1] sm:$0xff pattern:$0x75316420] }
 0x14f   : > { %1461 = vst [vmem:[#allocation1] ss:$2 sm:$0xff] %v948_v25  ;;  %v942_v25 = vld [vmem:[#allocation2 + $0x80] sm:$0xf] }
 0x150   : > { %1463 = vst [vmem:[#allocation1 + $0x1] ss:$2 sm:$0xff] %v949_v29  ;;  %v4872_v29 = vld.sshfl [vmem:[#allocation1 + $0x10] sm:$0xff pattern:$0x75316420] }
 0x151   : > { %1411 = vst [vmem:[#allocation1 + $0x10] ss:$2 sm:$0xff] %v942_v25  ;;  %v4874_v35 = vld.sshfl [vmem:[#allocation1 + $0x20] sm:$0xff pattern:$0x75316420] }
 0x152   : > { %1412 = vst [vmem:[#allocation1 + $0x11] ss:$2 sm:$0xff] %v943_v26  ;;  %v937_v25 = vld [vmem:[#allocation2 + $0x48] sm:$0xf] }
 0x153   : > { %1342 = vst [vmem:[#allocation1 + $0x20] ss:$2 sm:$0xff] %v927_v32  ;;  %v897_v26 = vld [vmem:[#allocation2 + $0xa8] sm:$0xf] }
 0x154   : > { %1343 = vst [vmem:[#allocation1 + $0x21] ss:$2 sm:$0xff] %v928_v42  ;;  %v4887_v32 = vld.sshfl [vmem:[#allocation1 + $0x30] sm:$0xff pattern:$0x75316420] }
 0x155   : > { %1218 = vst [vmem:[#allocation1 + $0x30] ss:$2 sm:$0xff] %v897_v26  ;;  %v967_v26 = vld [vmem:[#allocation2 + $0x2a] sm:$0xf] }
 0x157   : > { %v4862_v57 = vld.sshfl [vmem:[#allocation1] sm:$0xff pattern:$0x75316420] }
 0x158   : > { %1480 = vst [vmem:[#allocation1] ss:$2 sm:$0xff] %v956_v52  ;;  %v972_v52 = vld [vmem:[#allocation2 + $0x72] sm:$0xf] }
 0x159   : > { %1481 = vst [vmem:[#allocation1 + $0x1] ss:$2 sm:$0xff] %v957_v62  ;;  %v951_v62 = vld [vmem:[#allocation2 + $0x29] sm:$0xf] }
 0x15a   : > { %v4880_v6 = vld.sshfl [vmem:[#allocation1 + $0x10] sm:$0xff pattern:$0x75316420] }
 0x15b   : > { %1465 = vst [vmem:[#allocation1 + $0x10] ss:$2 sm:$0xff] %v950_v53  ;;  %v4884_v15 = vld.sshfl [vmem:[#allocation1 + $0x20] sm:$0xff pattern:$0x75316420] }
 0x15c   : > { %1467 = vst [vmem:[#allocation1 + $0x11] ss:$2 sm:$0xff] %v951_v62  ;;  %v944_v62 = vld [vmem:[#allocation2 + $0xa0] sm:$0xf] }
 0x15d   : > { %1398 = vst [vmem:[#allocation1 + $0x20] ss:$2 sm:$0xff] %v936_v9  ;;  %v945_v9 = vld [vmem:[#allocation2 + $0xa8] sm:$0xf] }
 0x15e   : > { %1400 = vst [vmem:[#allocation1 + $0x21] ss:$2 sm:$0xff] %v937_v25 }
 0x160   : > { %v4870_v21 = vld.sshfl [vmem:[#allocation1] sm:$0xff pattern:$0x75316420] }
 0x161   : > { %1532 = vst [vmem:[#allocation1] ss:$2 sm:$0xff] %v964_v12  ;;  %v4150_v12 = vpack.i.bf16 %v4832_v37, %v4816_v11  ;;  %v898_v37 = vld [vmem:[#allocation2 + $0xb0] sm:$0xf] }
 0x162   : > { %1534 = vst [vmem:[#allocation1 + $0x1] ss:$2 sm:$0xff] %v965_v18  ;;  %v1651_v18 = vld [vmem:[#allocation2 + $0x30] sm:$0xf] }
 0x163   : > { %4151 = vrot.lane.b32.xlu0 %v4150_v12, %s4529_s17  ;;  %v4891_v11 = vld.sshfl [vmem:[#allocation1 + $0x10] sm:$0xff pattern:$0x75316420]  ;;  %1219 = vst [vmem:[#allocation1 + $0x31] ss:$2 sm:$0xff] %v898_v37 }
 0x164   : > { %1482 = vst [vmem:[#allocation1 + $0x10] ss:$2 sm:$0xff] %v958_v51  ;;  %v966_v12 = vld [vmem:[#allocation2 + $0x22] sm:$0xf]  ;;  %v905_v37 = vld [vmem:[#allocation2 + $0x49] sm:$0xf] }
 0x165   : > { %v4893_v53 = vld.sshfl [vmem:[#allocation1 + $0x20] sm:$0xff pattern:$0x75316420] }
 0x166   : > { %1413 = vst [vmem:[#allocation1 + $0x20] ss:$2 sm:$0xff] %v944_v62  ;;  %v906_v62 = vld [vmem:[#allocation2 + $0x51] sm:$0xf] }
 0x167   : > { %1414 = vst [vmem:[#allocation1 + $0x21] ss:$2 sm:$0xff] %v945_v9  ;;  %v1667_v9 = vld [vmem:[#allocation2 + $0x31] sm:$0xf] }
 0x169   : > { %v4878_v58 = vld.sshfl [vmem:[#allocation1] sm:$0xff pattern:$0x75316420] }
 0x16a   : > { %6191 = vst [vmem:[#allocation17_spill] sm:$0xff] %v4878_v58 }
 0x16b   : > { %1551 = vst [vmem:[#allocation1] ss:$2 sm:$0xff] %v972_v52  ;;  %v959_v52 = vld [vmem:[#allocation2 + $0x89] sm:$0xf] }
 0x16c   : > { %1552 = vst [vmem:[#allocation1 + $0x1] ss:$2 sm:$0xff] %v973_v4  ;;  %v1659_v4 = vld [vmem:[#allocation2 + $0x90] sm:$0xf] }
 0x16d   : > { %1483 = vst [vmem:[#allocation1 + $0x11] ss:$2 sm:$0xff] %v959_v52  ;;  %v4901_v52 = vld.sshfl [vmem:[#allocation1 + $0x30] sm:$0xff pattern:$0x75316420] }
 0x16e   : > { %1276 = vst [vmem:[#allocation1 + $0x30] ss:$2 sm:$0xff] %v905_v37  ;;  %v4160_v37 = vpack.i.bf16 %v4862_v57, %v4842_v1  ;;  %v922_v1 = vld [vmem:[#allocation2 + $0x52] sm:$0xf]  ;;  %v952_v57 = vld [vmem:[#allocation2 + $0x41] sm:$0xf] }
 0x16f   : > { %1278 = vst [vmem:[#allocation1 + $0x31] ss:$2 sm:$0xff] %v906_v62  ;;  %v1653_v62 = vld [vmem:[#allocation2 + $0x40] sm:$0xf] }
 0x170   : > { %4161 = vrot.lane.b32.xlu2 %v4160_v37, %s4531_s19  ;;  %v1684_v37 = vld [vmem:[#allocation2 + $0x3a] sm:$0xf] }
 0x173   : > { %v4889_v42 = vld.sshfl [vmem:[#allocation1] sm:$0xff pattern:$0x75316420] }
 0x174   : > { %6192 = vst [vmem:[#allocation18_spill] sm:$0xff] %v4889_v42  ;;  %v4899_v51 = vld.sshfl [vmem:[#allocation1 + $0x10] sm:$0xff pattern:$0x75316420]  ;;  %v974_v42 = vld [vmem:[#allocation2 + $0x82] sm:$0xf] }
 0x175   : > { %1812 = vst [vmem:[#allocation1] ss:$2 sm:$0xff] %v1651_v18  ;;  %v1660_v18 = vld [vmem:[#allocation2 + $0x98] sm:$0xf] }
 0x176   : > { %1814 = vst [vmem:[#allocation1 + $0x1] ss:$2 sm:$0xff] %v1652_v38  ;;  %v4155_v38 = vpack.i.bf16 %v4846_v7, %v4830_v33  ;;  %v975_v33 = vld [vmem:[#allocation2 + $0x8a] sm:$0xf] }
 0x177   : > { %1536 = vst [vmem:[#allocation1 + $0x10] ss:$2 sm:$0xff] %v966_v12  ;;  %v913_v12 = vld [vmem:[#allocation2 + $0xa9] sm:$0xf] }
 0x178   : > { %4156 = vrot.lane.b32.xlu1 %v4155_v38, %s4530_s18  ;;  %1538 = vst [vmem:[#allocation1 + $0x11] ss:$2 sm:$0xff] %v967_v26  ;;  %v914_v38 = vld [vmem:[#allocation2 + $0xb1] sm:$0xf] }
 0x179   : > { %v1675_v26 = vld [vmem:[#allocation2 + $0x91] sm:$0xf] }
 0x17d   : > { %v4895_v25 = vld.sshfl [vmem:[#allocation1] sm:$0xff pattern:$0x75316420] }
 0x17e   : > { %1831 = vst [vmem:[#allocation1] ss:$2 sm:$0xff] %v1659_v4  ;;  %v1668_v4 = vld [vmem:[#allocation2 + $0x39] sm:$0xf] }
 0x17f   : > { %1832 = vst [vmem:[#allocation1 + $0x1] ss:$2 sm:$0xff] %v1660_v18  ;;  %v4906_v7 = vld.sshfl [vmem:[#allocation1 + $0x10] sm:$0xff pattern:$0x75316420] }
 0x180   : > { %6194 = vst [vmem:[#allocation20_spill] sm:$0xff] %v4906_v7  ;;  %v4908_v18 = vld.sshfl [vmem:[#allocation1 + $0x30] sm:$0xff pattern:$0x75316420] }
 0x181   : > { %1553 = vst [vmem:[#allocation1 + $0x10] ss:$2 sm:$0xff] %v974_v42  ;;  %v921_v42 = vld [vmem:[#allocation2 + $0x4a] sm:$0xf] }
 0x182   : > { %1554 = vst [vmem:[#allocation1 + $0x11] ss:$2 sm:$0xff] %v975_v33  ;;  %v4917_v33 = vld.sshfl [vmem:[#allocation1 + $0x20] sm:$0xff pattern:$0x75316420] }
 0x183   : > { %6195 = vst [vmem:[#allocation21_spill] sm:$0xff] %v4908_v18  ;;  %v953_v7 = vld [vmem:[#allocation2 + $0x49] sm:$0xf]  ;;  %v976_v18 = vld [vmem:[#allocation2 + $0xa2] sm:$0xf] }
 0x184   : > { %1289 = vst [vmem:[#allocation1 + $0x30] ss:$2 sm:$0xff] %v913_v12 }
 0x185   : > { %1290 = vst [vmem:[#allocation1 + $0x31] ss:$2 sm:$0xff] %v914_v38  ;;  %v1683_v38 = vld [vmem:[#allocation2 + $0x32] sm:$0xf] }
 0x186   : > { %v4904_v44 = vld.sshfl [vmem:[#allocation1] sm:$0xff pattern:$0x75316420]  ;;  %1469 = vst [vmem:[#allocation1 + $0x20] ss:$2 sm:$0xff] %v952_v57 }
 0x187   : > { %6193 = vst [vmem:[#allocation19_spill] sm:$0xff] %v4904_v44  ;;  %v1686_v44 = vld [vmem:[#allocation2 + $0x4a] sm:$0xf] }
 0x188   : > { %1867 = vst [vmem:[#allocation1] ss:$2 sm:$0xff] %v1667_v9  ;;  %v1676_v9 = vld [vmem:[#allocation2 + $0x99] sm:$0xf] }
 0x189   : > { %1869 = vst [vmem:[#allocation1 + $0x1] ss:$2 sm:$0xff] %v1668_v4  ;;  %v4915_v4 = vld.sshfl [vmem:[#allocation1 + $0x10] sm:$0xff pattern:$0x75316420] }
 0x18a   : > { %6196 = vst [vmem:[#allocation22_spill] sm:$0xff] %v4915_v4  ;;  %v961_v4 = vld [vmem:[#allocation2 + $0xa9] sm:$0xf] }
 0x18b   : > { %1816 = vst [vmem:[#allocation1 + $0x10] ss:$2 sm:$0xff] %v1653_v62  ;;  %v1662_v62 = vld [vmem:[#allocation2 + $0xa8] sm:$0xf] }
 0x18c   : > { %1818 = vst [vmem:[#allocation1 + $0x11] ss:$2 sm:$0xff] %v1654_v5  ;;  %v4919_v12 = vld.sshfl [vmem:[#allocation1 + $0x30] sm:$0xff pattern:$0x75316420] }
 0x18d   : > { %6197 = vst [vmem:[#allocation23_spill] sm:$0xff] %v4919_v12  ;;  %v929_v5 = vld [vmem:[#allocation2 + $0xaa] sm:$0xf] }
 0x18e   : > { %1331 = vst [vmem:[#allocation1 + $0x30] ss:$2 sm:$0xff] %v921_v42  ;;  %v960_v42 = vld [vmem:[#allocation2 + $0xa1] sm:$0xf] }
 0x18f   : > { %1333 = vst [vmem:[#allocation1 + $0x31] ss:$2 sm:$0xff] %v922_v1  ;;  %v930_v1 = vld [vmem:[#allocation2 + $0xb2] sm:$0xf] }
 0x190   : > { %v4912_v58 = vld.sshfl [vmem:[#allocation1] sm:$0xff pattern:$0x75316420]  ;;  %1471 = vst [vmem:[#allocation1 + $0x21] ss:$2 sm:$0xff] %v953_v7 }
 0x191   : > { %1886 = vst [vmem:[#allocation1] ss:$2 sm:$0xff] %v1675_v26  ;;  %v1691_v7 = vld [vmem:[#allocation2 + $0x92] sm:$0xf] }
 0x192   : > { %1887 = vst [vmem:[#allocation1 + $0x1] ss:$2 sm:$0xff] %v1676_v9 }
 0x193   : > { %v4923_v9 = vld.sshfl [vmem:[#allocation1 + $0x10] sm:$0xff pattern:$0x75316420] }
 0x194   : > { %1833 = vst [vmem:[#allocation1 + $0x10] ss:$2 sm:$0xff] %v1661_v13  ;;  %v1692_v13 = vld [vmem:[#allocation2 + $0x9a] sm:$0xf] }
 0x195   : > { %1834 = vst [vmem:[#allocation1 + $0x11] ss:$2 sm:$0xff] %v1662_v62  ;;  %v938_v62 = vld [vmem:[#allocation2 + $0x50] sm:$0xf] }
 0x196   : > { %v4925_v12 = vld.sshfl [vmem:[#allocation1 + $0x30] sm:$0xff pattern:$0x75316420] }
 0x197   : > { %1344 = vst [vmem:[#allocation1 + $0x30] ss:$2 sm:$0xff] %v929_v5  ;;  %v1478_v57 = vld.sshfl [vmem:[#allocation1 + $0x20] sm:$0xff pattern:$0x75316420] }
 0x198   : > { %1345 = vst [vmem:[#allocation1 + $0x31] ss:$2 sm:$0xff] %v930_v1  ;;  %v4210_v27 = vpack.i.bf16 %v1478_v57, %v4814_v8  ;;  %v968_v5 = vld [vmem:[#allocation2 + $0x42] sm:$0xf]  ;;  %v1699_v8 = vld [vmem:[#allocation2 + $0x38] sm:$0xf] }
 0x199   : > { %v4921_v26 = vld.sshfl [vmem:[#allocation1] sm:$0xff pattern:$0x75316420]  ;;  %1484 = vst [vmem:[#allocation1 + $0x20] ss:$2 sm:$0xff] %v960_v42 }
 0x19a   : > { %1938 = vst [vmem:[#allocation1] ss:$2 sm:$0xff] %v1683_v38  ;;  %4211 = vrot.lane.b32.xlu2 %v4210_v27, %s4531_s19  ;;  %v969_v42 = vld [vmem:[#allocation2 + $0x4a] sm:$0xf]  ;;  %v1700_v57 = vld [vmem:[#allocation2 + $0x40] sm:$0xf] }
 0x19b   : > { %1940 = vst [vmem:[#allocation1 + $0x1] ss:$2 sm:$0xff] %v1684_v37  ;;  %v939_v37 = vld [vmem:[#allocation2 + $0x58] sm:$0xf] }
 0x19c   : > { %1485 = vst [vmem:[#allocation1 + $0x21] ss:$2 sm:$0xff] %v961_v4  ;;  %v947_v27 = vld [vmem:[#allocation2 + $0xb8] sm:$0xf] }
 0x19d   : > { %v4952_v24 = vld.sshfl [vmem:[#allocation1 + $0x10] sm:$0xff pattern:$0x75316420] }
 0x19e   : > { %6202 = vst [vmem:[#allocation28_spill] sm:$0xff] %v4952_v24 }
 0x19f   : > { %v4931_v3 = vld.sshfl [vmem:[#allocation1 + $0x30] sm:$0xff pattern:$0x75316420] }
 0x1a0   : > { %6198 = vst [vmem:[#allocation24_spill] sm:$0xff] %v4931_v3  ;;  %v955_v3 = vld [vmem:[#allocation2 + $0x59] sm:$0xf] }
 0x1a1   : > { %1402 = vst [vmem:[#allocation1 + $0x30] ss:$2 sm:$0xff] %v938_v62 }
 0x1a2   : > { %v4928_v38 = vld.sshfl [vmem:[#allocation1] sm:$0xff pattern:$0x75316420]  ;;  %1404 = vst [vmem:[#allocation1 + $0x31] ss:$2 sm:$0xff] %v939_v37 }
 0x1a3   : > { %1957 = vst [vmem:[#allocation1] ss:$2 sm:$0xff] %v1691_v7  ;;  %v4933_v1 = vld.sshfl [vmem:[#allocation1 + $0x20] sm:$0xff pattern:$0x75316420] }
 0x1a4   : > { %1958 = vst [vmem:[#allocation1 + $0x1] ss:$2 sm:$0xff] %v1692_v13  ;;  %v946_v7 = vld [vmem:[#allocation2 + $0xb0] sm:$0xf]  ;;  %v977_v37 = vld [vmem:[#allocation2 + $0xaa] sm:$0xf] }
 0x1a5   : > { %1540 = vst [vmem:[#allocation1 + $0x20] ss:$2 sm:$0xff] %v968_v5  ;;  %v702_v5 = vadd.f32 %v4729_v49, %v701_v61  ;;  %v1656_v49 = vld [vmem:[#allocation2 + $0x68] sm:$0xf]  ;;  %v1715_v61 = vld [vmem:[#allocation2 + $0x39] sm:$0xf] }
 0x1a6   : > { %1542 = vst [vmem:[#allocation1 + $0x21] ss:$2 sm:$0xff] %v969_v42  ;;  %v1707_v42 = vld [vmem:[#allocation2 + $0x98] sm:$0xf] }
 0x1a9   : > { %v4937_v13 = vld.sshfl [vmem:[#allocation1 + $0x30] sm:$0xff pattern:$0x75316420] }
 0x1aa   : > { %1415 = vst [vmem:[#allocation1 + $0x30] ss:$2 sm:$0xff] %v946_v7 }
 0x1ab   : > { %v4935_v4 = vld.sshfl [vmem:[#allocation1] sm:$0xff pattern:$0x75316420]  ;;  %1416 = vst [vmem:[#allocation1 + $0x31] ss:$2 sm:$0xff] %v947_v27 }
 0x1ac   : > { %2009 = vst [vmem:[#allocation1] ss:$2 sm:$0xff] %v1699_v8  ;;  %v1708_v8 = vld [vmem:[#allocation2 + $0xa0] sm:$0xf] }
 0x1ad   : > { %2011 = vst [vmem:[#allocation1 + $0x1] ss:$2 sm:$0xff] %v1700_v57  ;;  %v4939_v62 = vld.sshfl [vmem:[#allocation1 + $0x20] sm:$0xff pattern:$0x75316420]  ;;  %v721_v57 = vmax.f32 %v702_v5, 0.0 }
 0x1ae   : > { %6199 = vst [vmem:[#allocation25_spill] sm:$0xff] %v4939_v62  ;;  %v1655_v27 = vld [vmem:[#allocation2 + $0x60] sm:$0xf] }
 0x1af   : > { %1555 = vst [vmem:[#allocation1 + $0x20] ss:$2 sm:$0xff] %v976_v18  ;;  %v745_v18 = vrot.slane %v721_v57, 4  ;;  %v1716_v62 = vld [vmem:[#allocation2 + $0x41] sm:$0xf] }
 0x1b0   : > { %1556 = vst [vmem:[#allocation1 + $0x21] ss:$2 sm:$0xff] %v977_v37  ;;  %v1669_v5 = vld [vmem:[#allocation2 + $0x41] sm:$0xf] }
 0x1b1   : > { %812 = vst.msk [vmem:[#allocation2 + $0xc9] sm:$0xf] %vm799_vm1, %v721_v57  ;;  %v963_v57 = vld [vmem:[#allocation2 + $0xb9] sm:$0xf] }
 0x1b2   : > { %v4945_v7 = vld.sshfl [vmem:[#allocation1 + $0x30] sm:$0xff pattern:$0x75316420]  ;;  %813 = vst.msk [vmem:[#allocation2 + $0xd1] sm:$0xf] %vm799_vm1, %v745_v18 }
 0x1b3   : > { %6200 = vst [vmem:[#allocation26_spill] sm:$0xff] %v4945_v7  ;;  %v1670_v7 = vld [vmem:[#allocation2 + $0x49] sm:$0xf] }
 0x1b4   : > { %v4942_v59 = vld.sshfl [vmem:[#allocation1] sm:$0xff pattern:$0x75316420]  ;;  %1473 = vst [vmem:[#allocation1 + $0x30] ss:$2 sm:$0xff] %v954_v39 }
 0x1b5   : > { %2028 = vst [vmem:[#allocation1] ss:$2 sm:$0xff] %v1707_v42  ;;  %v704_v42 = vpop.f32.mrf.mxu0  ;;  %v962_v39 = vld [vmem:[#allocation2 + $0xb1] sm:$0xf] }
 0x1b6   : > { %2029 = vst [vmem:[#allocation1 + $0x1] ss:$2 sm:$0xff] %v1708_v8 }
 0x1b7   : > { %1475 = vst [vmem:[#allocation1 + $0x31] ss:$2 sm:$0xff] %v955_v3  ;;  %v4947_v37 = vld.sshfl [vmem:[#allocation1 + $0x20] sm:$0xff pattern:$0x75316420] }
 0x1b8   : > { %6201 = vst [vmem:[#allocation27_spill] sm:$0xff] %v4947_v37  ;;  %v1663_v3 = vld [vmem:[#allocation2 + $0xc0] sm:$0xf] }
 0x1b9   : > { %1820 = vst [vmem:[#allocation1 + $0x20] ss:$2 sm:$0xff] %v1655_v27 }
 0x1ba   : > { %1822 = vst [vmem:[#allocation1 + $0x21] ss:$2 sm:$0xff] %v1656_v49 }
 0x1bb   : > { %1871 = vst [vmem:[#allocation1 + $0x10] ss:$2 sm:$0xff] %v1669_v5  ;;  %v1678_v5 = vld [vmem:[#allocation2 + $0xa9] sm:$0xf] }
 0x1bc   : > { %1873 = vst [vmem:[#allocation1 + $0x11] ss:$2 sm:$0xff] %v1670_v7  ;;  %v970_v7 = vld [vmem:[#allocation2 + $0x52] sm:$0xf] }
 0x1bd   : > { %v4949_v8 = vld.sshfl [vmem:[#allocation1] sm:$0xff pattern:$0x75316420]  ;;  %v707_v49 = vpop.f32.mrf.mxu0 }
 0x1be   : > { %2080 = vst [vmem:[#allocation1] ss:$2 sm:$0xff] %v1715_v61  ;;  %v4954_v37 = vld.sshfl [vmem:[#allocation1 + $0x30] sm:$0xff pattern:$0x75316420] }
 0x1bf   : > { %2082 = vst [vmem:[#allocation1 + $0x1] ss:$2 sm:$0xff] %v1716_v62  ;;  %v1677_v61 = vld [vmem:[#allocation2 + $0xa1] sm:$0xf] }
 0x1c0   : > { %1486 = vst [vmem:[#allocation1 + $0x30] ss:$2 sm:$0xff] %v962_v39  ;;  %v1664_v39 = vld [vmem:[#allocation2 + $0xc8] sm:$0xf] }
 0x1c1   : > { %1487 = vst [vmem:[#allocation1 + $0x31] ss:$2 sm:$0xff] %v963_v57  ;;  %v4956_v27 = vld.sshfl [vmem:[#allocation1 + $0x20] sm:$0xff pattern:$0x75316420] }
 0x1c2   : > { %1835 = vst [vmem:[#allocation1 + $0x20] ss:$2 sm:$0xff] %v1663_v3  ;;  %v1731_v57 = vld [vmem:[#allocation2 + $0x3a] sm:$0xf] }
 0x1c3   : > { %v4960_v62 = vld.sshfl [vmem:[#allocation1 + $0x10] sm:$0xff pattern:$0x75316420]  ;;  %1836 = vst [vmem:[#allocation1 + $0x21] ss:$2 sm:$0xff] %v1664_v39 }
 0x1c4   : > { %1888 = vst [vmem:[#allocation1 + $0x10] ss:$2 sm:$0xff] %v1677_v61  ;;  %v1671_v61 = vld [vmem:[#allocation2 + $0x61] sm:$0xf] }
 0x1c5   : > { %1889 = vst [vmem:[#allocation1 + $0x11] ss:$2 sm:$0xff] %v1678_v5  ;;  %v710_v3 = vpop.f32.mrf.mxu0  ;;  %v978_v5 = vld [vmem:[#allocation2 + $0xb2] sm:$0xf] }
 0x1c6   : > { %v4958_v18 = vld.sshfl [vmem:[#allocation1] sm:$0xff pattern:$0x75316420]  ;;  %v1672_v3 = vld [vmem:[#allocation2 + $0x69] sm:$0xf] }
 0x1c7   : > { %6203 = vst [vmem:[#allocation29_spill] sm:$0xff] %v4958_v18 }
 0x1c8   : > { %2099 = vst [vmem:[#allocation1] ss:$2 sm:$0xff] %v1723_v19  ;;  %v4962_v24 = vld.sshfl [vmem:[#allocation1 + $0x30] sm:$0xff pattern:$0x75316420] }
 0x1c9   : > { %2100 = vst [vmem:[#allocation1 + $0x1] ss:$2 sm:$0xff] %v1724_v54  ;;  %v1732_v19 = vld [vmem:[#allocation2 + $0x42] sm:$0xf] }
 0x1ca   : > { %6204 = vst [vmem:[#allocation30_spill] sm:$0xff] %v4962_v24  ;;  %v979_v24 = vld [vmem:[#allocation2 + $0xba] sm:$0xf] }
 0x1cb   : > { %1544 = vst [vmem:[#allocation1 + $0x30] ss:$2 sm:$0xff] %v970_v7  ;;  %v4503_v7 = vld [vmem:[%s6169_s4] ss:$0 sm:$0xff] }
 0x1cc   : > { %1546 = vst [vmem:[#allocation1 + $0x31] ss:$2 sm:$0xff] %v971_v63  ;;  %v4966_v54 = vld.sshfl [vmem:[#allocation1 + $0x10] sm:$0xff pattern:$0x75316420]  ;;  %v705_v39 = vadd.f32 %v4503_v7, %v704_v42 }
 0x1cd   : > { %1942 = vst [vmem:[#allocation1 + $0x10] ss:$2 sm:$0xff] %v1685_v20  ;;  %v4970_v63 = vld.sshfl [vmem:[#allocation1 + $0x20] sm:$0xff pattern:$0x75316420] }
 0x1ce   : > { %1944 = vst [vmem:[#allocation1 + $0x11] ss:$2 sm:$0xff] %v1686_v44  ;;  %v1740_v44 = vld [vmem:[#allocation2 + $0xa2] sm:$0xf]  ;;  %v1680_v7 = vld [vmem:[#allocation2 + $0xc9] sm:$0xf] }
 0x1cf   : > { %6207 = vst [vmem:[#allocation33_spill] sm:$0xff] %v4970_v63  ;;  %v1657_v63 = vld [vmem:[#allocation2 + $0x70] sm:$0xf] }
 0x1d0   : > { %v4964_v49 = vld.sshfl [vmem:[#allocation1] sm:$0xff pattern:$0x75316420]  ;;  %1875 = vst [vmem:[#allocation1 + $0x20] ss:$2 sm:$0xff] %v1671_v61 }
 0x1d1   : > { %6205 = vst [vmem:[#allocation31_spill] sm:$0xff] %v4964_v49  ;;  %v722_v49 = vmax.f32 %v705_v39, 0.0  ;;  %v1748_v61 = vld [vmem:[#allocation2 + $0x40] sm:$0xf]  ;;  %v1701_v39 = vld [vmem:[#allocation2 + $0x48] sm:$0xf] }
 0x1d2   : > { %2135 = vst [vmem:[#allocation1] ss:$2 sm:$0xff] %v1731_v57  ;;  %v1739_v57 = vld [vmem:[#allocation2 + $0x9a] sm:$0xf] }
 0x1d3   : > { %2137 = vst [vmem:[#allocation1 + $0x1] ss:$2 sm:$0xff] %v1732_v19  ;;  %v4968_v17 = vld.sshfl [vmem:[#allocation1 + $0x30] sm:$0xff pattern:$0x75316420] }
 0x1d4   : > { %6206 = vst [vmem:[#allocation32_spill] sm:$0xff] %v4968_v17  ;;  %v1693_v19 = vld [vmem:[#allocation2 + $0xa2] sm:$0xf]  ;;  %v1694_v17 = vld [vmem:[#allocation2 + $0xaa] sm:$0xf] }
 0x1d5   : > { %1557 = vst [vmem:[#allocation1 + $0x30] ss:$2 sm:$0xff] %v978_v5  ;;  %v1954_v5 = vld.sshfl [vmem:[#allocation1 + $0x10] sm:$0xff pattern:$0x75316420] }
 0x1d6   : > { %1558 = vst [vmem:[#allocation1 + $0x31] ss:$2 sm:$0xff] %v979_v24  ;;  %v1658_v24 = vld [vmem:[#allocation2 + $0x78] sm:$0xf] }
 0x1d7   : > { %1877 = vst [vmem:[#allocation1 + $0x21] ss:$2 sm:$0xff] %v1672_v3 }
 0x1d8   : > { %1959 = vst [vmem:[#allocation1 + $0x10] ss:$2 sm:$0xff] %v1693_v19  ;;  %v746_v19 = vrot.slane %v722_v49, 4 }
 0x1d9   : > { %1960 = vst [vmem:[#allocation1 + $0x11] ss:$2 sm:$0xff] %v1694_v17  ;;  %v4165_v17 = vpack.i.bf16 %v4960_v62, %v4912_v58  ;;  %v1709_v62 = vld [vmem:[#allocation2 + $0xa8] sm:$0xf] }
 0x1da   : > { %v4975_v20 = vld.sshfl [vmem:[#allocation1] sm:$0xff pattern:$0x75316420]  ;;  %814 = vst.msk [vmem:[#allocation2 + $0xd9] sm:$0xf] %vm799_vm1, %v722_v49 }
 0x1db   : > { %2154 = vst [vmem:[#allocation1] ss:$2 sm:$0xff] %v1739_v57  ;;  %v1749_v57 = vld [vmem:[#allocation2 + $0x48] sm:$0xf]  ;;  %4166 = vrot.lane.b32.xlu0 %v4165_v17, %s4529_s17 }
 0x1dc   : > { %2155 = vst [vmem:[#allocation1 + $0x1] ss:$2 sm:$0xff] %v1740_v44  ;;  %v1688_v49 = vld [vmem:[#allocation2 + $0x6a] sm:$0xf] }
 0x1dd   : > { %v4977_v18 = vld.sshfl [vmem:[#allocation1 + $0x30] sm:$0xff pattern:$0x75316420]  ;;  %815 = vst.msk [vmem:[#allocation2 + $0xe1] sm:$0xf] %vm799_vm1, %v746_v19 }
 0x1de   : > { %6208 = vst [vmem:[#allocation34_spill] sm:$0xff] %v4977_v18  ;;  %v4980_v42 = vld.sshfl [vmem:[#allocation1 + $0x20] sm:$0xff pattern:$0x75316420]  ;;  %v1710_v19 = vld [vmem:[#allocation2 + $0xb0] sm:$0xf] }
 0x1df   : > { %1824 = vst [vmem:[#allocation1 + $0x30] ss:$2 sm:$0xff] %v1657_v63  ;;  %v1702_v63 = vld [vmem:[#allocation2 + $0x50] sm:$0xf] }
 0x1e0   : > { %1826 = vst [vmem:[#allocation1 + $0x31] ss:$2 sm:$0xff] %v1658_v24  ;;  %v4986_v44 = vld.sshfl [vmem:[#allocation1 + $0x10] sm:$0xff pattern:$0x75316420] }
 0x1e1   : > { %1890 = vst [vmem:[#allocation1 + $0x20] ss:$2 sm:$0xff] %v1679_v40  ;;  %v1687_v24 = vld [vmem:[#allocation2 + $0x62] sm:$0xf]  ;;  %v1665_v40 = vld [vmem:[#allocation2 + $0xd0] sm:$0xf] }
 0x1e2   : > { %1891 = vst [vmem:[#allocation1 + $0x21] ss:$2 sm:$0xff] %v1680_v7  ;;  %v1756_v7 = vld [vmem:[#allocation2 + $0xa0] sm:$0xf]  ;;  %v1666_v17 = vld [vmem:[#allocation2 + $0xd8] sm:$0xf] }
 0x1e3   : > { %v4982_v3 = vld.sshfl [vmem:[#allocation1] sm:$0xff pattern:$0x75316420]  ;;  %2013 = vst [vmem:[#allocation1 + $0x10] ss:$2 sm:$0xff] %v1701_v39  ;;  %v4170_v39 = vpack.i.bf16 %v4966_v54, %v4921_v26 }
 0x1e4   : > { %2206 = vst [vmem:[#allocation1] ss:$2 sm:$0xff] %v1748_v61  ;;  %v1717_v26 = vld [vmem:[#allocation2 + $0x49] sm:$0xf]  ;;  %v1718_v54 = vld [vmem:[#allocation2 + $0x51] sm:$0xf] }
 0x1e5   : > { %2208 = vst [vmem:[#allocation1 + $0x1] ss:$2 sm:$0xff] %v1749_v57  ;;  %v1757_v57 = vld [vmem:[#allocation2 + $0xa8] sm:$0xf]  ;;  %4171 = vrot.lane.b32.xlu0 %v4170_v39, %s4529_s17 }
 0x1e6   : > { %2015 = vst [vmem:[#allocation1 + $0x11] ss:$2 sm:$0xff] %v1702_v63 }
 0x1e7   : > { %v4989_v18 = vld.sshfl [vmem:[#allocation1 + $0x30] sm:$0xff pattern:$0x75316420] }
 0x1e8   : > { %6209 = vst [vmem:[#allocation35_spill] sm:$0xff] %v4989_v18  ;;  %v1696_v18 = vld [vmem:[#allocation2 + $0xca] sm:$0xf] }
 0x1e9   : > { %1837 = vst [vmem:[#allocation1 + $0x30] ss:$2 sm:$0xff] %v1665_v40  ;;  %v1896_v61 = vld.sshfl [vmem:[#allocation1 + $0x20] sm:$0xff pattern:$0x75316420] }
 0x1ea   : > { %1946 = vst [vmem:[#allocation1 + $0x20] ss:$2 sm:$0xff] %v1687_v24  ;;  %v1695_v40 = vld [vmem:[#allocation2 + $0xc2] sm:$0xf] }
 0x1eb   : > { %1948 = vst [vmem:[#allocation1 + $0x21] ss:$2 sm:$0xff] %v1688_v49  ;;  %v4175_v49 = vpack.i.bf16 %v1954_v5, %v4928_v38  ;;  %v4180_v38 = vpack.i.bf16 %v4874_v35, %v4793_v36  ;;  %v1725_v5 = vld [vmem:[#allocation2 + $0xa9] sm:$0xf]  ;;  %v4190_v36 = vpack.i.bf16 %v1896_v61, %v4790_v31  ;;  %v4195_v31 = vpack.i.bf16 %v4986_v44, %v4935_v4  ;;  %v1734_v61 = vld [vmem:[#allocation2 + $0x52] sm:$0xf] }
 0x1ec   : > { %v4992_v58 = vld.sshfl [vmem:[#allocation1] sm:$0xff pattern:$0x75316420]  ;;  %1838 = vst [vmem:[#allocation1 + $0x31] ss:$2 sm:$0xff] %v1666_v17 }
 0x1ed   : > { %2225 = vst [vmem:[#allocation1] ss:$2 sm:$0xff] %v1756_v7  ;;  %v4996_v63 = vld.sshfl [vmem:[#allocation1 + $0x10] sm:$0xff pattern:$0x75316420]  ;;  %4176 = vrot.lane.b32.xlu0 %v4175_v49, %s4530_s18 }
 0x1ee   : > { %2226 = vst [vmem:[#allocation1 + $0x1] ss:$2 sm:$0xff] %v1757_v57  ;;  %v1674_v57 = vld [vmem:[#allocation2 + $0x79] sm:$0xf]  ;;  %v1703_v17 = vld [vmem:[#allocation2 + $0x68] sm:$0xf]  ;;  %v4200_v44 = vpack.i.bf16 %v4996_v63, %v4942_v59 }
 0x1ef   : > { %2030 = vst [vmem:[#allocation1 + $0x10] ss:$2 sm:$0xff] %v1709_v62  ;;  %v1673_v62 = vld [vmem:[#allocation2 + $0x71] sm:$0xf]  ;;  %v1711_v35 = vld [vmem:[#allocation2 + $0xc8] sm:$0xf] }
 0x1f0   : > { %2031 = vst [vmem:[#allocation1 + $0x11] ss:$2 sm:$0xff] %v1710_v19  ;;  %v1726_v49 = vld [vmem:[#allocation2 + $0xb1] sm:$0xf]  ;;  %v1741_v4 = vld [vmem:[#allocation2 + $0xaa] sm:$0xf] }
 0x1f1   : > { %v1781_v63 = vld [vmem:[#allocation2 + $0x4a] sm:$0xf] }
 0x1f2   : > { %v4999_v24 = vld.sshfl [vmem:[#allocation1 + $0x20] sm:$0xff pattern:$0x75316420] }
 0x1f3   : > { %1961 = vst [vmem:[#allocation1 + $0x20] ss:$2 sm:$0xff] %v1695_v40  ;;  %v5005_v39 = vld.sshfl [vmem:[#allocation1 + $0x30] sm:$0xff pattern:$0x75316420] }
 0x1f4   : > { %1962 = vst [vmem:[#allocation1 + $0x21] ss:$2 sm:$0xff] %v1696_v18  ;;  %v1704_v18 = vld [vmem:[#allocation2 + $0x70] sm:$0xf] }
 0x1f5   : > { %6210 = vst [vmem:[#allocation36_spill] sm:$0xff] %v5005_v39  ;;  %4181 = vrot.lane.b32.xlu0 %v4180_v38, %s4529_s17  ;;  %v1764_v39 = vld [vmem:[#allocation2 + $0x41] sm:$0xf]  ;;  %v5019_v38 = vld.sshfl [vmem:[#allocation1] sm:$0xff pattern:$0x75316420] }
 0x1f6   : > { %1879 = vst [vmem:[#allocation1 + $0x30] ss:$2 sm:$0xff] %v1673_v62  ;;  %v1682_v62 = vld [vmem:[#allocation2 + $0xd9] sm:$0xf] }
 0x1f7   : > { %v5003_v7 = vld.sshfl [vmem:[#allocation1 + $0x10] sm:$0xff pattern:$0x75316420]  ;;  %1881 = vst [vmem:[#allocation1 + $0x31] ss:$2 sm:$0xff] %v1674_v57 }
 0x1f8   : > { %2084 = vst [vmem:[#allocation1 + $0x10] ss:$2 sm:$0xff] %v1717_v26  ;;  %v1681_v26 = vld [vmem:[#allocation2 + $0xd1] sm:$0xf] }
 0x1f9   : > { %2086 = vst [vmem:[#allocation1 + $0x11] ss:$2 sm:$0xff] %v1718_v54 }
 0x1fa   : > { %2277 = vst [vmem:[#allocation1] ss:$2 sm:$0xff] %v1764_v39  ;;  %v1772_v39 = vld [vmem:[#allocation2 + $0xa1] sm:$0xf] }
 0x1fb   : > { %v5007_v19 = vld.sshfl [vmem:[#allocation1 + $0x20] sm:$0xff pattern:$0x75316420] }
 0x1fc   : > { %2017 = vst [vmem:[#allocation1 + $0x20] ss:$2 sm:$0xff] %v1703_v17 }
 0x1fd   : > { %2019 = vst [vmem:[#allocation1 + $0x21] ss:$2 sm:$0xff] %v1704_v18  ;;  %4191 = vrot.lane.b32.xlu0 %v4190_v36, %s4529_s17  ;;  %v1765_v18 = vld [vmem:[#allocation2 + $0x49] sm:$0xf] }
 0x1fe   : > { %v1885_v54 = vld.sshfl [vmem:[#allocation1 + $0x30] sm:$0xff pattern:$0x75316420]  ;;  %2279 = vst [vmem:[#allocation1 + $0x1] ss:$2 sm:$0xff] %v1765_v18 }
 0x1ff   : > { %1892 = vst [vmem:[#allocation1 + $0x30] ss:$2 sm:$0xff] %v1681_v26  ;;  %v4185_v57 = vpack.i.bf16 %v1885_v54, %v4980_v42  ;;  %v1689_v26 = vld [vmem:[#allocation2 + $0x72] sm:$0xf]  ;;  %v1719_v18 = vld [vmem:[#allocation2 + $0x69] sm:$0xf] }
 0x200   : > { %v5012_v40 = vld.sshfl [vmem:[#allocation1 + $0x10] sm:$0xff pattern:$0x75316420]  ;;  %1893 = vst [vmem:[#allocation1 + $0x31] ss:$2 sm:$0xff] %v1682_v62 }
 0x201   : > { %2101 = vst [vmem:[#allocation1 + $0x10] ss:$2 sm:$0xff] %v1725_v5  ;;  %4186 = vrot.lane.b32.xlu1 %v4185_v57, %s4529_s17  ;;  %v1733_v5 = vld [vmem:[#allocation2 + $0x4a] sm:$0xf]  ;;  %v1690_v62 = vld [vmem:[#allocation2 + $0x7a] sm:$0xf] }
 0x202   : > { %2102 = vst [vmem:[#allocation1 + $0x11] ss:$2 sm:$0xff] %v1726_v49  ;;  %v1712_v49 = vld [vmem:[#allocation2 + $0xd0] sm:$0xf]  ;;  %v1773_v57 = vld [vmem:[#allocation2 + $0xa9] sm:$0xf] }
 0x204   : > { %v5016_v17 = vld.sshfl [vmem:[#allocation1 + $0x20] sm:$0xff pattern:$0x75316420] }
 0x205   : > { %2032 = vst [vmem:[#allocation1 + $0x20] ss:$2 sm:$0xff] %v1711_v35  ;;  %v5029_v36 = vld.sshfl [vmem:[#allocation1] sm:$0xff pattern:$0x75316420] }
 0x206   : > { %2033 = vst [vmem:[#allocation1 + $0x21] ss:$2 sm:$0xff] %v1712_v49  ;;  %v1720_v49 = vld [vmem:[#allocation2 + $0x71] sm:$0xf] }
 0x207   : > { %v5026_v54 = vld.sshfl [vmem:[#allocation1 + $0x30] sm:$0xff pattern:$0x75316420]  ;;  %2296 = vst [vmem:[#allocation1] ss:$2 sm:$0xff] %v1772_v39 }
 0x208   : > { %1950 = vst [vmem:[#allocation1 + $0x30] ss:$2 sm:$0xff] %v1689_v26  ;;  %v1697_v26 = vld [vmem:[#allocation2 + $0xd2] sm:$0xf]  ;;  %v1698_v39 = vld [vmem:[#allocation2 + $0xda] sm:$0xf] }
 0x209   : > { %v5022_v42 = vld.sshfl [vmem:[#allocation1 + $0x10] sm:$0xff pattern:$0x75316420]  ;;  %1952 = vst [vmem:[#allocation1 + $0x31] ss:$2 sm:$0xff] %v1690_v62  ;;  %4196 = vrot.lane.b32.xlu1 %v4195_v31, %s4530_s18 }
 0x20a   : > { %2139 = vst [vmem:[#allocation1 + $0x10] ss:$2 sm:$0xff] %v1733_v5 }
 0x20b   : > { %2141 = vst [vmem:[#allocation1 + $0x11] ss:$2 sm:$0xff] %v1734_v61  ;;  %v1742_v61 = vld [vmem:[#allocation2 + $0xb2] sm:$0xf] }
 0x20c   : > { %2297 = vst [vmem:[#allocation1 + $0x1] ss:$2 sm:$0xff] %v1773_v57  ;;  %v1780_v57 = vld [vmem:[#allocation2 + $0x42] sm:$0xf] }
 0x20d   : > { %v5031_v35 = vld.sshfl [vmem:[#allocation1 + $0x20] sm:$0xff pattern:$0x75316420] }
 0x20e   : > { %2088 = vst [vmem:[#allocation1 + $0x20] ss:$2 sm:$0xff] %v1719_v18  ;;  %v1751_v18 = vld [vmem:[#allocation2 + $0x58] sm:$0xf] }
 0x20f   : > { %2090 = vst [vmem:[#allocation1 + $0x21] ss:$2 sm:$0xff] %v1720_v49 }
 0x210   : > { %v1956_v31 = vld.sshfl [vmem:[#allocation1 + $0x30] sm:$0xff pattern:$0x75316420] }
 0x211   : > { %4201 = vrot.lane.b32.xlu1 %v4200_v44, %s4531_s19  ;;  %v4215_v62 = vpack.i.bf16 %v1956_v31, %v4999_v24  ;;  %1963 = vst [vmem:[#allocation1 + $0x30] ss:$2 sm:$0xff] %v1697_v26  ;;  %v4205_v44 = vpack.i.bf16 %v4893_v53, %v4801_v50  ;;  %v4225_v24 = vpack.i.bf16 %v5003_v7, %v4949_v8  ;;  %v1727_v26 = vld [vmem:[#allocation2 + $0xc9] sm:$0xf]  ;;  %v1705_v50 = vld [vmem:[#allocation2 + $0x78] sm:$0xf] }
 0x212   : > { %v2151_v5 = vld.sshfl [vmem:[#allocation1 + $0x10] sm:$0xff pattern:$0x75316420]  ;;  %1964 = vst [vmem:[#allocation1 + $0x31] ss:$2 sm:$0xff] %v1698_v39  ;;  %v4240_v31 = vpack.i.bf16 %v4799_v45, %v4975_v20  ;;  %v4220_v45 = vpack.i.bf16 %v5007_v19, %v4797_v41 }
 0x213   : > { %2156 = vst [vmem:[#allocation1 + $0x10] ss:$2 sm:$0xff] %v1741_v4  ;;  %4216 = vrot.lane.b32.xlu2 %v4215_v62, %s4530_s18  ;;  %v5038_v59 = vld.sshfl [vmem:[#allocation1] sm:$0xff pattern:$0x75316420] }
 0x214   : > { %2157 = vst [vmem:[#allocation1 + $0x11] ss:$2 sm:$0xff] %v1742_v61  ;;  %v1750_v4 = vld [vmem:[#allocation2 + $0x50] sm:$0xf]  ;;  %4241 = vrot.lane.b32.xlu0 %v4240_v31, %s4529_s17  ;;  %v1706_v53 = vld [vmem:[#allocation2 + $0x80] sm:$0xf] }
 0x215   : > { %2348 = vst [vmem:[#allocation1] ss:$2 sm:$0xff] %v1780_v57  ;;  %v1728_v39 = vld [vmem:[#allocation2 + $0xd1] sm:$0xf]  ;;  %v1759_v8 = vld [vmem:[#allocation2 + $0xb8] sm:$0xf]  ;;  %v4245_v57 = vpack.i.bf16 %v2151_v5, %v5026_v54  ;;  %v4255_v54 = vpack.i.bf16 %v4811_v2, %v4992_v58  ;;  %v4250_v5 = vpack.i.bf16 %v4805_v56, %v4982_v3  ;;  %v4235_v2 = vpack.i.bf16 %v5031_v35, %v4807_v60 }
 0x216   : > { %2350 = vst [vmem:[#allocation1 + $0x1] ss:$2 sm:$0xff] %v1781_v63  ;;  %v5046_v49 = vld.sshfl [vmem:[#allocation1 + $0x20] sm:$0xff pattern:$0x75316420] }
 0x217   : > { %2103 = vst [vmem:[#allocation1 + $0x20] ss:$2 sm:$0xff] %v1727_v26  ;;  %v1758_v20 = vld [vmem:[#allocation2 + $0xb0] sm:$0xf]  ;;  %v1735_v63 = vld [vmem:[#allocation2 + $0x6a] sm:$0xf] }
 0x218   : > { %2104 = vst [vmem:[#allocation1 + $0x21] ss:$2 sm:$0xff] %v1728_v39  ;;  %v1714_v31 = vld [vmem:[#allocation2 + $0xe0] sm:$0xf]  ;;  %v1767_v19 = vld [vmem:[#allocation2 + $0x59] sm:$0xf] }
 0x219   : > { %4206 = vrot.lane.b32.xlu1 %v4205_v44, %s4530_s18  ;;  %v1968_v62 = vld.sshfl [vmem:[#allocation1 + $0x30] sm:$0xff pattern:$0x75316420]  ;;  %v1713_v44 = vld [vmem:[#allocation2 + $0xd8] sm:$0xf] }
 0x21a   : > { %2021 = vst [vmem:[#allocation1 + $0x30] ss:$2 sm:$0xff] %v1705_v50  ;;  %v1766_v26 = vld [vmem:[#allocation2 + $0x51] sm:$0xf]  ;;  %v1722_v56 = vld [vmem:[#allocation2 + $0x81] sm:$0xf] }
 0x21b   : > { %v5040_v61 = vld.sshfl [vmem:[#allocation1 + $0x10] sm:$0xff pattern:$0x75316420]  ;;  %4226 = vrot.lane.b32.xlu2 %v4225_v24, %s4531_s19  ;;  %2023 = vst [vmem:[#allocation1 + $0x31] ss:$2 sm:$0xff] %v1706_v53 }
 0x21c   : > { %2210 = vst [vmem:[#allocation1 + $0x10] ss:$2 sm:$0xff] %v1750_v4  ;;  %4246 = vrot.lane.b32.xlu0 %v4245_v57, %s4529_s17  ;;  %v1736_v4 = vld [vmem:[#allocation2 + $0x72] sm:$0xf]  ;;  %v1721_v53 = vld [vmem:[#allocation2 + $0x79] sm:$0xf] }
 0x21d   : > { %2212 = vst [vmem:[#allocation1 + $0x11] ss:$2 sm:$0xff] %v1751_v18  ;;  %v1774_v57 = vld [vmem:[#allocation2 + $0xb1] sm:$0xf]  ;;  %v1753_v60 = vld [vmem:[#allocation2 + $0x78] sm:$0xf] }
 0x21e   : > { %v1729_v35 = vld [vmem:[#allocation2 + $0xd9] sm:$0xf] }
 0x21f   : > { %v5058_v18 = vld.sshfl [vmem:[#allocation1 + $0x20] sm:$0xff pattern:$0x75316420] }
 0x220   : > { %2143 = vst [vmem:[#allocation1 + $0x20] ss:$2 sm:$0xff] %v1735_v63 }
 0x221   : > { %4221 = vrot.lane.b32.xlu1 %v4220_v45, %s4530_s18  ;;  %2145 = vst [vmem:[#allocation1 + $0x21] ss:$2 sm:$0xff] %v1736_v4  ;;  %v1752_v4 = vld [vmem:[#allocation2 + $0x70] sm:$0xf] }
 0x222   : > { %v2027_v24 = vld.sshfl [vmem:[#allocation1 + $0x30] sm:$0xff pattern:$0x75316420] }
 0x223   : > { %2034 = vst [vmem:[#allocation1 + $0x30] ss:$2 sm:$0xff] %v1713_v44  ;;  %v4230_v41 = vpack.i.bf16 %v2027_v24, %v5016_v17  ;;  %v1743_v17 = vld [vmem:[#allocation2 + $0xca] sm:$0xf] }
 0x224   : > { %v2222_v7 = vld.sshfl [vmem:[#allocation1 + $0x10] sm:$0xff pattern:$0x75316420]  ;;  %2035 = vst [vmem:[#allocation1 + $0x31] ss:$2 sm:$0xff] %v1714_v31  ;;  %4251 = vrot.lane.b32.xlu0 %v4250_v5, %s4529_s17  ;;  %v4290_v31 = vpack.i.bf16 %v4828_v28, %v5029_v36  ;;  %v4037_v28 = vld [vmem:[%s6170_s5 + $0x238] sm:$0xff] }
 0x225   : > { %2227 = vst [vmem:[#allocation1 + $0x10] ss:$2 sm:$0xff] %v1758_v20  ;;  %4231 = vrot.lane.b32.xlu2 %v4230_v41, %s4531_s19  ;;  %v4270_v58 = vpack.i.bf16 %v2222_v7, %v1968_v62  ;;  %v1775_v20 = vld [vmem:[#allocation2 + $0xb9] sm:$0xf]  ;;  %v4265_v62 = vpack.i.bf16 %v5040_v61, %v4925_v12  ;;  %v4285_v7 = vpack.i.bf16 %v4818_v14, %v5019_v38  ;;  %v1760_v12 = vld [vmem:[#allocation2 + $0xd0] sm:$0xf] }
 0x226   : > { %2228 = vst [vmem:[#allocation1 + $0x11] ss:$2 sm:$0xff] %v1759_v8  ;;  %v1744_v8 = vld [vmem:[#allocation2 + $0xd2] sm:$0xf]  ;;  %v1783_v41 = vld [vmem:[#allocation2 + $0x5a] sm:$0xf]  ;;  %2574 = vmatpush.msra.mxu3 %v4037_v28 }
 0x227   : > { %v1737_v5 = vld [vmem:[#allocation2 + $0x7a] sm:$0xf]  ;;  %v4017_v28 = vld [vmem:[%s6170_s5 + $0x198] sm:$0xff] }
 0x228   : > { %v2152_v50 = vld.sshfl [vmem:[#allocation1 + $0x20] sm:$0xff pattern:$0x75316420]  ;;  %2480 = vmatpush.msra.mxu1 %v4017_v28  ;;  %v4007_v28 = vld [vmem:[%s6170_s5 + $0x148] sm:$0xff] }
 0x229   : > { %4256 = vrot.lane.b32.xlu1 %v4255_v54, %s4530_s18  ;;  %2158 = vst [vmem:[#allocation1 + $0x20] ss:$2 sm:$0xff] %v1743_v17  ;;  %v4260_v3 = vpack.i.bf16 %v4852_v23, %v2152_v50  ;;  %v1730_v23 = vld [vmem:[#allocation2 + $0xe1] sm:$0xf]  ;;  %v1761_v14 = vld [vmem:[#allocation2 + $0xd8] sm:$0xf] }
 0x22a   : > { %2159 = vst [vmem:[#allocation1 + $0x21] ss:$2 sm:$0xff] %v1744_v8  ;;  %v1738_v17 = vld [vmem:[#allocation2 + $0x82] sm:$0xf]  ;;  %v4036_v50 = vld [vmem:[%s6170_s5 + $0x230] sm:$0xff]  ;;  %v4034_v8 = vld [vmem:[%s6170_s5 + $0x220] sm:$0xff] }
 0x22b   : > { %v2039_v45 = vld.sshfl [vmem:[#allocation1 + $0x30] sm:$0xff pattern:$0x75316420]  ;;  %2575 = vmatpush.msra.mxu3 %v4036_v50 }
 0x22c   : > { %2092 = vst [vmem:[#allocation1 + $0x30] ss:$2 sm:$0xff] %v1721_v53  ;;  %4261 = vrot.lane.b32.xlu0 %v4260_v3, %s4529_s17  ;;  %v4035_v53 = vld [vmem:[%s6170_s5 + $0x228] sm:$0xff]  ;;  %v1745_v3 = vld [vmem:[#allocation2 + $0xda] sm:$0xf] }
 0x22d   : > { %v5066_v39 = vld.sshfl [vmem:[#allocation1 + $0x10] sm:$0xff pattern:$0x75316420]  ;;  %2094 = vst [vmem:[#allocation1 + $0x31] ss:$2 sm:$0xff] %v1722_v56  ;;  %4236 = vrot.lane.b32.xlu2 %v4235_v2, %s4531_s19  ;;  %2576 = vmatpush.msra.mxu3 %v4035_v53 }
 0x22e   : > { %2281 = vst [vmem:[#allocation1 + $0x10] ss:$2 sm:$0xff] %v1766_v26  ;;  %v2363_v2 = vld.sshfl [vmem:[#allocation1] sm:$0xff pattern:$0x75316420] }
 0x22f   : > { %2283 = vst [vmem:[#allocation1 + $0x11] ss:$2 sm:$0xff] %v1767_v19  ;;  %v1782_v19 = vld [vmem:[#allocation2 + $0x52] sm:$0xf]  ;;  %2577 = vmatpush.msra.mxu3 %v4034_v8  ;;  %v1769_v56 = vld [vmem:[#allocation2 + $0x79] sm:$0xf] }
 0x230   : > { %4038 = vmatmul.msk.f32.vlgmr.msra.gmra.mxu3 %vm1563_vm2, %v2363_v2  ;;  %v1763_v50 = vld [vmem:[#allocation2 + $0xe8] sm:$0xf]  ;;  %v5144_v2 = vpop.permute.xlu0 %4151 }
 0x231   : > { %4271 = vrot.lane.b32.xlu1 %v4270_v58, %s4530_s18  ;;  %v5076_v44 = vld.sshfl [vmem:[#allocation1 + $0x20] sm:$0xff pattern:$0x75316420]  ;;  %v4300_v58 = vpack.i.bf16 %v5066_v39, %v4937_v13  ;;  %v1790_v13 = vld [vmem:[#allocation2 + $0xb2] sm:$0xf] }
 0x232   : > { %2214 = vst [vmem:[#allocation1 + $0x20] ss:$2 sm:$0xff] %v1752_v4  ;;  %v1755_v39 = vld [vmem:[#allocation2 + $0x88] sm:$0xf]  ;;  %v4345_v53 = vpack.i.bf16 %v4860_v47, %v5076_v44  ;;  %v4014_v47 = vld [vmem:[%s6170_s5 + $0x180] sm:$0xff] }
 0x233   : > { %2216 = vst [vmem:[#allocation1 + $0x21] ss:$2 sm:$0xff] %v1753_v60  ;;  %v1788_v60 = vld [vmem:[#allocation2 + $0xa2] sm:$0xf] }
 0x234   : > { %v5078_v24 = vld.sshfl [vmem:[#allocation1 + $0x30] sm:$0xff pattern:$0x75316420]  ;;  %4266 = vrot.lane.b32.xlu0 %v4265_v62, %s4529_s17  ;;  %2367 = vst [vmem:[#allocation1] ss:$2 sm:$0xff] %v1788_v60 }
 0x235   : > { %2105 = vst [vmem:[#allocation1 + $0x30] ss:$2 sm:$0xff] %v1729_v35  ;;  %4291 = vrot.lane.b32.xlu2 %v4290_v31, %s4531_s19  ;;  %v1789_v35 = vld [vmem:[#allocation2 + $0xaa] sm:$0xf] }
 0x236   : > { %v2293_v63 = vld.sshfl [vmem:[#allocation1 + $0x10] sm:$0xff pattern:$0x75316420]  ;;  %2106 = vst [vmem:[#allocation1 + $0x31] ss:$2 sm:$0xff] %v1730_v23 }
 0x237   : > { %2298 = vst [vmem:[#allocation1 + $0x10] ss:$2 sm:$0xff] %v1774_v57  ;;  %v4305_v26 = vpack.i.bf16 %v2293_v63, %v2039_v45  ;;  %v4320_v57 = vpack.i.bf16 %v4834_v43, %v5038_v59  ;;  %v1746_v63 = vld [vmem:[#allocation2 + $0xe2] sm:$0xf]  ;;  %v1776_v23 = vld [vmem:[#allocation2 + $0xd1] sm:$0xf] }
 0x238   : > { %2299 = vst [vmem:[#allocation1 + $0x11] ss:$2 sm:$0xff] %v1775_v20  ;;  %v1754_v43 = vld [vmem:[#allocation2 + $0x80] sm:$0xf] }
 0x239   : > { %4286 = vrot.lane.b32.xlu1 %v4285_v7, %s4530_s18  ;;  %2368 = vst [vmem:[#allocation1 + $0x1] ss:$2 sm:$0xff] %v1789_v35  ;;  %v1777_v7 = vld [vmem:[#allocation2 + $0xd9] sm:$0xf] }
 0x23a   : > { %v2223_v61 = vld.sshfl [vmem:[#allocation1 + $0x20] sm:$0xff pattern:$0x75316420] }
 0x23b   : > { %2229 = vst [vmem:[#allocation1 + $0x20] ss:$2 sm:$0xff] %v1760_v12  ;;  %v4295_v36 = vpack.i.bf16 %v4868_v10, %v2223_v61  ;;  %v1768_v10 = vld [vmem:[#allocation2 + $0x71] sm:$0xf]  ;;  %v2743_v12 = vld [vmem:[#allocation2 + $0x60] sm:$0xf] }
 0x23c   : > { %2230 = vst [vmem:[#allocation1 + $0x21] ss:$2 sm:$0xff] %v1761_v14  ;;  %v1784_v14 = vld [vmem:[#allocation2 + $0x72] sm:$0xf] }
 0x23d   : > { %v5091_v38 = vld.sshfl [vmem:[#allocation1 + $0x30] sm:$0xff pattern:$0x75316420]  ;;  %4306 = vrot.lane.b32.xlu2 %v4305_v26, %s4531_s19 }
 0x23e   : > { %2147 = vst [vmem:[#allocation1 + $0x30] ss:$2 sm:$0xff] %v1737_v5  ;;  %v2744_v5 = vld [vmem:[#allocation2 + $0x68] sm:$0xf] }
 0x23f   : > { %v5088_v54 = vld.sshfl [vmem:[#allocation1 + $0x10] sm:$0xff pattern:$0x75316420]  ;;  %2149 = vst [vmem:[#allocation1 + $0x31] ss:$2 sm:$0xff] %v1738_v17 }
 0x240   : > { %2352 = vst [vmem:[#allocation1 + $0x10] ss:$2 sm:$0xff] %v1782_v19  ;;  %v4280_v19 = vpack.i.bf16 %v4838_v55, %v4824_v22  ;;  %v5127_v61 = vld.sshfl [vmem:[#allocation1] sm:$0xff pattern:$0x75316420]  ;;  %v4016_v22 = vld [vmem:[%s6170_s5 + $0x190] sm:$0xff]  ;;  %v4330_v26 = vpack.i.bf16 %v5088_v54, %v4954_v37 }
 0x241   : > { %2354 = vst [vmem:[#allocation1 + $0x11] ss:$2 sm:$0xff] %v1783_v41  ;;  %4296 = vrot.lane.b32.xlu1 %v4295_v36, %s4530_s18  ;;  %v1762_v55 = vld [vmem:[#allocation2 + $0xe0] sm:$0xf]  ;;  %2481 = vmatpush.msra.mxu1 %v4016_v22  ;;  %v2745_v54 = vld [vmem:[#allocation2 + $0x70] sm:$0xf] }
 0x242   : > { %2905 = vst [vmem:[#allocation1] ss:$2 sm:$0xff] %v2743_v12  ;;  %v2751_v17 = vld [vmem:[#allocation2 + $0xc0] sm:$0xf]  ;;  %v2753_v12 = vld [vmem:[#allocation2 + $0xd0] sm:$0xf] }
 0x243   : > { %v5108_v45 = vld.sshfl [vmem:[#allocation1 + $0x20] sm:$0xff pattern:$0x75316420]  ;;  %2907 = vst [vmem:[#allocation1 + $0x1] ss:$2 sm:$0xff] %v2744_v5  ;;  %v1627_v22 = vld [vmem:[%s6170_s5 + $0x68] sm:$0xff] }
 0x244   : > { %2285 = vst [vmem:[#allocation1 + $0x20] ss:$2 sm:$0xff] %v1768_v10  ;;  %v4015_v10 = vld [vmem:[%s6170_s5 + $0x188] sm:$0xff] }
 0x245   : > { %2287 = vst [vmem:[#allocation1 + $0x21] ss:$2 sm:$0xff] %v1769_v56  ;;  %4321 = vrot.lane.b32.xlu2 %v4320_v57, %s4531_s19  ;;  %2482 = vmatpush.msra.mxu1 %v4015_v10  ;;  %v5163_v57 = vpop.permute.xlu2 %4161  ;;  %v4350_v10 = vpack.i.bf16 %v4876_v46, %v5108_v45  ;;  %v1626_v46 = vld [vmem:[%s6170_s5 + $0x60] sm:$0xff] }
 0x246   : > { %v2153_v20 = vld.sshfl [vmem:[#allocation1 + $0x30] sm:$0xff pattern:$0x75316420] }
 0x247   : > { %2160 = vst [vmem:[#allocation1 + $0x30] ss:$2 sm:$0xff] %v1745_v3  ;;  %v4275_v4 = vpack.i.bf16 %v2153_v20, %v4856_v34  ;;  %v1791_v34 = vld [vmem:[#allocation2 + $0xba] sm:$0xf]  ;;  %v2752_v3 = vld [vmem:[#allocation2 + $0xc8] sm:$0xf]  ;;  %2483 = vmatpush.msra.mxu1 %v4014_v47 }
 0x248   : > { %2161 = vst [vmem:[#allocation1 + $0x31] ss:$2 sm:$0xff] %v1746_v63  ;;  %v2364_v62 = vld.sshfl [vmem:[#allocation1 + $0x10] sm:$0xff pattern:$0x75316420] }
 0x249   : > { %4301 = vrot.lane.b32.xlu1 %v4300_v58, %s4530_s18  ;;  %4276 = vrot.lane.b32.xlu0 %v4275_v4, %s4529_s17  ;;  %2369 = vst [vmem:[#allocation1 + $0x10] ss:$2 sm:$0xff] %v1790_v13  ;;  %v2746_v58 = vld [vmem:[#allocation2 + $0x78] sm:$0xf]  ;;  %v4012_v20 = vld [vmem:[%s6170_s5 + $0x170] sm:$0xff]  ;;  %v4011_v13 = vld [vmem:[%s6170_s5 + $0x168] sm:$0xff] }
 0x24a   : > { %4039 = vmatmul.msk.f32.gmra.mxu3 %vm1563_vm2, %v2364_v62  ;;  %2370 = vst [vmem:[#allocation1 + $0x11] ss:$2 sm:$0xff] %v1791_v34  ;;  %v5155_v56 = vld.sshfl [vmem:[#allocation1] sm:$0xff pattern:$0x75316420] }
 0x24b   : > { %2924 = vst [vmem:[#allocation1] ss:$2 sm:$0xff] %v2751_v17  ;;  %v1770_v63 = vld [vmem:[#allocation2 + $0x81] sm:$0xf]  ;;  %v1792_v4 = vld [vmem:[#allocation2 + $0xd2] sm:$0xf]  ;;  %v5206_v17 = vpop.permute.xlu1 %4156 }
 0x24c   : > { %v2294_v59 = vld.sshfl [vmem:[#allocation1 + $0x20] sm:$0xff pattern:$0x75316420]  ;;  %2925 = vst [vmem:[#allocation1 + $0x1] ss:$2 sm:$0xff] %v2752_v3 }
 0x24d   : > { %2300 = vst [vmem:[#allocation1 + $0x20] ss:$2 sm:$0xff] %v1776_v23  ;;  %v4325_v31 = vpack.i.bf16 %v4887_v32, %v2294_v59  ;;  %v1785_v32 = vld [vmem:[#allocation2 + $0x7a] sm:$0xf]  ;;  %v5170_v62 = vpop.permute.xlu0 %4166  ;;  %v2759_v34 = vld [vmem:[#allocation2 + $0x61] sm:$0xf]  ;;  %v5193_v5 = vpop.permute.xlu2 %4211 }
 0x24e   : > { %2301 = vst [vmem:[#allocation1 + $0x21] ss:$2 sm:$0xff] %v1777_v7  ;;  %v1793_v23 = vld [vmem:[#allocation2 + $0xda] sm:$0xf]  ;;  %v2747_v7 = vld [vmem:[#allocation2 + $0x90] sm:$0xf] }
 0x24f   : > { %v5121_v41 = vld.sshfl [vmem:[#allocation1 + $0x30] sm:$0xff pattern:$0x75316420]  ;;  %4326 = vrot.lane.b32.xlu2 %v4325_v31, %s4531_s19  ;;  %v4010_v59 = vld [vmem:[%s6170_s5 + $0x160] sm:$0xff] }
 0x250   : > { %2218 = vst [vmem:[#allocation1 + $0x30] ss:$2 sm:$0xff] %v1754_v43  ;;  %v4355_v35 = vpack.i.bf16 %v5121_v41, %v4864_v0  ;;  %v4315_v0 = vpack.i.bf16 %v4854_v30, %v4836_v48  ;;  %v2760_v31 = vld [vmem:[#allocation2 + $0x69] sm:$0xf]  ;;  %v1629_v48 = vld [vmem:[%s6170_s5 + $0x78] sm:$0xff] }
 0x251   : > { %2220 = vst [vmem:[#allocation1 + $0x31] ss:$2 sm:$0xff] %v1755_v39  ;;  %4281 = vrot.lane.b32.xlu0 %v4280_v19, %s4529_s17  ;;  %v5152_v44 = vld.sshfl [vmem:[#allocation1 + $0x10] sm:$0xff pattern:$0x75316420]  ;;  %v4009_v19 = vld [vmem:[%s6170_s5 + $0x158] sm:$0xff]  ;;  %2619 = vmatpush.msrb.mxu3 %v1629_v48 }
 0x252   : > { %2909 = vst [vmem:[#allocation1 + $0x10] ss:$2 sm:$0xff] %v2745_v54  ;;  %v1771_v39 = vld [vmem:[#allocation2 + $0x89] sm:$0xf]  ;;  %v2767_v54 = vld [vmem:[#allocation2 + $0xc1] sm:$0xf] }
 0x253   : > { %2911 = vst [vmem:[#allocation1 + $0x11] ss:$2 sm:$0xff] %v2746_v58  ;;  %v5182_v41 = vld.sshfl [vmem:[#allocation1] sm:$0xff pattern:$0x75316420]  ;;  %v4008_v30 = vld [vmem:[%s6170_s5 + $0x150] sm:$0xff] }
 0x254   : > { %2960 = vst [vmem:[#allocation1] ss:$2 sm:$0xff] %v2759_v34  ;;  %v2768_v58 = vld [vmem:[#allocation2 + $0xc9] sm:$0xf]  ;;  %v4002_v34 = vld [vmem:[%s6170_s5 + $0x120] sm:$0xff] }
 0x255   : > { %v5135_v36 = vld.sshfl [vmem:[#allocation1 + $0x20] sm:$0xff pattern:$0x75316420]  ;;  %2962 = vst [vmem:[#allocation1 + $0x1] ss:$2 sm:$0xff] %v2760_v31 }
 0x256   : > { %2356 = vst [vmem:[#allocation1 + $0x20] ss:$2 sm:$0xff] %v1784_v14  ;;  %v1628_v14 = vld [vmem:[%s6170_s5 + $0x70] sm:$0xff]  ;;  %v1786_v31 = vld [vmem:[#allocation2 + $0x82] sm:$0xf] }
 0x257   : > { %2358 = vst [vmem:[#allocation1 + $0x21] ss:$2 sm:$0xff] %v1785_v32  ;;  %4331 = vrot.lane.b32.xlu2 %v4330_v26, %s4531_s19  ;;  %v2748_v32 = vld [vmem:[#allocation2 + $0x98] sm:$0xf]  ;;  %v1778_v26 = vld [vmem:[#allocation2 + $0xe1] sm:$0xf]  ;;  %2620 = vmatpush.msrb.mxu3 %v1628_v14  ;;  %v5215_v47 = vpop.permute.xlu0 %4171 }
 0x258   : > { %v2224_v8 = vld.sshfl [vmem:[#allocation1 + $0x30] sm:$0xff pattern:$0x75316420]  ;;  %v1621_v14 = vld [vmem:[%s6170_s5 + $0x38] sm:$0xff] }
 0x259   : > { %2231 = vst [vmem:[#allocation1 + $0x30] ss:$2 sm:$0xff] %v1762_v55  ;;  %4346 = vrot.lane.b32.xlu0 %v4345_v53, %s4529_s17  ;;  %v4310_v37 = vpack.i.bf16 %v2224_v8, %v4872_v29  ;;  %v4013_v29 = vld [vmem:[%s6170_s5 + $0x178] sm:$0xff]  ;;  %v1779_v53 = vld [vmem:[#allocation2 + $0xe9] sm:$0xf]  ;;  %v4006_v8 = vld [vmem:[%s6170_s5 + $0x140] sm:$0xff]  ;;  %2621 = vmatpush.msrb.mxu3 %v1627_v22 }
 0x25a   : > { %2232 = vst [vmem:[#allocation1 + $0x31] ss:$2 sm:$0xff] %v1763_v50  ;;  %2484 = vmatpush.msra.mxu1 %v4013_v29  ;;  %v5204_v55 = vld.sshfl [vmem:[#allocation1 + $0x10] sm:$0xff pattern:$0x75316420]  ;;  %v4005_v29 = vld [vmem:[%s6170_s5 + $0x138] sm:$0xff] }
 0x25b   : > { %4311 = vrot.lane.b32.xlu1 %v4310_v37, %s4530_s18  ;;  %2926 = vst [vmem:[#allocation1 + $0x10] ss:$2 sm:$0xff] %v2753_v12  ;;  %2622 = vmatpush.msrb.mxu3 %v1626_v46  ;;  %v1622_v12 = vld [vmem:[%s6170_s5 + $0x40] sm:$0xff]  ;;  %v1794_v46 = vld [vmem:[#allocation2 + $0xe2] sm:$0xf] }
 0x25c   : > { %2485 = vmatpush.msra.mxu1 %v4012_v20  ;;  %v2975_v45 = vld.sshfl [vmem:[#allocation1] sm:$0xff pattern:$0x75316420]  ;;  %v1625_v20 = vld [vmem:[%s6170_s5 + $0x58] sm:$0xff] }
 0x25d   : > { %2979 = vst [vmem:[#allocation1] ss:$2 sm:$0xff] %v2767_v54  ;;  %2623 = vmatpush.msrb.mxu3 %v1625_v20  ;;  %v2764_v54 = vld [vmem:[#allocation2 + $0x99] sm:$0xf] }
 0x25e   : > { %v2365_v60 = vld.sshfl [vmem:[#allocation1 + $0x20] sm:$0xff pattern:$0x75316420]  ;;  %2486 = vmatpush.msra.mxu1 %v4011_v13  ;;  %2980 = vst [vmem:[#allocation1 + $0x1] ss:$2 sm:$0xff] %v2768_v58  ;;  %v4003_v13 = vld [vmem:[%s6170_s5 + $0x128] sm:$0xff] }
 0x25f   : > { %4040 = vmatmul.msk.f32.gmra.mxu3 %vm1563_vm2, %v2365_v60  ;;  %2371 = vst [vmem:[#allocation1 + $0x20] ss:$2 sm:$0xff] %v1792_v4  ;;  %v4375_v4 = vpack.i.bf16 %v4884_v15, %v2975_v45  ;;  %v4004_v60 = vld [vmem:[%s6170_s5 + $0x130] sm:$0xff]  ;;  %v1623_v15 = vld [vmem:[%s6170_s5 + $0x48] sm:$0xff]  ;;  %v4365_v45 = vpack.i.bf16 %v4901_v52, %v5135_v36  ;;  %v4033_v52 = vld [vmem:[%s6170_s5 + $0x218] sm:$0xff] }
 0x260   : > { %2372 = vst [vmem:[#allocation1 + $0x21] ss:$2 sm:$0xff] %v1793_v23  ;;  %2487 = vmatpush.msra.mxu1 %v4010_v59  ;;  %v2783_v58 = vld [vmem:[#allocation2 + $0xc2] sm:$0xf]  ;;  %v1617_v36 = vld [vmem:[%s6170_s5 + $0x18] sm:$0xff]  ;;  %2521 = vmatpush.msra.mxu2 %v4033_v52 }
 0x261   : > { %v5173_v43 = vld.sshfl [vmem:[#allocation1 + $0x30] sm:$0xff pattern:$0x75316420]  ;;  %4356 = vrot.lane.b32.xlu0 %v4355_v35, %s4529_s17 }
 0x262   : > { %2289 = vst [vmem:[#allocation1 + $0x30] ss:$2 sm:$0xff] %v1770_v63  ;;  %2488 = vmatpush.msra.mxu1 %v4009_v19  ;;  %v1624_v35 = vld [vmem:[%s6170_s5 + $0x50] sm:$0xff]  ;;  %v4360_v59 = vpack.i.bf16 %v5173_v43, %v4880_v6  ;;  %v2775_v6 = vld [vmem:[#allocation2 + $0x62] sm:$0xf]  ;;  %v5259_v43 = vpop.permute.xlu0 %4176 }
 0x263   : > { %2291 = vst [vmem:[#allocation1 + $0x31] ss:$2 sm:$0xff] %v1771_v39  ;;  %4316 = vrot.lane.b32.xlu1 %v4315_v0, %s4530_s18  ;;  %v2755_v39 = vld [vmem:[#allocation2 + $0xf0] sm:$0xf]  ;;  %v2756_v0 = vld [vmem:[#allocation2 + $0xf8] sm:$0xf]  ;;  %2624 = vmatpush.msrb.mxu3 %v1624_v35 }
 0x264   : > { %2489 = vmatpush.msra.mxu1 %v4008_v30  ;;  %v1787_v19 = vld [vmem:[#allocation2 + $0x8a] sm:$0xf]  ;;  %v4340_v30 = vpack.i.bf16 %v4870_v21, %v4850_v16  ;;  %v2763_v16 = vld [vmem:[#allocation2 + $0x91] sm:$0xf] }
 0x265   : > { %2625 = vmatpush.msrb.mxu3 %v1623_v15  ;;  %v2776_v21 = vld [vmem:[#allocation2 + $0x6a] sm:$0xf] }
 0x266   : > { %2490 = vmatpush.msra.mxu1 %v4007_v28  ;;  %v1620_v28 = vld [vmem:[%s6170_s5 + $0x30] sm:$0xff] }
 0x267   : > { %v5208_v50 = vld.sshfl [vmem:[#allocation1 + $0x20] sm:$0xff pattern:$0x75316420]  ;;  %2626 = vmatpush.msrb.mxu3 %v1622_v12  ;;  %v2784_v15 = vld [vmem:[#allocation2 + $0xca] sm:$0xf] }
 0x268   : > { %2913 = vst [vmem:[#allocation1 + $0x20] ss:$2 sm:$0xff] %v2747_v7  ;;  %2491 = vmatpush.msra.mxu1 %v4006_v8  ;;  %v1619_v8 = vld [vmem:[%s6170_s5 + $0x28] sm:$0xff] }
 0x269   : > { %2915 = vst [vmem:[#allocation1 + $0x21] ss:$2 sm:$0xff] %v2748_v32  ;;  %4376 = vrot.lane.b32.xlu0 %v4375_v4, %s4529_s17  ;;  %v5268_v32 = vld.sshfl [vmem:[#allocation1] sm:$0xff pattern:$0x75316420]  ;;  %2627 = vmatpush.msrb.mxu3 %v1621_v14  ;;  %v1615_v14 = vld [vmem:[%s6170_s5 + $0x8] sm:$0xff] }
 0x26a   : > { %v2295_v37 = vld.sshfl [vmem:[#allocation1 + $0x30] sm:$0xff pattern:$0x75316420]  ;;  %2492 = vmatpush.msra.mxu1 %v4005_v29  ;;  %3031 = vst [vmem:[#allocation1] ss:$2 sm:$0xff] %v2775_v6  ;;  %v1618_v4 = vld [vmem:[%s6170_s5 + $0x20] sm:$0xff]  ;;  %v5299_v35 = vpop.permute.xlu0 %4181 }
 0x26b   : > { %2302 = vst [vmem:[#allocation1 + $0x30] ss:$2 sm:$0xff] %v1778_v26  ;;  %4351 = vrot.lane.b32.xlu1 %v4350_v10, %s4530_s18  ;;  %v4335_v3 = vpack.i.bf16 %v2295_v37, %v4891_v11  ;;  %v2754_v11 = vld [vmem:[#allocation2 + $0xd8] sm:$0xf]  ;;  %v2761_v26 = vld [vmem:[#allocation2 + $0x71] sm:$0xf]  ;;  %2628 = vmatpush.msrb.mxu3 %v1620_v28 }
 0x26c   : > { %2303 = vst [vmem:[#allocation1 + $0x31] ss:$2 sm:$0xff] %v1779_v53  ;;  %2493 = vmatpush.msra.mxu1 %v4004_v60  ;;  %v2762_v37 = vld [vmem:[#allocation2 + $0x79] sm:$0xf]  ;;  %v1795_v29 = vld [vmem:[#allocation2 + $0xea] sm:$0xf]  ;;  %v4178_v60 = vunpack.i.l.bf16 %v5259_v43 }
 0x26d   : > { %4336 = vrot.lane.b32.xlu2 %v4335_v3, %s4531_s19  ;;  %v5229_v63 = vpop.permute.xlu2 %4216  ;;  %2927 = vst [vmem:[#allocation1 + $0x11] ss:$2 sm:$0xff] %v2754_v11  ;;  %2629 = vmatpush.msrb.mxu3 %v1619_v8  ;;  %v4168_v11 = vunpack.i.l.bf16 %v5170_v62 }
 0x26e   : > { %2494 = vmatpush.msra.mxu1 %v4003_v13  ;;  %3033 = vst [vmem:[#allocation1 + $0x1] ss:$2 sm:$0xff] %v2776_v21  ;;  %v4032_v13 = vld [vmem:[%s6170_s5 + $0x210] sm:$0xff] }
 0x26f   : > { %2630 = vmatpush.msrb.mxu3 %v1618_v4  ;;  %2522 = vmatpush.msra.mxu2 %v4032_v13  ;;  %v2379_v12 = vsel %vm1563_vm2, %v4895_v25, %v4168_v11  ;;  %v4030_v25 = vld [vmem:[%s6170_s5 + $0x200] sm:$0xff] }
 0x270   : > { %v5252_v7 = vld.sshfl [vmem:[#allocation1 + $0x20] sm:$0xff pattern:$0x75316420]  ;;  %2495 = vmatpush.msra.mxu1 %v4002_v34  ;;  %v2387_v28 = vsel %vm1572_vm3, %v2379_v12, %v4178_v60  ;;  %v2793_v60 = vld [vmem:[#allocation2 + $0x70] sm:$0xf] }
 0x271   : > { %2928 = vst [vmem:[#allocation1 + $0x20] ss:$2 sm:$0xff] %v2755_v39  ;;  %v2769_v39 = vld [vmem:[#allocation2 + $0xd1] sm:$0xf]  ;;  %2631 = vmatpush.msrb.mxu3 %v1617_v36 }
 0x272   : > { %2929 = vst [vmem:[#allocation1 + $0x21] ss:$2 sm:$0xff] %v2756_v0  ;;  %v5350_v11 = vpop.permute.xlu0 %4191  ;;  %v2777_v36 = vld [vmem:[#allocation2 + $0x72] sm:$0xf] }
 0x273   : > { %v5241_v23 = vpop.permute.xlu1 %4186  ;;  %v5254_v48 = vld.sshfl [vmem:[#allocation1 + $0x30] sm:$0xff pattern:$0x75316420]  ;;  %4361 = vrot.lane.b32.xlu1 %v4360_v59, %s4530_s18 }
 0x274   : > { %2360 = vst [vmem:[#allocation1 + $0x30] ss:$2 sm:$0xff] %v1786_v31  ;;  %v5273_v22 = vld.sshfl [vmem:[#allocation1 + $0x10] sm:$0xff pattern:$0x75316420]  ;;  %v4370_v8 = vpack.i.bf16 %v5254_v48, %v4899_v51  ;;  %v4029_v48 = vld [vmem:[%s6170_s5 + $0x1f8] sm:$0xff] }
 0x275   : > { %2362 = vst [vmem:[#allocation1 + $0x31] ss:$2 sm:$0xff] %v1787_v19  ;;  %4341 = vrot.lane.b32.xlu2 %v4340_v30, %s4531_s19  ;;  %v5275_v53 = vpop.permute.xlu2 %4226  ;;  %v3046_v0 = vld.sshfl [vmem:[#allocation1] sm:$0xff pattern:$0x75316420]  ;;  %v1616_v59 = vld [vmem:[%s6170_s5 + $0x10] sm:$0xff] }
 0x276   : > { %6211 = vst [vmem:[#allocation37_spill] sm:$0xff] %v5273_v22  ;;  %v4380_v31 = vpack.i.bf16 %v4917_v33, %v3046_v0  ;;  %v4031_v19 = vld [vmem:[%s6170_s5 + $0x208] sm:$0xff]  ;;  %v2771_v30 = vld [vmem:[#allocation2 + $0xf1] sm:$0xf]  ;;  %v2770_v33 = vld [vmem:[#allocation2 + $0xd9] sm:$0xf]  ;;  %2632 = vmatpush.msrb.mxu3 %v1616_v59 }
 0x277   : > { %2964 = vst [vmem:[#allocation1 + $0x10] ss:$2 sm:$0xff] %v2761_v26  ;;  %2523 = vmatpush.msra.mxu2 %v4031_v19  ;;  %v2778_v0 = vld [vmem:[#allocation2 + $0x7a] sm:$0xf] }
 0x278   : > { %2966 = vst [vmem:[#allocation1 + $0x11] ss:$2 sm:$0xff] %v2762_v37  ;;  %v1614_v37 = vld [vmem:[%s6170_s5] sm:$0xff]  ;;  %2633 = vmatpush.msrb.mxu3 %v1615_v14 }
 0x279   : > { %v5282_v3 = vld.sshfl [vmem:[#allocation1 + $0x20] sm:$0xff pattern:$0x75316420]  ;;  %3050 = vst [vmem:[#allocation1] ss:$2 sm:$0xff] %v2783_v58  ;;  %2524 = vmatpush.msra.mxu2 %v4030_v25 }
 0x27a   : > { %6212 = vst [vmem:[#allocation38_spill] sm:$0xff] %v5282_v3  ;;  %v2749_v58 = vld [vmem:[#allocation2 + $0xa0] sm:$0xf]  ;;  %2634 = vmatpush.msrb.mxu3 %v1614_v37  ;;  %v4026_v19 = vld [vmem:[%s6170_s5 + $0x1e0] sm:$0xff]  ;;  %v2758_v25 = vld [vmem:[#allocation2 + $0x108] sm:$0xf] }
 0x27b   : > { %v5277_v10 = vpop.permute.xlu1 %4196  ;;  %2968 = vst [vmem:[#allocation1 + $0x20] ss:$2 sm:$0xff] %v2763_v16  ;;  %4381 = vrot.lane.b32.xlu1 %v4380_v31, %s4530_s18  ;;  %2525 = vmatpush.msra.mxu2 %v4029_v48  ;;  %v1642_v14 = vld [vmem:[%s6170_s5 + $0xe0] sm:$0xff] }
 0x27c   : > { %v2366_v20 = vld.sshfl [vmem:[#allocation1 + $0x30] sm:$0xff pattern:$0x75316420]  ;;  %2970 = vst [vmem:[#allocation1 + $0x21] ss:$2 sm:$0xff] %v2764_v54 }
 0x27d   : > { %4041 = vmatmul.msk.f32.gmra.mxu3 %vm1563_vm2, %v2366_v20  ;;  %2373 = vst [vmem:[#allocation1 + $0x30] ss:$2 sm:$0xff] %v1794_v46  ;;  %4366 = vrot.lane.b32.xlu2 %v4365_v45, %s4531_s19  ;;  %v4169_v46 = vunpack.i.h.bf16 %v5170_v62  ;;  %v2750_v45 = vld [vmem:[#allocation2 + $0xa8] sm:$0xf] }
 0x27e   : > { %2374 = vst [vmem:[#allocation1 + $0x31] ss:$2 sm:$0xff] %v1795_v29  ;;  %v4179_v29 = vunpack.i.h.bf16 %v5259_v43  ;;  %v2792_v62 = vld [vmem:[#allocation2 + $0x68] sm:$0xf]  ;;  %v1645_v43 = vld [vmem:[%s6170_s5 + $0xf8] sm:$0xff] }
 0x27f   : > { %3051 = vst [vmem:[#allocation1 + $0x1] ss:$2 sm:$0xff] %v2784_v15  ;;  %v5319_v16 = vld.sshfl [vmem:[#allocation1 + $0x10] sm:$0xff pattern:$0x75316420]  ;;  %v5321_v21 = vpop.permute.xlu2 %4231  ;;  %v2380_v13 = vsel %vm1563_vm2, %v4923_v9, %v4169_v46  ;;  %2660 = vmatpush.msrb.mxu1 %v1645_v43  ;;  %v4188_v9 = vunpack.i.l.bf16 %v5241_v23  ;;  %v4218_v46 = vunpack.i.l.bf16 %v5229_v63 }
 0x280   : > { %2981 = vst [vmem:[#allocation1 + $0x10] ss:$2 sm:$0xff] %v2769_v39  ;;  %v4027_v39 = vld [vmem:[%s6170_s5 + $0x1e8] sm:$0xff]  ;;  %v1644_v15 = vld [vmem:[%s6170_s5 + $0xf0] sm:$0xff]  ;;  %v2388_v59 = vsel %vm1572_vm3, %v2380_v13, %v4179_v29  ;;  %v4233_v37 = vunpack.i.l.bf16 %v5321_v21  ;;  %v2785_v13 = vld [vmem:[#allocation2 + $0xd2] sm:$0xf] }
 0x281   : > { %2982 = vst [vmem:[#allocation1 + $0x11] ss:$2 sm:$0xff] %v2770_v33  ;;  %2661 = vmatpush.msrb.mxu1 %v1644_v15  ;;  %v2757_v33 = vld [vmem:[#allocation2 + $0x100] sm:$0xf]  ;;  %v2800_v29 = vld [vmem:[#allocation2 + $0xc8] sm:$0xf] }
 0x283   : > { %v5307_v34 = vpop.permute.xlu1 %4201  ;;  %v5334_v54 = vld.sshfl [vmem:[#allocation1 + $0x20] sm:$0xff pattern:$0x75316420] }
 0x284   : > { %v4203_v6 = vunpack.i.l.bf16 %v5307_v34  ;;  %2983 = vst [vmem:[#allocation1 + $0x20] ss:$2 sm:$0xff] %v2771_v30  ;;  %v4204_v20 = vunpack.i.h.bf16 %v5307_v34  ;;  %v1643_v34 = vld [vmem:[%s6170_s5 + $0xe8] sm:$0xff] }
 0x285   : > { %4042 = vmatmul.msk.f32.gmra.mxu3 %vm1563_vm2, %v5127_v61  ;;  %4371 = vrot.lane.b32.xlu2 %v4370_v8, %s4531_s19  ;;  %v5340_v51 = vld.sshfl [vmem:[#allocation1 + $0x30] sm:$0xff pattern:$0x75316420] }
 0x286   : > { %v2395_v26 = vsel %vm1581_vm4, %v2387_v28, %v4203_v6  ;;  %2917 = vst [vmem:[#allocation1 + $0x30] ss:$2 sm:$0xff] %v2749_v58  ;;  %v4028_v61 = vld [vmem:[%s6170_s5 + $0x1f0] sm:$0xff]  ;;  %v5354_v52 = vld.sshfl [vmem:[#allocation1] sm:$0xff pattern:$0x75316420]  ;;  %v2396_v31 = vsel %vm1581_vm4, %v2388_v59, %v4204_v20  ;;  %2662 = vmatpush.msrb.mxu1 %v1643_v34  ;;  %v5400_v48 = vpop.permute.xlu0 %4241 }
 0x287   : > { %2496 = vmatmul.f32.vlgmr.msra.gmra.mxu1 %v2395_v26  ;;  %2919 = vst [vmem:[#allocation1 + $0x31] ss:$2 sm:$0xff] %v2750_v45  ;;  %2526 = vmatpush.msra.mxu2 %v4028_v61  ;;  %v2772_v6 = vld [vmem:[#allocation2 + $0xf9] sm:$0xf]  ;;  %v5378_v12 = vpop.permute.xlu2 %4236  ;;  %v4025_v28 = vld [vmem:[%s6170_s5 + $0x1d8] sm:$0xff]  ;;  %v4024_v58 = vld [vmem:[%s6170_s5 + $0x1d0] sm:$0xff] }
 0x288   : > { %3102 = vst [vmem:[#allocation1] ss:$2 sm:$0xff] %v2792_v62  ;;  %v5376_v30 = vld.sshfl [vmem:[#allocation1 + $0x10] sm:$0xff pattern:$0x75316420]  ;;  %v1641_v26 = vld [vmem:[%s6170_s5 + $0xd8] sm:$0xff]  ;;  %2663 = vmatpush.msrb.mxu1 %v1642_v14  ;;  %v4234_v14 = vunpack.i.h.bf16 %v5321_v21 }
 0x289   : > { %3104 = vst [vmem:[#allocation1 + $0x1] ss:$2 sm:$0xff] %v2793_v60  ;;  %2527 = vmatpush.msra.mxu2 %v4027_v39  ;;  %v1640_v45 = vld [vmem:[%s6170_s5 + $0xd0] sm:$0xff]  ;;  %v2779_v61 = vld [vmem:[#allocation2 + $0x92] sm:$0xf]  ;;  %v4023_v60 = vld [vmem:[%s6170_s5 + $0x1c8] sm:$0xff]  ;;  %v4189_v39 = vunpack.i.h.bf16 %v5241_v23 }
 0x28a   : > { %3035 = vst [vmem:[#allocation1 + $0x10] ss:$2 sm:$0xff] %v2777_v36  ;;  %2664 = vmatpush.msrb.mxu1 %v1641_v26  ;;  %v2801_v62 = vld [vmem:[#allocation2 + $0xd0] sm:$0xf]  ;;  %v2786_v59 = vld [vmem:[#allocation2 + $0xda] sm:$0xf] }
 0x28b   : > { %v5352_v4 = vpop.permute.xlu1 %4206  ;;  %3037 = vst [vmem:[#allocation1 + $0x11] ss:$2 sm:$0xff] %v2778_v0  ;;  %2528 = vmatpush.msra.mxu2 %v4026_v19  ;;  %v1639_v0 = vld [vmem:[%s6170_s5 + $0xc8] sm:$0xff]  ;;  %v4022_v34 = vld [vmem:[%s6170_s5 + $0x1c0] sm:$0xff]  ;;  %v4020_v21 = vld [vmem:[%s6170_s5 + $0x1b0] sm:$0xff] }
 0x28c   : > { %2984 = vst [vmem:[#allocation1 + $0x21] ss:$2 sm:$0xff] %v2772_v6  ;;  %2665 = vmatpush.msrb.mxu1 %v1640_v45  ;;  %v1638_v23 = vld [vmem:[%s6170_s5 + $0xc0] sm:$0xff]  ;;  %v4021_v6 = vld [vmem:[%s6170_s5 + $0x1b8] sm:$0xff]  ;;  %v2766_v45 = vld [vmem:[#allocation2 + $0xa9] sm:$0xf] }
 0x28d   : > { %4043 = vmatmul.msk.f32.gmra.mxu3 %vm1563_vm2, %v5152_v44  ;;  %v2381_v44 = vsel %vm1563_vm2, %v4956_v27, %v4188_v9  ;;  %2529 = vmatpush.msra.mxu2 %v4025_v28  ;;  %v2780_v19 = vld [vmem:[#allocation2 + $0x9a] sm:$0xf] }
 0x28e   : > { %v5391_v8 = vld.sshfl [vmem:[#allocation1 + $0x30] sm:$0xff pattern:$0x75316420]  ;;  %v2389_v43 = vsel %vm1572_vm3, %v2381_v44, %v4218_v46  ;;  %2666 = vmatpush.msrb.mxu1 %v1639_v0  ;;  %v4219_v44 = vunpack.i.h.bf16 %v5229_v63  ;;  %v4193_v63 = vunpack.i.l.bf16 %v5350_v11 }
 0x28f   : > { %2499 = vmatmul.f32.gmra.mxu1 %v2396_v31  ;;  %2930 = vst [vmem:[#allocation1 + $0x30] ss:$2 sm:$0xff] %v2757_v33  ;;  %2530 = vmatpush.msra.mxu2 %v4024_v58  ;;  %v2397_v15 = vsel %vm1581_vm4, %v2389_v43, %v4233_v37  ;;  %v4243_v33 = vunpack.i.l.bf16 %v5400_v48  ;;  %v2765_v37 = vld [vmem:[#allocation2 + $0xa1] sm:$0xf]  ;;  %v4184_v58 = vunpack.i.h.bf16 %v5299_v35  ;;  %v2808_v46 = vld [vmem:[#allocation2 + $0x69] sm:$0xf]  ;;  %v5455_v43 = vpop.permute.xlu0 %4246 }
 0x290   : > { %2931 = vst [vmem:[#allocation1 + $0x31] ss:$2 sm:$0xff] %v2758_v25  ;;  %v3117_v27 = vld.sshfl [vmem:[#allocation1] sm:$0xff pattern:$0x75316420]  ;;  %v1637_v25 = vld [vmem:[%s6170_s5 + $0xb8] sm:$0xff]  ;;  %2667 = vmatpush.msrb.mxu1 %v1638_v23 }
 0x291   : > { %v4385_v36 = vpack.i.bf16 %v4933_v1, %v3117_v27  ;;  %3121 = vst [vmem:[#allocation1] ss:$2 sm:$0xff] %v2800_v29  ;;  %v5418_v1 = vpop.permute.xlu2 %4291  ;;  %2531 = vmatpush.msra.mxu2 %v4023_v60  ;;  %v4209_v29 = vunpack.i.h.bf16 %v5352_v4  ;;  %v4019_v60 = vld [vmem:[%s6170_s5 + $0x1a8] sm:$0xff] }
 0x292   : > { %3122 = vst [vmem:[#allocation1 + $0x1] ss:$2 sm:$0xff] %v2801_v62  ;;  %v5423_v9 = vld.sshfl [vmem:[#allocation1 + $0x10] sm:$0xff pattern:$0x75316420]  ;;  %2668 = vmatpush.msrb.mxu1 %v1637_v25  ;;  %v6216_v25 = vld [vmem:[#allocation15_spill] sm:$0xff] }
 0x293   : > { %v5405_v20 = vpop.permute.xlu1 %4221  ;;  %4386 = vrot.lane.b32.xlu2 %v4385_v36, %s4531_s19  ;;  %3052 = vst [vmem:[#allocation1 + $0x10] ss:$2 sm:$0xff] %v2785_v13  ;;  %v5430_v31 = vld.sshfl [vmem:[#allocation1 + $0x20] sm:$0xff pattern:$0x75316420]  ;;  %2532 = vmatpush.msra.mxu2 %v4022_v34  ;;  %v6215_v34 = vld [vmem:[#allocation29_spill] sm:$0xff] }
 0x294   : > { %3053 = vst [vmem:[#allocation1 + $0x11] ss:$2 sm:$0xff] %v2786_v59  ;;  %v4293_v59 = vunpack.i.l.bf16 %v5418_v1  ;;  %v2403_v23 = vsel %vm1563_vm2, %v6215_v34, %v4243_v33 }
 0x295   : > { %4044 = vmatmul.msk.f32.gmra.mxu3 %vm1563_vm2, %v5208_v50  ;;  %v6213_v50 = vld [vmem:[#allocation35_spill] sm:$0xff]  ;;  %3039 = vst [vmem:[#allocation1 + $0x20] ss:$2 sm:$0xff] %v2779_v61  ;;  %2533 = vmatpush.msra.mxu2 %v4021_v6  ;;  %v4173_v61 = vunpack.i.l.bf16 %v5215_v47  ;;  %v4198_v6 = vunpack.i.l.bf16 %v5277_v10 }
 0x296   : > { %v2382_v28 = vsel %vm1563_vm2, %v6213_v50, %v4189_v39  ;;  %3041 = vst [vmem:[#allocation1 + $0x21] ss:$2 sm:$0xff] %v2780_v19  ;;  %v2809_v39 = vld [vmem:[#allocation2 + $0x71] sm:$0xf]  ;;  %v2794_v19 = vld [vmem:[#allocation2 + $0x78] sm:$0xf] }
 0x297   : > { %2502 = vmatmul.f32.gmra.mxu1 %v2397_v15  ;;  %v5442_v26 = vld.sshfl [vmem:[#allocation1 + $0x30] sm:$0xff pattern:$0x75316420]  ;;  %v2390_v62 = vsel %vm1572_vm3, %v2382_v28, %v4219_v44  ;;  %v4223_v15 = vunpack.i.l.bf16 %v5405_v20  ;;  %2534 = vmatpush.msra.mxu2 %v4020_v21  ;;  %v4018_v50 = vld [vmem:[%s6170_s5 + $0x1a0] sm:$0xff]  ;;  %v2787_v44 = vld [vmem:[#allocation2 + $0xf2] sm:$0xf] }
 0x298   : > { %6214 = vst [vmem:[#allocation35_spill] sm:$0xff] %v5442_v26  ;;  %v2398_v0 = vsel %vm1581_vm4, %v2390_v62, %v4234_v14  ;;  %v1592_v14 = vsel %vm1563_vm2, %v6216_v25, %v4184_v58  ;;  %v2788_v58 = vld [vmem:[#allocation2 + $0xfa] sm:$0xf]  ;;  %v4244_v25 = vunpack.i.h.bf16 %v5400_v48  ;;  %v2817_v48 = vld [vmem:[#allocation2 + $0xd1] sm:$0xf] }
 0x299   : > { %2972 = vst [vmem:[#allocation1 + $0x30] ss:$2 sm:$0xff] %v2765_v37  ;;  %v5461_v13 = vld.sshfl [vmem:[#allocation1] sm:$0xff pattern:$0x75316420]  ;;  %2535 = vmatpush.msra.mxu2 %v4019_v60  ;;  %v5481_v21 = vsel %vm1572_vm3, %v1592_v14, %v4209_v29  ;;  %v6218_v60 = vld [vmem:[#allocation19_spill] sm:$0xff]  ;;  %v4238_v29 = vunpack.i.l.bf16 %v5378_v12 }
 0x29a   : > { %2974 = vst [vmem:[#allocation1 + $0x31] ss:$2 sm:$0xff] %v2766_v45  ;;  %v6217_v45 = vld [vmem:[#allocation4_spill] sm:$0xff] }
 0x29b   : > { %v5450_v27 = vpop.permute.xlu1 %4256  ;;  %3173 = vst [vmem:[#allocation1] ss:$2 sm:$0xff] %v2808_v46  ;;  %v5478_v37 = vld.sshfl [vmem:[#allocation1 + $0x10] sm:$0xff pattern:$0x75316420]  ;;  %v1564_v62 = vsel %vm1563_vm2, %v6217_v45, %v4193_v63  ;;  %2536 = vmatpush.msra.mxu2 %v4018_v50 }
 0x29c   : > { %v4258_v36 = vunpack.i.l.bf16 %v5450_v27  ;;  %3175 = vst [vmem:[#allocation1 + $0x1] ss:$2 sm:$0xff] %v2809_v39  ;;  %v2795_v46 = vld [vmem:[#allocation2 + $0x80] sm:$0xf]  ;;  %v1573_v39 = vsel %vm1572_vm3, %v1564_v62, %v4223_v15  ;;  %v1636_v63 = vld [vmem:[%s6170_s5 + $0xb0] sm:$0xff]  ;;  %v4259_v45 = vunpack.i.h.bf16 %v5450_v27  ;;  %v1633_v27 = vld [vmem:[%s6170_s5 + $0x98] sm:$0xff] }
 0x29d   : > { %4045 = vmatmul.msk.f32.gmra.mxu3 %vm1563_vm2, %v5340_v51  ;;  %3106 = vst [vmem:[#allocation1 + $0x10] ss:$2 sm:$0xff] %v2794_v19  ;;  %v4249_v51 = vunpack.i.h.bf16 %v5455_v43  ;;  %v1635_v15 = vld [vmem:[%s6170_s5 + $0xa8] sm:$0xff]  ;;  %2669 = vmatpush.msrb.mxu1 %v1636_v63  ;;  %v2816_v50 = vld [vmem:[#allocation2 + $0xc9] sm:$0xf] }
 0x29e   : > { %v2411_v28 = vsel %vm1572_vm3, %v2403_v23, %v4258_v36  ;;  %v5485_v36 = vpop.permute.xlu2 %4306  ;;  %3108 = vst [vmem:[#allocation1 + $0x11] ss:$2 sm:$0xff] %v2795_v46  ;;  %v2773_v23 = vld [vmem:[#allocation2 + $0x101] sm:$0xf] }
 0x29f   : > { %2505 = vmatmul.f32.gmra.mxu1 %v2398_v0  ;;  %v2419_v33 = vsel %vm1581_vm4, %v2411_v28, %v4293_v59  ;;  %v2383_v0 = vsel %vm1563_vm2, %v6218_v60, %v4173_v61  ;;  %v5491_v59 = vld.sshfl [vmem:[#allocation1 + $0x20] sm:$0xff pattern:$0x75316420]  ;;  %v4228_v61 = vunpack.i.l.bf16 %v5275_v53  ;;  %v1582_v28 = vsel %vm1581_vm4, %v1573_v39, %v4238_v29  ;;  %v5521_v60 = vpop.permute.xlu0 %4251 }
 0x2a0   : > { %v2391_v34 = vsel %vm1572_vm3, %v2383_v0, %v4198_v6  ;;  %2537 = vmatmul.f32.vlgmr.msra.gmra.mxu2 %v2419_v33  ;;  %3054 = vst [vmem:[#allocation1 + $0x20] ss:$2 sm:$0xff] %v2787_v44  ;;  %v4174_v6 = vunpack.i.h.bf16 %v5215_v47  ;;  %v1634_v33 = vld [vmem:[%s6170_s5 + $0xa0] sm:$0xff]  ;;  %v4309_v62 = vunpack.i.h.bf16 %v5485_v36  ;;  %v2404_v47 = vsel %vm1563_vm2, %v5012_v40, %v4249_v51  ;;  %2670 = vmatpush.msrb.mxu1 %v1635_v15  ;;  %v2803_v15 = vld [vmem:[#allocation2 + $0xe0] sm:$0xf] }
 0x2a1   : > { %3055 = vst [vmem:[#allocation1 + $0x21] ss:$2 sm:$0xff] %v2788_v58  ;;  %v5511_v44 = vld.sshfl [vmem:[#allocation1 + $0x30] sm:$0xff pattern:$0x75316420]  ;;  %v2399_v46 = vsel %vm1581_vm4, %v2391_v34, %v4228_v61  ;;  %v4199_v39 = vunpack.i.h.bf16 %v5277_v10  ;;  %v6219_v34 = vld [vmem:[#allocation5_spill] sm:$0xff] }
 0x2a2   : > { %2985 = vst [vmem:[#allocation1 + $0x30] ss:$2 sm:$0xff] %v2773_v23  ;;  %2671 = vmatpush.msrb.mxu1 %v1634_v33  ;;  %v2796_v51 = vld [vmem:[#allocation2 + $0x98] sm:$0xf]  ;;  %v1565_v10 = vsel %vm1563_vm2, %v6219_v34, %v4244_v25  ;;  %v6220_v23 = vld [vmem:[#allocation28_spill] sm:$0xff] }
 0x2a3   : > { %v5502_v19 = vpop.permute.xlu1 %4271  ;;  %v5518_v58 = vld.sshfl [vmem:[#allocation1] sm:$0xff pattern:$0x75316420]  ;;  %v2384_v61 = vsel %vm1563_vm2, %v6220_v23, %v4174_v6 }
 0x2a4   : > { %v4274_v14 = vunpack.i.h.bf16 %v5502_v19  ;;  %3192 = vst [vmem:[#allocation1] ss:$2 sm:$0xff] %v2816_v50  ;;  %v2802_v29 = vld [vmem:[#allocation2 + $0xd8] sm:$0xf]  ;;  %v1574_v50 = vsel %vm1572_vm3, %v1565_v10, %v4259_v45  ;;  %2672 = vmatpush.msrb.mxu1 %v1633_v27  ;;  %v2392_v33 = vsel %vm1572_vm3, %v2384_v61, %v4199_v39  ;;  %v4194_v45 = vunpack.i.h.bf16 %v5350_v11  ;;  %v2824_v39 = vld [vmem:[#allocation2 + $0x6a] sm:$0xf] }
 0x2a5   : > { %2635 = vmatmul.f32.vlgmr.msrb.gmra.mxu3 %v1582_v28  ;;  %3193 = vst [vmem:[#allocation1 + $0x1] ss:$2 sm:$0xff] %v2817_v48  ;;  %v5530_v63 = vld.sshfl [vmem:[#allocation1 + $0x10] sm:$0xff pattern:$0x75316420]  ;;  %v4224_v27 = vunpack.i.h.bf16 %v5405_v20  ;;  %v6221_v11 = vld [vmem:[#allocation33_spill] sm:$0xff] }
 0x2a6   : > { %v2412_v0 = vsel %vm1572_vm3, %v2404_v47, %v4274_v14  ;;  %3123 = vst [vmem:[#allocation1 + $0x10] ss:$2 sm:$0xff] %v2802_v29  ;;  %v2774_v28 = vld [vmem:[#allocation2 + $0x109] sm:$0xf]  ;;  %v4294_v14 = vunpack.i.h.bf16 %v5418_v1  ;;  %v4229_v47 = vunpack.i.h.bf16 %v5275_v53  ;;  %v2825_v53 = vld [vmem:[#allocation2 + $0x72] sm:$0xf]  ;;  %v4158_v29 = vunpack.i.l.bf16 %v5206_v17 }
 0x2a7   : > { %2508 = vmatmul.f32.gmra.mxu1 %v2399_v46  ;;  %v2420_v40 = vsel %vm1581_vm4, %v2412_v0, %v4309_v62  ;;  %v5537_v46 = vpop.permute.xlu2 %4321  ;;  %3124 = vst [vmem:[#allocation1 + $0x11] ss:$2 sm:$0xff] %v2803_v15  ;;  %v2797_v62 = vld [vmem:[#allocation2 + $0xa0] sm:$0xf]  ;;  %v4153_v0 = vunpack.i.l.bf16 %v5144_v2  ;;  %v4262_v34 = vpop.permute.xlu0 %4261  ;;  %v2385_v10 = vsel %vm1563_vm2, %v6221_v11, %v4194_v45  ;;  %v2804_v23 = vld [vmem:[#allocation2 + $0xf8] sm:$0xf] }
 0x2a8   : > { %2540 = vmatmul.f32.gmra.mxu2 %v2420_v40  ;;  %v5539_v25 = vld.sshfl [vmem:[#allocation1 + $0x20] sm:$0xff pattern:$0x75316420]  ;;  %v1583_v6 = vsel %vm1581_vm4, %v1574_v50, %v4294_v14  ;;  %v2400_v1 = vsel %vm1581_vm4, %v2392_v33, %v4229_v47  ;;  %2986 = vst [vmem:[#allocation1 + $0x31] ss:$2 sm:$0xff] %v2774_v28  ;;  %v2393_v20 = vsel %vm1572_vm3, %v2385_v10, %v4224_v27  ;;  %v6222_v50 = vld [vmem:[#allocation3_spill] sm:$0xff]  ;;  %v4239_v33 = vunpack.i.h.bf16 %v5378_v12 }
 0x2a9   : > { %3110 = vst [vmem:[#allocation1 + $0x20] ss:$2 sm:$0xff] %v2796_v51  ;;  %v2810_v51 = vld [vmem:[#allocation2 + $0x79] sm:$0xf]  ;;  %v2811_v61 = vld [vmem:[#allocation2 + $0x81] sm:$0xf]  ;;  %v1566_v28 = vsel %vm1563_vm2, %v6222_v50, %v4153_v0  ;;  %v4248_v12 = vunpack.i.l.bf16 %v5455_v43  ;;  %v4273_v10 = vunpack.i.l.bf16 %v5502_v19 }
 0x2aa   : > { %3112 = vst [vmem:[#allocation1 + $0x21] ss:$2 sm:$0xff] %v2797_v62  ;;  %v2805_v14 = vld [vmem:[#allocation2 + $0x100] sm:$0xf]  ;;  %v4263_v62 = vunpack.i.l.bf16 %v4262_v34  ;;  %v1575_v47 = vsel %vm1572_vm3, %v1566_v28, %v4158_v29  ;;  %v2401_v29 = vsel %vm1581_vm4, %v2393_v20, %v4239_v33  ;;  %v2832_v50 = vld [vmem:[#allocation2 + $0xca] sm:$0xf] }
 0x2ab   : > { %v5542_v48 = vpop.permute.xlu1 %4286  ;;  %v1631_v11 = vld [vmem:[%s6170_s5 + $0x88] sm:$0xff]  ;;  %v1630_v20 = vld [vmem:[%s6170_s5 + $0x80] sm:$0xff]  ;;  %v2833_v33 = vld [vmem:[#allocation2 + $0xd2] sm:$0xf] }
 0x2ac   : > { %v5549_v40 = vld.sshfl [vmem:[#allocation1] sm:$0xff pattern:$0x75316420] }
 0x2ad   : > { %2638 = vmatmul.f32.gmra.mxu3 %v1583_v6  ;;  %3228 = vst [vmem:[#allocation1] ss:$2 sm:$0xff] %v2824_v39  ;;  %v1632_v6 = vld [vmem:[%s6170_s5 + $0x90] sm:$0xff]  ;;  %v4264_v39 = vunpack.i.h.bf16 %v4262_v34 }
 0x2ae   : > { %3230 = vst [vmem:[#allocation1 + $0x1] ss:$2 sm:$0xff] %v2825_v53  ;;  %v5554_v15 = vld.sshfl [vmem:[#allocation1 + $0x10] sm:$0xff pattern:$0x75316420]  ;;  %2673 = vmatpush.msrb.mxu1 %v1632_v6 }
 0x2af   : > { %2511 = vmatmul.f32.gmra.mxu1 %v2400_v1  ;;  %3177 = vst [vmem:[#allocation1 + $0x10] ss:$2 sm:$0xff] %v2810_v51  ;;  %v4163_v1 = vunpack.i.l.bf16 %v5163_v57  ;;  %v4327_v27 = vpop.permute.xlu2 %4326  ;;  %v5567_v0 = vld.sshfl [vmem:[#allocation1 + $0x30] sm:$0xff pattern:$0x75316420] }
 0x2b0   : > { %3179 = vst [vmem:[#allocation1 + $0x11] ss:$2 sm:$0xff] %v2811_v61  ;;  %v2781_v53 = vld [vmem:[#allocation2 + $0xa2] sm:$0xf]  ;;  %v4328_v43 = vunpack.i.l.bf16 %v4327_v27  ;;  %2674 = vmatpush.msrb.mxu1 %v1631_v11  ;;  %v6223_v6 = vld [vmem:[#allocation8_spill] sm:$0xff] }
 0x2b1   : > { %v5564_v45 = vld.sshfl [vmem:[#allocation1 + $0x20] sm:$0xff pattern:$0x75316420]  ;;  %v1584_v34 = vsel %vm1581_vm4, %v1575_v47, %v4163_v1  ;;  %3043 = vst [vmem:[#allocation1 + $0x30] ss:$2 sm:$0xff] %v2781_v53  ;;  %v1567_v1 = vsel %vm1563_vm2, %v6223_v6, %v4264_v39 }
 0x2b2   : > { %3125 = vst [vmem:[#allocation1 + $0x20] ss:$2 sm:$0xff] %v2804_v23  ;;  %v2782_v53 = vld [vmem:[#allocation2 + $0xaa] sm:$0xf]  ;;  %2675 = vmatpush.msrb.mxu1 %v1630_v20  ;;  %v2812_v39 = vld [vmem:[#allocation2 + $0x99] sm:$0xf]  ;;  %v4154_v20 = vunpack.i.h.bf16 %v5144_v2 }
 0x2b3   : > { %v4297_v51 = vpop.permute.xlu1 %4296  ;;  %3126 = vst [vmem:[#allocation1 + $0x21] ss:$2 sm:$0xff] %v2805_v14  ;;  %v2405_v14 = vsel %vm1563_vm2, %v5046_v49, %v4263_v62  ;;  %v4329_v62 = vunpack.i.h.bf16 %v4327_v27  ;;  %v2826_v6 = vld [vmem:[#allocation2 + $0x7a] sm:$0xf] }
 0x2b4   : > { %v4299_v61 = vunpack.i.h.bf16 %v4297_v51  ;;  %v4298_v23 = vunpack.i.l.bf16 %v4297_v51  ;;  %v6224_v51 = vld [vmem:[#allocation36_spill] sm:$0xff]  ;;  %3045 = vst [vmem:[#allocation1 + $0x31] ss:$2 sm:$0xff] %v2782_v53  ;;  %v6225_v2 = vld [vmem:[#allocation10_spill] sm:$0xff] }
 0x2b5   : > { %2641 = vmatmul.f32.gmra.mxu3 %v1584_v34  ;;  %v3243_v28 = vld.sshfl [vmem:[#allocation1] sm:$0xff pattern:$0x75316420]  ;;  %v2386_v11 = vsel %vm1563_vm2, %v6224_v51, %v4248_v12  ;;  %v1590_v53 = vsel %vm1563_vm2, %v6225_v2, %v4154_v20  ;;  %v2827_v51 = vld [vmem:[#allocation2 + $0x82] sm:$0xf] }
 0x2b6   : > { %3247 = vst [vmem:[#allocation1] ss:$2 sm:$0xff] %v2832_v50  ;;  %v4390_v19 = vpack.i.bf16 %v5319_v16, %v3243_v28  ;;  %v2413_v47 = vsel %vm1572_vm3, %v2405_v14, %v4298_v23  ;;  %v1576_v49 = vsel %vm1572_vm3, %v1567_v1, %v4299_v61  ;;  %v2394_v16 = vsel %vm1572_vm3, %v2386_v11, %v4273_v10  ;;  %v2819_v50 = vld [vmem:[#allocation2 + $0xe1] sm:$0xf]  ;;  %v2842_v1 = vld [vmem:[#allocation2 + $0x78] sm:$0xf] }
 0x2b7   : > { %2514 = vmatmul.f32.gmra.mxu1 %v2401_v29  ;;  %v2818_v29 = vld [vmem:[#allocation2 + $0xd9] sm:$0xf]  ;;  %3248 = vst [vmem:[#allocation1 + $0x1] ss:$2 sm:$0xff] %v2833_v33  ;;  %v2421_v34 = vsel %vm1581_vm4, %v2413_v47, %v4328_v43  ;;  %v4308_v28 = vunpack.i.l.bf16 %v5485_v36  ;;  %v1585_v12 = vsel %vm1581_vm4, %v1576_v49, %v4329_v62  ;;  %v2813_v61 = vld [vmem:[#allocation2 + $0xa1] sm:$0xf]  ;;  %v4159_v10 = vunpack.i.h.bf16 %v5206_v17 }
 0x2b8   : > { %4391 = vrot.lane.b32.xlu0 %v4390_v19, %s4529_s17  ;;  %v5591_v23 = vld.sshfl [vmem:[#allocation1 + $0x10] sm:$0xff pattern:$0x75316420]  ;;  %2543 = vmatmul.f32.gmra.mxu2 %v2421_v34  ;;  %v4183_v14 = vunpack.i.l.bf16 %v5299_v35  ;;  %v2841_v33 = vld [vmem:[#allocation2 + $0x70] sm:$0xf]  ;;  %v4208_v36 = vunpack.i.l.bf16 %v5352_v4  ;;  %v6226_v35 = vld [vmem:[#allocation6_spill] sm:$0xff]  ;;  %v4164_v4 = vunpack.i.h.bf16 %v5163_v57 }
 0x2b9   : > { %3194 = vst [vmem:[#allocation1 + $0x10] ss:$2 sm:$0xff] %v2818_v29  ;;  %v2402_v27 = vsel %vm1581_vm4, %v2394_v16, %v4308_v28  ;;  %v2789_v47 = vld [vmem:[#allocation2 + $0x102] sm:$0xf]  ;;  %v2820_v29 = vld [vmem:[#allocation2 + $0xf9] sm:$0xf]  ;;  %v1598_v17 = vsel %vm1572_vm3, %v1590_v53, %v4159_v10  ;;  %v4213_v16 = vunpack.i.l.bf16 %v5193_v5  ;;  %v4254_v10 = vunpack.i.h.bf16 %v5521_v60 }
 0x2ba   : > { %3195 = vst [vmem:[#allocation1 + $0x11] ss:$2 sm:$0xff] %v2819_v50  ;;  %v5595_v43 = vld.sshfl [vmem:[#allocation1 + $0x20] sm:$0xff pattern:$0x75316420]  ;;  %v1568_v11 = vsel %vm1563_vm2, %v6226_v35, %v4183_v14  ;;  %v1606_v28 = vsel %vm1581_vm4, %v1598_v17, %v4164_v4  ;;  %v6228_v53 = vld [vmem:[#allocation24_spill] sm:$0xff] }
 0x2bb   : > { %3181 = vst [vmem:[#allocation1 + $0x20] ss:$2 sm:$0xff] %v2812_v39  ;;  %v5609_v34 = vld.sshfl [vmem:[#allocation1 + $0x30] sm:$0xff pattern:$0x75316420]  ;;  %v1577_v62 = vsel %vm1572_vm3, %v1568_v11, %v4208_v36  ;;  %v6230_v35 = vld [vmem:[#allocation7_spill] sm:$0xff] }
 0x2bc   : > { %3183 = vst [vmem:[#allocation1 + $0x21] ss:$2 sm:$0xff] %v2813_v61  ;;  %v2821_v39 = vld [vmem:[#allocation2 + $0x101] sm:$0xf]  ;;  %v2790_v50 = vld [vmem:[#allocation2 + $0x10a] sm:$0xf]  ;;  %v1586_v61 = vsel %vm1581_vm4, %v1577_v62, %v4213_v16 }
 0x2bd   : > { %2644 = vmatmul.f32.gmra.mxu3 %v1585_v12  ;;  %3056 = vst [vmem:[#allocation1 + $0x30] ss:$2 sm:$0xff] %v2789_v47  ;;  %v2849_v57 = vld [vmem:[#allocation2 + $0xd0] sm:$0xf]  ;;  %v2828_v36 = vld [vmem:[#allocation2 + $0x9a] sm:$0xf] }
 0x2be   : > { %v5602_v19 = vld.sshfl [vmem:[#allocation1] sm:$0xff pattern:$0x75316420]  ;;  %3057 = vst [vmem:[#allocation1 + $0x31] ss:$2 sm:$0xff] %v2790_v50 }
 0x2bf   : > { %2517 = vmatmul.f32.gmra.mxu1 %v2402_v27  ;;  %3299 = vst [vmem:[#allocation1] ss:$2 sm:$0xff] %v2841_v33  ;;  %v2850_v27 = vld [vmem:[#allocation2 + $0xd8] sm:$0xf]  ;;  %v4289_v33 = vunpack.i.h.bf16 %v5542_v48  ;;  %v2835_v2 = vld [vmem:[#allocation2 + $0xe2] sm:$0xf] }
 0x2c0   : > { %3301 = vst [vmem:[#allocation1 + $0x1] ss:$2 sm:$0xff] %v2842_v1  ;;  %v2834_v47 = vld [vmem:[#allocation2 + $0xda] sm:$0xf]  ;;  %v2829_v1 = vld [vmem:[#allocation2 + $0xa2] sm:$0xf] }
 0x2c1   : > { %v5612_v49 = vld.sshfl [vmem:[#allocation1 + $0x10] sm:$0xff pattern:$0x75316420]  ;;  %v2799_v50 = vld [vmem:[#allocation2 + $0xb0] sm:$0xf] }
 0x2c2   : > { %6227 = vst [vmem:[#allocation29_spill] sm:$0xff] %v5612_v49  ;;  %v2798_v62 = vld [vmem:[#allocation2 + $0xa8] sm:$0xf]  ;;  %v4253_v49 = vunpack.i.l.bf16 %v5521_v60 }
 0x2c3   : > { %3232 = vst [vmem:[#allocation1 + $0x10] ss:$2 sm:$0xff] %v2826_v6  ;;  %v5617_v12 = vld.sshfl [vmem:[#allocation1 + $0x20] sm:$0xff pattern:$0x75316420] }
 0x2c4   : > { %3234 = vst [vmem:[#allocation1 + $0x11] ss:$2 sm:$0xff] %v2827_v51  ;;  %v4324_v51 = vunpack.i.h.bf16 %v5537_v46 }
 0x2c5   : > { %3196 = vst [vmem:[#allocation1 + $0x20] ss:$2 sm:$0xff] %v2820_v29  ;;  %2647 = vmatmul.f32.gmra.mxu3 %v1586_v61  ;;  %v5631_v11 = vld.sshfl [vmem:[#allocation1 + $0x30] sm:$0xff pattern:$0x75316420] }
 0x2c6   : > { %3197 = vst [vmem:[#allocation1 + $0x21] ss:$2 sm:$0xff] %v2821_v39  ;;  %v2857_v39 = vld [vmem:[#allocation2 + $0x71] sm:$0xf]  ;;  %v2858_v61 = vld [vmem:[#allocation2 + $0x79] sm:$0xf] }
 0x2c7   : > { %2676 = vmatmul.f32.vlgmr.msrb.gmra.mxu1 %v1606_v28  ;;  %v3314_v20 = vld.sshfl [vmem:[#allocation1] sm:$0xff pattern:$0x75316420]  ;;  %3114 = vst [vmem:[#allocation1 + $0x30] ss:$2 sm:$0xff] %v2798_v62 }
 0x2c8   : > { %3318 = vst [vmem:[#allocation1] ss:$2 sm:$0xff] %v2849_v57  ;;  %v4400_v14 = vpack.i.bf16 %v5423_v9, %v3314_v20  ;;  %v1569_v9 = vsel %vm1563_vm2, %v6230_v35, %v4254_v10  ;;  %v5637_v57 = vpop.permute.xlu0 %4266  ;;  %v2843_v20 = vld [vmem:[#allocation2 + $0x80] sm:$0xf] }
 0x2c9   : > { %3319 = vst [vmem:[#allocation1 + $0x1] ss:$2 sm:$0xff] %v2850_v27  ;;  %v1578_v4 = vsel %vm1572_vm3, %v1569_v9, %v4289_v33  ;;  %v2844_v27 = vld [vmem:[#allocation2 + $0x88] sm:$0xf]  ;;  %v2837_v33 = vld [vmem:[#allocation2 + $0x102] sm:$0xf] }
 0x2ca   : > { %4401 = vrot.lane.b32.xlu1 %v4400_v14, %s4530_s18  ;;  %v1587_v16 = vsel %vm1581_vm4, %v1578_v4, %v4324_v51  ;;  %3116 = vst [vmem:[#allocation1 + $0x31] ss:$2 sm:$0xff] %v2799_v50  ;;  %v2836_v14 = vld [vmem:[#allocation2 + $0xfa] sm:$0xf]  ;;  %v2852_v51 = vld [vmem:[#allocation2 + $0xe8] sm:$0xf] }
 0x2cb   : > { %v3244_v6 = vld.sshfl [vmem:[#allocation1 + $0x10] sm:$0xff pattern:$0x75316420]  ;;  %v2851_v9 = vld [vmem:[#allocation2 + $0xe0] sm:$0xf] }
 0x2cc   : > { %v4395_v29 = vpack.i.bf16 %v3244_v6, %v6228_v53  ;;  %3249 = vst [vmem:[#allocation1 + $0x10] ss:$2 sm:$0xff] %v2834_v47  ;;  %v5641_v47 = vpop.permute.xlu2 %4331  ;;  %v2845_v62 = vld [vmem:[#allocation2 + $0xa0] sm:$0xf]  ;;  %v2814_v50 = vld [vmem:[#allocation2 + $0xa9] sm:$0xf] }
 0x2cd   : > { %3250 = vst [vmem:[#allocation1 + $0x11] ss:$2 sm:$0xff] %v2835_v2  ;;  %v5626_v17 = vld.sshfl [vmem:[#allocation1 + $0x20] sm:$0xff pattern:$0x75316420]  ;;  %2650 = vmatmul.f32.gmra.mxu3 %v1587_v16 }
 0x2ce   : > { %6229 = vst [vmem:[#allocation15_spill] sm:$0xff] %v5626_v17  ;;  %4396 = vrot.lane.b32.xlu0 %v4395_v29, %s4529_s17  ;;  %v2807_v2 = vld [vmem:[#allocation2 + $0x110] sm:$0xf]  ;;  %v5647_v29 = vpop.permute.xlu1 %4301  ;;  %v6231_v16 = vld [vmem:[#allocation26_spill] sm:$0xff] }
 0x2cf   : > { %3236 = vst [vmem:[#allocation1 + $0x20] ss:$2 sm:$0xff] %v2828_v36  ;;  %v2806_v36 = vld [vmem:[#allocation2 + $0x108] sm:$0xf] }
 0x2d0   : > { %3238 = vst [vmem:[#allocation1 + $0x21] ss:$2 sm:$0xff] %v2829_v1  ;;  %v5635_v28 = vld.sshfl [vmem:[#allocation1] sm:$0xff pattern:$0x75316420]  ;;  %v4277_v35 = vpop.permute.xlu0 %4276 }
 0x2d1   : > { %3370 = vst [vmem:[#allocation1] ss:$2 sm:$0xff] %v2857_v39  ;;  %v5644_v53 = vld.sshfl [vmem:[#allocation1 + $0x30] sm:$0xff pattern:$0x75316420] }
 0x2d2   : > { %3372 = vst [vmem:[#allocation1 + $0x1] ss:$2 sm:$0xff] %v2858_v61  ;;  %v2846_v61 = vld [vmem:[#allocation2 + $0xa8] sm:$0xf] }
 0x2d3   : > { %3127 = vst [vmem:[#allocation1 + $0x30] ss:$2 sm:$0xff] %v2806_v36  ;;  %v2815_v36 = vld [vmem:[#allocation2 + $0xb1] sm:$0xf] }
 0x2d4   : > { %v5639_v10 = vld.sshfl [vmem:[#allocation1 + $0x10] sm:$0xff pattern:$0x75316420]  ;;  %3128 = vst [vmem:[#allocation1 + $0x31] ss:$2 sm:$0xff] %v2807_v2 }
 0x2d5   : > { %3303 = vst [vmem:[#allocation1 + $0x10] ss:$2 sm:$0xff] %v2843_v20  ;;  %v4337_v20 = vpop.permute.xlu2 %4336 }
 0x2d6   : > { %3305 = vst [vmem:[#allocation1 + $0x11] ss:$2 sm:$0xff] %v2844_v27  ;;  %v4279_v27 = vunpack.i.h.bf16 %v4277_v35  ;;  %v4338_v26 = vunpack.i.l.bf16 %v4337_v20 }
 0x2d7   : > { %v3245_v6 = vld.sshfl [vmem:[#allocation1 + $0x20] sm:$0xff pattern:$0x75316420] }
 0x2d8   : > { %v4405_v1 = vpack.i.bf16 %v3245_v6, %v5334_v54  ;;  %3251 = vst [vmem:[#allocation1 + $0x20] ss:$2 sm:$0xff] %v2836_v14  ;;  %v4278_v14 = vunpack.i.l.bf16 %v4277_v35  ;;  %v4312_v6 = vpop.permute.xlu1 %4311 }
 0x2d9   : > { %3252 = vst [vmem:[#allocation1 + $0x21] ss:$2 sm:$0xff] %v2837_v33  ;;  %v4313_v2 = vunpack.i.l.bf16 %v4312_v6  ;;  %v3385_v3 = vld.sshfl [vmem:[#allocation1] sm:$0xff pattern:$0x75316420] }
 0x2da   : > { %4406 = vrot.lane.b32.xlu0 %v4405_v1, %s4529_s17  ;;  %v4314_v1 = vunpack.i.h.bf16 %v4312_v6 }
 0x2db   : > { %v5653_v33 = vld.sshfl [vmem:[#allocation1 + $0x30] sm:$0xff pattern:$0x75316420] }
 0x2dc   : > { %3185 = vst [vmem:[#allocation1 + $0x30] ss:$2 sm:$0xff] %v2814_v50  ;;  %v2822_v50 = vld [vmem:[#allocation2 + $0x109] sm:$0xf] }
 0x2dd   : > { %v3315_v4 = vld.sshfl [vmem:[#allocation1 + $0x10] sm:$0xff pattern:$0x75316420]  ;;  %3187 = vst [vmem:[#allocation1 + $0x31] ss:$2 sm:$0xff] %v2815_v36 }
 0x2de   : > { %v4410_v39 = vpack.i.bf16 %v3315_v4, %v6231_v16  ;;  %3320 = vst [vmem:[#allocation1 + $0x10] ss:$2 sm:$0xff] %v2851_v9  ;;  %v2859_v9 = vld [vmem:[#allocation2 + $0x81] sm:$0xf]  ;;  %v2860_v4 = vld [vmem:[#allocation2 + $0x89] sm:$0xf]  ;;  %v4339_v16 = vunpack.i.h.bf16 %v4337_v20 }
 0x2df   : > { %3321 = vst [vmem:[#allocation1 + $0x11] ss:$2 sm:$0xff] %v2852_v51  ;;  %v2853_v51 = vld [vmem:[#allocation2 + $0x100] sm:$0xf]  ;;  %v2854_v20 = vld [vmem:[#allocation2 + $0x108] sm:$0xf] }
 0x2e0   : > { %v5650_v54 = vld.sshfl [vmem:[#allocation1 + $0x20] sm:$0xff pattern:$0x75316420]  ;;  %4411 = vrot.lane.b32.xlu1 %v4410_v39, %s4530_s18  ;;  %v6232_v39 = vld [vmem:[#allocation12_spill] sm:$0xff] }
 0x2e1   : > { %3307 = vst [vmem:[#allocation1 + $0x20] ss:$2 sm:$0xff] %v2845_v62  ;;  %v2406_v62 = vsel %vm1563_vm2, %v5078_v24, %v4279_v27  ;;  %v1591_v35 = vsel %vm1563_vm2, %v6232_v39, %v4278_v14  ;;  %v4425_v27 = vpack.i.bf16 %v5530_v63, %v3385_v3  ;;  %v4069_v14 = vld [vmem:[%s6170_s5 + $0x2b8] sm:$0xff]  ;;  %v4288_v39 = vunpack.i.l.bf16 %v5542_v48  ;;  %v6233_v63 = vld [vmem:[#allocation31_spill] sm:$0xff] }
 0x2e2   : > { %3309 = vst [vmem:[#allocation1 + $0x21] ss:$2 sm:$0xff] %v2846_v61  ;;  %v5659_v61 = vpop.permute.xlu0 %4281  ;;  %v2414_v36 = vsel %vm1572_vm3, %v2406_v62, %v4314_v1  ;;  %v1599_v6 = vsel %vm1572_vm3, %v1591_v35, %v4313_v2  ;;  %v2823_v2 = vld [vmem:[#allocation2 + $0x111] sm:$0xf]  ;;  %3573 = vmatpush.msrb.mxu0 %v4069_v14  ;;  %v2407_v48 = vsel %vm1563_vm2, %v6233_v63, %v4253_v49  ;;  %v4323_v62 = vunpack.i.l.bf16 %v5537_v46  ;;  %v2861_v46 = vld [vmem:[#allocation2 + $0xa1] sm:$0xf] }
 0x2e3   : > { %v2422_v22 = vsel %vm1581_vm4, %v2414_v36, %v4339_v16  ;;  %v1607_v24 = vsel %vm1581_vm4, %v1599_v6, %v4338_v26  ;;  %v4283_v60 = vunpack.i.l.bf16 %v5659_v61  ;;  %4426 = vrot.lane.b32.xlu2 %v4425_v27, %s4531_s19  ;;  %v5678_v26 = vpop.permute.xlu2 %4341  ;;  %v2866_v16 = vld [vmem:[#allocation2 + $0xd9] sm:$0xf]  ;;  %v4214_v6 = vunpack.i.h.bf16 %v5193_v5 }
 0x2e4   : > { %2546 = vmatmul.f32.gmra.mxu2 %v2422_v22  ;;  %2679 = vmatmul.f32.gmra.mxu1 %v1607_v24  ;;  %v5676_v3 = vld.sshfl [vmem:[#allocation1 + $0x30] sm:$0xff pattern:$0x75316420]  ;;  %v5681_v22 = vpop.permute.xlu1 %4316  ;;  %v4343_v35 = vunpack.i.l.bf16 %v5678_v26  ;;  %3390 = vst [vmem:[#allocation1 + $0x1] ss:$2 sm:$0xff] %v2866_v16  ;;  %v4269_v24 = vunpack.i.h.bf16 %v5637_v57 }
 0x2e5   : > { %3198 = vst [vmem:[#allocation1 + $0x30] ss:$2 sm:$0xff] %v2822_v50  ;;  %v6234_v50 = vld [vmem:[#allocation9_spill] sm:$0xff]  ;;  %v1608_v5 = vsel %vm1581_vm4, %v5481_v21, %v4214_v6 }
 0x2e6   : > { %v5661_v17 = vld.sshfl [vmem:[#allocation1 + $0x10] sm:$0xff pattern:$0x75316420]  ;;  %3199 = vst [vmem:[#allocation1 + $0x31] ss:$2 sm:$0xff] %v2823_v2  ;;  %v1570_v36 = vsel %vm1563_vm2, %v6234_v50, %v4283_v60  ;;  %v4304_v2 = vunpack.i.h.bf16 %v5647_v29  ;;  %v6235_v60 = vld [vmem:[#allocation30_spill] sm:$0xff] }
 0x2e7   : > { %3374 = vst [vmem:[#allocation1 + $0x10] ss:$2 sm:$0xff] %v2859_v9  ;;  %v2873_v16 = vld [vmem:[#allocation2 + $0x72] sm:$0xf] }
 0x2e8   : > { %3376 = vst [vmem:[#allocation1 + $0x11] ss:$2 sm:$0xff] %v2860_v4  ;;  %v2865_v4 = vld [vmem:[#allocation2 + $0xd1] sm:$0xf] }
 0x2e9   : > { %v3316_v1 = vld.sshfl [vmem:[#allocation1 + $0x20] sm:$0xff pattern:$0x75316420]  ;;  %3389 = vst [vmem:[#allocation1] ss:$2 sm:$0xff] %v2865_v4  ;;  %v4303_v4 = vunpack.i.l.bf16 %v5647_v29 }
 0x2ea   : > { %v4430_v9 = vpack.i.bf16 %v3316_v1, %v5491_v59  ;;  %3322 = vst [vmem:[#allocation1 + $0x20] ss:$2 sm:$0xff] %v2853_v51  ;;  %v4318_v59 = vunpack.i.l.bf16 %v5681_v22  ;;  %v2415_v51 = vsel %vm1572_vm3, %v2407_v48, %v4288_v39  ;;  %v4268_v1 = vunpack.i.l.bf16 %v5637_v57  ;;  %v2868_v48 = vld [vmem:[#allocation2 + $0xe9] sm:$0xf]  ;;  %v2831_v50 = vld [vmem:[#allocation2 + $0xb2] sm:$0xf] }
 0x2eb   : > { %3323 = vst [vmem:[#allocation1 + $0x21] ss:$2 sm:$0xff] %v2854_v20  ;;  %v2867_v20 = vld [vmem:[#allocation2 + $0xe1] sm:$0xf]  ;;  %v2423_v27 = vsel %vm1581_vm4, %v2415_v51, %v4323_v62  ;;  %v2830_v57 = vld [vmem:[#allocation2 + $0xaa] sm:$0xf]  ;;  %v5712_v29 = vpop.permute.xlu2 %4366 }
 0x2ec   : > { %4431 = vrot.lane.b32.xlu1 %v4430_v9, %s4530_s18  ;;  %v1579_v49 = vsel %vm1572_vm3, %v1570_v36, %v4318_v59  ;;  %v5698_v9 = vpop.permute.xlu0 %4346  ;;  %2549 = vmatmul.f32.gmra.mxu2 %v2423_v27  ;;  %v2862_v51 = vld [vmem:[#allocation2 + $0xa9] sm:$0xf]  ;;  %v4334_v27 = vunpack.i.h.bf16 %v5641_v47 }
 0x2ed   : > { %v1588_v14 = vsel %vm1581_vm4, %v1579_v49, %v4343_v35  ;;  %2682 = vmatmul.f32.gmra.mxu1 %v1608_v5  ;;  %v5707_v62 = vld.sshfl [vmem:[#allocation1 + $0x30] sm:$0xff pattern:$0x75316420]  ;;  %v4349_v21 = vunpack.i.h.bf16 %v5698_v9  ;;  %v2408_v35 = vsel %vm1563_vm2, %v5022_v42, %v4269_v24  ;;  %v6236_v49 = vld [vmem:[#allocation21_spill] sm:$0xff] }
 0x2ee   : > { %2653 = vmatmul.f32.gmra.mxu3 %v1588_v14  ;;  %3240 = vst [vmem:[#allocation1 + $0x30] ss:$2 sm:$0xff] %v2830_v57  ;;  %v4068_v36 = vld [vmem:[%s6170_s5 + $0x2b0] sm:$0xff]  ;;  %v2416_v6 = vsel %vm1572_vm3, %v2408_v35, %v4304_v2  ;;  %v4352_v14 = vpop.permute.xlu1 %4351  ;;  %v4067_v2 = vld [vmem:[%s6170_s5 + $0x2a8] sm:$0xff] }
 0x2ef   : > { %v3386_v39 = vld.sshfl [vmem:[#allocation1 + $0x10] sm:$0xff pattern:$0x75316420]  ;;  %3242 = vst [vmem:[#allocation1 + $0x31] ss:$2 sm:$0xff] %v2831_v50  ;;  %3574 = vmatpush.msrb.mxu0 %v4068_v36  ;;  %v4354_v5 = vunpack.i.h.bf16 %v4352_v14  ;;  %v4353_v35 = vunpack.i.l.bf16 %v4352_v14 }
 0x2f0   : > { %v4435_v63 = vpack.i.bf16 %v3386_v39, %v6235_v60  ;;  %3391 = vst [vmem:[#allocation1 + $0x10] ss:$2 sm:$0xff] %v2867_v20  ;;  %v1593_v20 = vsel %vm1563_vm2, %v6236_v49, %v4268_v1  ;;  %v5722_v24 = vld.sshfl [vmem:[#allocation1] sm:$0xff pattern:$0x75316420]  ;;  %v4348_v1 = vunpack.i.l.bf16 %v5698_v9 }
 0x2f1   : > { %3392 = vst [vmem:[#allocation1 + $0x11] ss:$2 sm:$0xff] %v2868_v48  ;;  %v1601_v42 = vsel %vm1572_vm3, %v1593_v20, %v4303_v4  ;;  %v2874_v39 = vld [vmem:[#allocation2 + $0x7a] sm:$0xf]  ;;  %v2875_v60 = vld [vmem:[#allocation2 + $0x82] sm:$0xf]  ;;  %3575 = vmatpush.msrb.mxu0 %v4067_v2  ;;  %v2424_v48 = vsel %vm1581_vm4, %v2416_v6, %v4334_v27  ;;  %v4319_v6 = vunpack.i.h.bf16 %v5681_v22 }
 0x2f2   : > { %v5704_v59 = vld.sshfl [vmem:[#allocation1 + $0x20] sm:$0xff pattern:$0x75316420]  ;;  %4436 = vrot.lane.b32.xlu2 %v4435_v63, %s4531_s19  ;;  %3441 = vst [vmem:[#allocation1] ss:$2 sm:$0xff] %v2873_v16  ;;  %v4369_v63 = vunpack.i.h.bf16 %v5712_v29  ;;  %v6237_v4 = vld [vmem:[#allocation13_spill] sm:$0xff] }
 0x2f3   : > { %3378 = vst [vmem:[#allocation1 + $0x20] ss:$2 sm:$0xff] %v2861_v46  ;;  %v4333_v46 = vunpack.i.l.bf16 %v5641_v47  ;;  %v1571_v57 = vsel %vm1563_vm2, %v6237_v4, %v4349_v21  ;;  %v4284_v47 = vunpack.i.h.bf16 %v5659_v61  ;;  %v4066_v16 = vld [vmem:[%s6170_s5 + $0x2a0] sm:$0xff]  ;;  %v4065_v61 = vld [vmem:[%s6170_s5 + $0x298] sm:$0xff]  ;;  %v2838_v49 = vld [vmem:[#allocation2 + $0x10a] sm:$0xf] }
 0x2f4   : > { %3380 = vst [vmem:[#allocation1 + $0x21] ss:$2 sm:$0xff] %v2862_v51  ;;  %v2876_v51 = vld [vmem:[#allocation2 + $0x8a] sm:$0xf]  ;;  %2552 = vmatmul.f32.gmra.mxu2 %v2424_v48  ;;  %v1580_v9 = vsel %vm1572_vm3, %v1571_v57, %v4354_v5  ;;  %3576 = vmatpush.msrb.mxu0 %v4066_v16  ;;  %v2839_v14 = vld [vmem:[#allocation2 + $0x112] sm:$0xf]  ;;  %v4357_v2 = vpop.permute.xlu0 %4356 }
 0x2f5   : > { %3443 = vst [vmem:[#allocation1 + $0x1] ss:$2 sm:$0xff] %v2874_v39  ;;  %v1609_v50 = vsel %vm1581_vm4, %v1601_v42, %v4333_v46  ;;  %v1589_v21 = vsel %vm1581_vm4, %v1580_v9, %v4369_v63  ;;  %v4064_v27 = vld [vmem:[%s6170_s5 + $0x290] sm:$0xff]  ;;  %v5749_v42 = vpop.f32.mrf.mxu3  ;;  %v2409_v39 = vsel %vm1563_vm2, %v5058_v18, %v4348_v1  ;;  %v2869_v46 = vld [vmem:[#allocation2 + $0x101] sm:$0xf]  ;;  %v4368_v18 = vunpack.i.l.bf16 %v5712_v29 }
 0x2f6   : > { %2685 = vmatmul.f32.gmra.mxu1 %v1609_v50  ;;  %2656 = vmatmul.f32.gmra.mxu3 %v1589_v21  ;;  %v3246_v5 = vld.sshfl [vmem:[#allocation1 + $0x30] sm:$0xff pattern:$0x75316420]  ;;  %v2417_v63 = vsel %vm1572_vm3, %v2409_v39, %v4353_v35  ;;  %v6238_v48 = vld [vmem:[#allocation11_spill] sm:$0xff]  ;;  %v2881_v57 = vld [vmem:[#allocation2 + $0xd2] sm:$0xf]  ;;  %v4362_v1 = vpop.permute.xlu1 %4361  ;;  %v4344_v35 = vunpack.i.h.bf16 %v5678_v26  ;;  %v4359_v29 = vunpack.i.h.bf16 %v4357_v2  ;;  %v4358_v21 = vunpack.i.l.bf16 %v4357_v2 }
 0x2f7   : > { %3577 = vmatpush.msrb.mxu0 %v4065_v61  ;;  %v1594_v4 = vsel %vm1563_vm2, %v6238_v48, %v4284_v47  ;;  %3253 = vst [vmem:[#allocation1 + $0x30] ss:$2 sm:$0xff] %v2838_v49  ;;  %v2870_v16 = vld [vmem:[#allocation2 + $0x109] sm:$0xf]  ;;  %v4062_v47 = vld [vmem:[%s6170_s5 + $0x280] sm:$0xff]  ;;  %v2425_v50 = vsel %vm1581_vm4, %v2417_v63, %v4368_v18  ;;  %v4061_v26 = vld [vmem:[%s6170_s5 + $0x278] sm:$0xff] }
 0x2f8   : > { %v5739_v36 = vld.sshfl [vmem:[#allocation1 + $0x10] sm:$0xff pattern:$0x75316420]  ;;  %3254 = vst [vmem:[#allocation1 + $0x31] ss:$2 sm:$0xff] %v2839_v14  ;;  %v4059_v2 = vld [vmem:[%s6170_s5 + $0x268] sm:$0xff] }
 0x2f9   : > { %3445 = vst [vmem:[#allocation1 + $0x10] ss:$2 sm:$0xff] %v2875_v60  ;;  %v4063_v60 = vld [vmem:[%s6170_s5 + $0x288] sm:$0xff]  ;;  %3578 = vmatpush.msrb.mxu0 %v4064_v27  ;;  %v4372_v27 = vpop.permute.xlu2 %4371  ;;  %v4060_v39 = vld [vmem:[%s6170_s5 + $0x270] sm:$0xff]  ;;  %v6239_v63 = vld [vmem:[#allocation14_spill] sm:$0xff] }
 0x2fa   : > { %3447 = vst [vmem:[#allocation1 + $0x11] ss:$2 sm:$0xff] %v2876_v51  ;;  %v1602_v51 = vsel %vm1572_vm3, %v1594_v4, %v4319_v6  ;;  %v4364_v6 = vunpack.i.h.bf16 %v4362_v1  ;;  %v2883_v49 = vld [vmem:[#allocation2 + $0xe2] sm:$0xf]  ;;  %v1595_v48 = vsel %vm1563_vm2, %v6239_v63, %v4358_v21  ;;  %v1649_v4 = vld [vmem:[%s6170_s5 + $0x118] sm:$0xff] }
 0x2fb   : > { %v3387_v20 = vld.sshfl [vmem:[#allocation1 + $0x20] sm:$0xff pattern:$0x75316420]  ;;  %3579 = vmatpush.msrb.mxu0 %v4063_v60  ;;  %v1610_v61 = vsel %vm1581_vm4, %v1602_v51, %v4344_v35  ;;  %2713 = vmatpush.msrb.mxu2 %v1649_v4  ;;  %v2878_v21 = vld [vmem:[#allocation2 + $0xaa] sm:$0xf] }
 0x2fc   : > { %v4450_v22 = vpack.i.bf16 %v3387_v20, %v5564_v45  ;;  %3393 = vst [vmem:[#allocation1 + $0x20] ss:$2 sm:$0xff] %v2869_v46  ;;  %v4415_v45 = vpack.i.bf16 %v3246_v5, %v5511_v44  ;;  %v5768_v9 = vld.sshfl [vmem:[#allocation1] sm:$0xff pattern:$0x75316420]  ;;  %2555 = vmatmul.f32.gmra.mxu2 %v2425_v50  ;;  %v4363_v20 = vunpack.i.l.bf16 %v4362_v1  ;;  %v2410_v46 = vsel %vm1563_vm2, %v5091_v38, %v4359_v29  ;;  %v4377_v35 = vpop.permute.xlu0 %4376  ;;  %v4057_v29 = vld [vmem:[%s6170_s5 + $0x258] sm:$0xff] }
 0x2fd   : > { %v2882_v44 = vld [vmem:[#allocation2 + $0xda] sm:$0xf]  ;;  %3460 = vst [vmem:[#allocation1] ss:$2 sm:$0xff] %v2881_v57  ;;  %3580 = vmatpush.msrb.mxu0 %v4062_v47  ;;  %v2418_v60 = vsel %vm1572_vm3, %v2410_v46, %v4364_v6  ;;  %v2847_v57 = vld [vmem:[#allocation2 + $0xb0] sm:$0xf]  ;;  %v4420_v38 = vpack.i.bf16 %v5602_v19, %v5268_v32  ;;  %v5796_v18 = vpop.f32.mrf.mxu3  ;;  %v4374_v1 = vunpack.i.h.bf16 %v4372_v27  ;;  %v4379_v6 = vunpack.i.h.bf16 %v4377_v35 }
 0x2fe   : > { %4451 = vrot.lane.b32.xlu2 %v4450_v22, %s4531_s19  ;;  %4416 = vrot.lane.b32.xlu0 %v4415_v45, %s4529_s17  ;;  %3461 = vst [vmem:[#allocation1 + $0x1] ss:$2 sm:$0xff] %v2882_v44  ;;  %v2884_v22 = vld [vmem:[#allocation2 + $0xea] sm:$0xf]  ;;  %v2848_v5 = vld [vmem:[#allocation2 + $0xb8] sm:$0xf]  ;;  %v1603_v51 = vsel %vm1572_vm3, %v1595_v48, %v4363_v20 }
 0x2ff   : > { %2688 = vmatmul.f32.gmra.mxu1 %v1610_v61  ;;  %3394 = vst [vmem:[#allocation1 + $0x21] ss:$2 sm:$0xff] %v2870_v16  ;;  %3581 = vmatpush.msrb.mxu0 %v4061_v26  ;;  %v5792_v45 = vld.sshfl [vmem:[#allocation1 + $0x30] sm:$0xff pattern:$0x75316420]  ;;  %v4373_v16 = vunpack.i.l.bf16 %v4372_v27  ;;  %v4058_v47 = vld [vmem:[%s6170_s5 + $0x260] sm:$0xff]  ;;  %v2426_v32 = vsel %vm1581_vm4, %v2418_v60, %v4374_v1  ;;  %v4378_v61 = vunpack.i.l.bf16 %v4377_v35  ;;  %v4382_v27 = vpop.permute.xlu1 %4381  ;;  %v4465_v60 = vpack.i.bf16 %v5639_v10, %v5376_v30 }
 0x300   : > { %3311 = vst [vmem:[#allocation1 + $0x30] ss:$2 sm:$0xff] %v2847_v57  ;;  %v2877_v19 = vld [vmem:[#allocation2 + $0xa2] sm:$0xf]  ;;  %v4056_v20 = vld [vmem:[%s6170_s5 + $0x250] sm:$0xff]  ;;  %v4384_v46 = vunpack.i.h.bf16 %v4382_v27  ;;  %v1646_v4 = vld [vmem:[%s6170_s5 + $0x100] sm:$0xff] }
 0x301   : > { %v5776_v14 = vld.sshfl [vmem:[#allocation1 + $0x10] sm:$0xff pattern:$0x75316420]  ;;  %3582 = vmatpush.msrb.mxu0 %v4060_v39  ;;  %3313 = vst [vmem:[#allocation1 + $0x31] ss:$2 sm:$0xff] %v2848_v5  ;;  %v1611_v44 = vsel %vm1581_vm4, %v1603_v51, %v4373_v16  ;;  %v4387_v26 = vpop.permute.xlu2 %4386  ;;  %v4383_v5 = vunpack.i.l.bf16 %v4382_v27  ;;  %v3472_v1 = vsel %vm1563_vm2, %v5155_v56, %v4378_v61  ;;  %v4054_v30 = vld [vmem:[%s6170_s5 + $0x240] sm:$0xff] }
 0x302   : > { %3462 = vst [vmem:[#allocation1 + $0x10] ss:$2 sm:$0xff] %v2883_v49  ;;  %v1648_v49 = vld [vmem:[%s6170_s5 + $0x110] sm:$0xff]  ;;  %v2855_v39 = vld [vmem:[#allocation2 + $0x110] sm:$0xf]  ;;  %v4389_v48 = vunpack.i.h.bf16 %v4387_v26  ;;  %v4388_v16 = vunpack.i.l.bf16 %v4387_v26 }
 0x303   : > { %3463 = vst [vmem:[#allocation1 + $0x11] ss:$2 sm:$0xff] %v2884_v22  ;;  %3583 = vmatpush.msrb.mxu0 %v4059_v2  ;;  %v1647_v22 = vld [vmem:[%s6170_s5 + $0x108] sm:$0xff]  ;;  %2714 = vmatpush.msrb.mxu2 %v1648_v49  ;;  %v2856_v63 = vld [vmem:[#allocation2 + $0x118] sm:$0xf]  ;;  %v6240_v57 = vld [vmem:[#allocation16_spill] sm:$0xff]  ;;  %v3480_v35 = vsel %vm1572_vm3, %v3472_v1, %v4383_v5  ;;  %v4445_v49 = vpack.i.bf16 %v5635_v28, %v5354_v52 }
 0x304   : > { %2558 = vmatmul.f32.gmra.mxu2 %v2426_v32  ;;  %v4055_v2 = vld [vmem:[%s6170_s5 + $0x248] sm:$0xff]  ;;  %v2863_v61 = vld [vmem:[#allocation2 + $0xb1] sm:$0xf]  ;;  %v6242_v27 = vld [vmem:[#allocation20_spill] sm:$0xff]  ;;  %v4490_v52 = vpack.i.bf16 %v5792_v45, %v5567_v0  ;;  %v4470_v0 = vpack.i.bf16 %v5661_v17, %v5478_v37  ;;  %v4485_v1 = vpack.i.bf16 %v5704_v59, %v5539_v25 }
 0x305   : > { %3584 = vmatpush.msrb.mxu0 %v4058_v47  ;;  %2715 = vmatpush.msrb.mxu2 %v1647_v22  ;;  %v5838_v32 = vpop.f32.mrf.mxu3  ;;  %v4082_v22 = vld [vmem:[%s6170_s5 + $0x320] sm:$0xff]  ;;  %v2871_v5 = vld [vmem:[#allocation2 + $0x111] sm:$0xf] }
 0x306   : > { %4421 = vrot.lane.b32.xlu0 %v4420_v38, %s4529_s17  ;;  %v5808_v50 = vld.sshfl [vmem:[#allocation1 + $0x20] sm:$0xff pattern:$0x75316420]  ;;  %v1596_v38 = vsel %vm1563_vm2, %v6240_v57, %v4379_v6  ;;  %v4088_v57 = vld [vmem:[%s6170_s5 + $0x350] sm:$0xff] }
 0x307   : > { %2691 = vmatmul.f32.gmra.mxu1 %v1611_v44  ;;  %3449 = vst [vmem:[#allocation1 + $0x20] ss:$2 sm:$0xff] %v2877_v19  ;;  %3585 = vmatpush.msrb.mxu0 %v4057_v29  ;;  %v1604_v10 = vsel %vm1572_vm3, %v1596_v38, %v4384_v46  ;;  %v3488_v19 = vsel %vm1581_vm4, %v3480_v35, %v4388_v16  ;;  %v6241_v44 = vld [vmem:[#allocation17_spill] sm:$0xff]  ;;  %v2497_v29 = vpop.f32.mrf.mxu1  ;;  %v2864_v6 = vld [vmem:[#allocation2 + $0xb9] sm:$0xf] }
 0x308   : > { %3451 = vst [vmem:[#allocation1 + $0x21] ss:$2 sm:$0xff] %v2878_v21  ;;  %v3317_v51 = vld.sshfl [vmem:[#allocation1 + $0x30] sm:$0xff pattern:$0x75316420]  ;;  %v1612_v56 = vsel %vm1581_vm4, %v1604_v10, %v4389_v48  ;;  %2716 = vmatpush.msrb.mxu2 %v1646_v4  ;;  %v4085_v21 = vld [vmem:[%s6170_s5 + $0x338] sm:$0xff] }
 0x309   : > { %3586 = vmatpush.msrb.mxu0 %v4056_v20  ;;  %v4440_v47 = vpack.i.bf16 %v3317_v51, %v5609_v34  ;;  %3324 = vst [vmem:[#allocation1 + $0x30] ss:$2 sm:$0xff] %v2855_v39  ;;  %v4480_v34 = vpack.i.bf16 %v5650_v54, %v5430_v31  ;;  %3614 = vmatpush.msra.mxu3 %v4085_v21  ;;  %v4084_v54 = vld [vmem:[%s6170_s5 + $0x330] sm:$0xff]  ;;  %v4083_v20 = vld [vmem:[%s6170_s5 + $0x328] sm:$0xff]  ;;  %v4089_v39 = vld [vmem:[%s6170_s5 + $0x358] sm:$0xff] }
 0x30a   : > { %3325 = vst [vmem:[#allocation1 + $0x31] ss:$2 sm:$0xff] %v2856_v63  ;;  %4114 = vmatpush.msra.mxu1 %v4089_v39  ;;  %v4081_v46 = vld [vmem:[%s6170_s5 + $0x318] sm:$0xff]  ;;  %v2872_v45 = vld [vmem:[#allocation2 + $0x119] sm:$0xf]  ;;  %v4079_v4 = vld [vmem:[%s6170_s5 + $0x308] sm:$0xff] }
 0x30b   : > { %3587 = vmatpush.msrb.mxu0 %v4055_v2  ;;  %4441 = vrot.lane.b32.xlu1 %v4440_v47, %s4530_s18  ;;  %v4080_v2 = vld [vmem:[%s6170_s5 + $0x310] sm:$0xff]  ;;  %v6243_v48 = vld [vmem:[#allocation25_spill] sm:$0xff]  ;;  %v2880_v59 = vld [vmem:[#allocation2 + $0xba] sm:$0xf]  ;;  %v4460_v47 = vpack.i.bf16 %v5722_v24, %v5461_v13 }
 0x30c   : > { %4046 = vmatmul.msk.f32.vlgmr.msrb.gmra.mxu2 %vm1563_vm2, %v6241_v44  ;;  %3615 = vmatpush.msra.mxu3 %v4084_v54  ;;  %v4077_v51 = vld [vmem:[%s6170_s5 + $0x2f8] sm:$0xff]  ;;  %v4076_v10 = vld [vmem:[%s6170_s5 + $0x2f0] sm:$0xff]  ;;  %v6245_v54 = vld [vmem:[#allocation18_spill] sm:$0xff] }
 0x30d   : > { %3588 = vmatpush.msrb.mxu0 %v4054_v30  ;;  %v5854_v31 = vpop.f32.mrf.mxu3  ;;  %4115 = vmatpush.msra.mxu1 %v4088_v57  ;;  %v4087_v30 = vld [vmem:[%s6170_s5 + $0x348] sm:$0xff]  ;;  %v2879_v35 = vld [vmem:[#allocation2 + $0xb2] sm:$0xf]  ;;  %v6244_v44 = vld [vmem:[#allocation32_spill] sm:$0xff] }
 0x30e   : > { %4466 = vrot.lane.b32.xlu0 %v4465_v60, %s4529_s17  ;;  %3589 = vmatmul.f32.vlgmr.msrb.gmra.mxu0 %v3488_v19  ;;  %v4075_v19 = vld [vmem:[%s6170_s5 + $0x2e8] sm:$0xff] }
 0x30f   : > { %2694 = vmatmul.f32.gmra.mxu1 %v1612_v56  ;;  %v2500_v28 = vpop.f32.mrf.mxu1  ;;  %3616 = vmatpush.msra.mxu3 %v4083_v20 }
 0x310   : > { %3667 = vmatpush.msra.mxu0 %v4089_v39  ;;  %4116 = vmatpush.msra.mxu1 %v4087_v30 }
 0x311   : > { %v3329_v26 = vld.sshfl [vmem:[#allocation1 + $0x30] sm:$0xff pattern:$0x75316420]  ;;  %3617 = vmatpush.msra.mxu3 %v4082_v22 }
 0x312   : > { %3382 = vst [vmem:[#allocation1 + $0x30] ss:$2 sm:$0xff] %v2863_v61  ;;  %3668 = vmatpush.msra.mxu0 %v4088_v57 }
 0x313   : > { %3384 = vst [vmem:[#allocation1 + $0x31] ss:$2 sm:$0xff] %v2864_v6  ;;  %4446 = vrot.lane.b32.xlu1 %v4445_v49, %s4530_s18  ;;  %3618 = vmatpush.msra.mxu3 %v4081_v46  ;;  %v4072_v6 = vld [vmem:[%s6170_s5 + $0x2d0] sm:$0xff]  ;;  %v4071_v49 = vld [vmem:[%s6170_s5 + $0x2c8] sm:$0xff] }
 0x314   : > { %4047 = vmatmul.msk.f32.gmra.mxu2 %vm1563_vm2, %v6242_v27  ;;  %3669 = vmatpush.msra.mxu0 %v4087_v30 }
 0x315   : > { %3619 = vmatpush.msra.mxu3 %v4080_v2  ;;  %v5886_v37 = vpop.f32.mrf.mxu3 }
 0x316   : > { %4481 = vrot.lane.b32.xlu0 %v4480_v34, %s4529_s17  ;;  %v4074_v34 = vld [vmem:[%s6170_s5 + $0x2e0] sm:$0xff] }
 0x317   : > { %v5888_v17 = vpop.f32.mrf.mxu1  ;;  %3620 = vmatpush.msra.mxu3 %v4079_v4 }
 0x31a   : > { %v3388_v60 = vld.sshfl [vmem:[#allocation1 + $0x30] sm:$0xff pattern:$0x75316420] }
 0x31b   : > { %4471 = vrot.lane.b32.xlu1 %v4470_v0, %s4530_s18  ;;  %v4455_v63 = vpack.i.bf16 %v3388_v60, %v5644_v53  ;;  %3395 = vst [vmem:[#allocation1 + $0x30] ss:$2 sm:$0xff] %v2871_v5  ;;  %v4078_v53 = vld [vmem:[%s6170_s5 + $0x300] sm:$0xff] }
 0x31c   : > { %3396 = vst [vmem:[#allocation1 + $0x31] ss:$2 sm:$0xff] %v2872_v45  ;;  %4048 = vmatmul.msk.f32.gmra.mxu2 %vm1563_vm2, %v6243_v48  ;;  %3621 = vmatpush.msra.mxu3 %v4078_v53 }
 0x31d   : > { %4456 = vrot.lane.b32.xlu2 %v4455_v63, %s4531_s19  ;;  %v5928_v24 = vpop.f32.mrf.mxu3 }
 0x31e   : > { %4491 = vrot.lane.b32.xlu0 %v4490_v52, %s4529_s17  ;;  %3622 = vmatpush.msra.mxu3 %v4077_v51  ;;  %s532_s17 = scalar_lea.vmem %s6174_s9, %s4620_s25 }
 0x320   : > { %3623 = vmatpush.msra.mxu3 %v4076_v10 }
 0x322   : > { %3624 = vmatpush.msra.mxu3 %v4075_v19 }
 0x323   : > { %v2538_v38 = vpop.f32.mrf.mxu2  ;;  %4486 = vrot.lane.b32.xlu1 %v4485_v1, %s4530_s18  ;;  %v3400_v56 = vld.sshfl [vmem:[#allocation1 + $0x30] sm:$0xff pattern:$0x75316420] }
 0x324   : > { %v2539_v16 = vadd.f32 %v2538_v38, %v2497_v29  ;;  %3453 = vst [vmem:[#allocation1 + $0x30] ss:$2 sm:$0xff] %v2879_v35  ;;  %4049 = vmatmul.msk.f32.gmra.mxu2 %vm1563_vm2, %v6244_v44  ;;  %v4073_v29 = vld [vmem:[%s6170_s5 + $0x2d8] sm:$0xff]  ;;  %3625 = vmatpush.msra.mxu3 %v4074_v34  ;;  %v6248_v38 = vld [vmem:[#allocation34_spill] sm:$0xff]  ;;  %v6249_v44 = vld [vmem:[#allocation23_spill] sm:$0xff] }
 0x325   : > { %4461 = vrot.lane.b32.xlu2 %v4460_v47, %s4531_s19  ;;  %3455 = vst [vmem:[#allocation1 + $0x31] ss:$2 sm:$0xff] %v2880_v59  ;;  %v4086_v35 = vld [vmem:[%s6170_s5 + $0x340] sm:$0xff] }
 0x326   : > { %3344 = vrot.lane.b32.xlu0 %v3329_v26, %s4530_s18  ;;  %v5912_v25 = vadd.f32 %v5749_v42, %v2539_v16  ;;  %v5923_v42 = vpop.f32.mrf.mxu1  ;;  %3626 = vmatpush.msra.mxu3 %v4073_v29  ;;  %v4475_v26 = vpack.i.bf16 %v5739_v36, %v5554_v15  ;;  %v4495_v15 = vpack.i.bf16 %v5808_v50, %v5595_v43  ;;  %v6246_v36 = vld [vmem:[#allocation22_spill] sm:$0xff]  ;;  %v6247_v50 = vld [vmem:[#allocation27_spill] sm:$0xff] }
 0x327   : > { %4117 = vmatpush.msra.mxu1 %v4086_v35  ;;  %3670 = vmatpush.msra.mxu0 %v4086_v35 }
 0x328   : > { %3627 = vmatpush.msra.mxu3 %v4072_v6 }
 0x32a   : > { %3628 = vmatpush.msra.mxu3 %v4071_v49  ;;  %v4392_v27 = vpop.permute.xlu0 %4391 }
 0x32b   : > { %v2541_v13 = vpop.f32.mrf.mxu2  ;;  %3076 = vrot.lane.b32.xlu1 %v5631_v11, %s4530_s18  ;;  %v5954_v11 = vpop.f32.mrf.mxu3  ;;  %v4394_v22 = vunpack.i.h.bf16 %v4392_v27  ;;  %v4393_v39 = vunpack.i.l.bf16 %v4392_v27 }
 0x32c   : > { %v2542_v21 = vadd.f32 %v2541_v13, %v2500_v28  ;;  %4050 = vmatmul.msk.f32.gmra.mxu2 %vm1563_vm2, %v6245_v54 }
 0x32d   : > { %4476 = vrot.lane.b32.xlu2 %v4475_v26, %s4531_s19  ;;  %v3496_v43 = vsel %vm1563_vm2, %v5518_v58, %v4393_v39  ;;  %v3473_v45 = vsel %vm1563_vm2, %v5204_v55, %v4394_v22 }
 0x32e   : > { %v5937_v61 = vadd.f32 %v5796_v18, %v2542_v21  ;;  %v5949_v20 = vpop.f32.mrf.mxu1  ;;  %v4070_v18 = vld [vmem:[%s6170_s5 + $0x2c0] sm:$0xff] }
 0x32f   : > { %3629 = vmatpush.msra.mxu3 %v4070_v18 }
 0x333   : > { %3415 = vrot.lane.b32.xlu1 %v3400_v56, %s4531_s19  ;;  %v5964_v0 = vpop.f32.mrf.mxu3 }
 0x334   : > { %4051 = vmatmul.msk.f32.gmra.mxu2 %vm1563_vm2, %v6246_v36 }
 0x335   : > { %4496 = vrot.lane.b32.xlu2 %v4495_v15, %s4531_s19 }
 0x336   : > { %v5962_v52 = vpop.f32.mrf.mxu1 }
 0x33b   : > { %v2636_v55 = vpop.f32.mrf.mxu3  ;;  %v2544_v36 = vpop.f32.mrf.mxu2 }
 0x33c   : > { %v4402_v28 = vpop.permute.xlu1 %4401  ;;  %4052 = vmatmul.msk.f32.gmra.mxu2 %vm1563_vm2, %v6247_v50  ;;  %v2637_v51 = vadd.f32 %v2636_v55, %v5912_v25  ;;  %v2545_v39 = vadd.f32 %v2544_v36, %v5888_v17 }
 0x33d   : > { %v4404_v46 = vunpack.i.h.bf16 %v4402_v28  ;;  %v4403_v5 = vunpack.i.l.bf16 %v4402_v28  ;;  %3147 = vrot.lane.b32.xlu2 %v5653_v33, %s4531_s19  ;;  %v4427_v2 = vpop.permute.xlu2 %4426 }
 0x33e   : > { %v5974_v60 = vpop.f32.mrf.mxu1  ;;  %v4429_v4 = vunpack.i.h.bf16 %v4427_v2  ;;  %v4428_v53 = vunpack.i.l.bf16 %v4427_v2 }
 0x33f   : > { %v3481_v63 = vsel %vm1572_vm3, %v3473_v45, %v4404_v46  ;;  %v3504_v48 = vsel %vm1572_vm3, %v3496_v43, %v4403_v5 }
 0x340   : > { %v3489_v58 = vsel %vm1581_vm4, %v3481_v63, %v4429_v4  ;;  %v3512_v57 = vsel %vm1581_vm4, %v3504_v48, %v4428_v53  ;;  %v4397_v1 = vpop.permute.xlu0 %4396  ;;  %v2586_v63 = vadd.f32 %v5838_v32, %v2545_v39 }
 0x341   : > { %3592 = vmatmul.f32.gmra.mxu0 %v3489_v58  ;;  %3630 = vmatmul.f32.vlgmr.msra.gmra.mxu3 %v3512_v57  ;;  %v4398_v16 = vunpack.i.l.bf16 %v4397_v1  ;;  %v4399_v30 = vunpack.i.h.bf16 %v4397_v1  ;;  %v3459_v1 = vld.sshfl [vmem:[#allocation1 + $0x30] sm:$0xff pattern:$0x75316420] }
 0x343   : > { %v1597_v34 = vsel %vm1563_vm2, %v6249_v44, %v4398_v16  ;;  %v3497_v25 = vsel %vm1563_vm2, %v5591_v23, %v4399_v30  ;;  %v5998_v15 = vpop.f32.mrf.mxu3 }
 0x344   : > { %4053 = vmatmul.msk.f32.gmra.mxu2 %vm1563_vm2, %v6248_v38 }
 0x346   : > { %v5982_v33 = vpop.f32.mrf.mxu1 }
 0x34b   : > { %v2642_v58 = vpop.f32.mrf.mxu3 }
 0x34c   : > { %v4437_v10 = vpop.permute.xlu2 %4436  ;;  %v4407_v18 = vpop.permute.xlu0 %4406 }
 0x34d   : > { %v4439_v13 = vunpack.i.h.bf16 %v4437_v10  ;;  %v4438_v29 = vunpack.i.l.bf16 %v4437_v10  ;;  %v4409_v27 = vunpack.i.h.bf16 %v4407_v18  ;;  %v4408_v28 = vunpack.i.l.bf16 %v4407_v18 }
 0x34e   : > { %v2677_v19 = vpop.f32.mrf.mxu1 }
 0x34f   : > { %v5990_v21 = vadd.f32 %v2677_v19, %v2637_v51  ;;  %v3474_v45 = vsel %vm1563_vm2, %v5252_v7, %v4408_v28  ;;  %v3498_v2 = vsel %vm1563_vm2, %v5617_v12, %v4409_v27  ;;  %v6012_v7 = vadd.f32 %v2642_v58, %v2586_v63  ;;  %v3458_v12 = vld.sshfl [vmem:[#allocation1 + $0x20] sm:$0xff pattern:$0x75316420]  ;;  %v2886_v28 = vld [vmem:[#allocation2 + $0x10a] sm:$0xf] }
 0x350   : > { %3465 = vst [vmem:[#allocation1 + $0x21] ss:$2 sm:$0xff] %v2886_v28 }
 0x352   : > { %v4412_v59 = vpop.permute.xlu1 %4411 }
 0x353   : > { %v4414_v47 = vunpack.i.h.bf16 %v4412_v59  ;;  %v4413_v56 = vunpack.i.l.bf16 %v4412_v59 }
 0x355   : > { %v1605_v6 = vsel %vm1572_vm3, %v1597_v34, %v4413_v56  ;;  %v3505_v26 = vsel %vm1572_vm3, %v3497_v25, %v4414_v47  ;;  %v3468_v56 = vld.sshfl [vmem:[#allocation1] sm:$0xff pattern:$0x75316420]  ;;  %v3469_v25 = vld.sshfl [vmem:[#allocation1 + $0x10] sm:$0xff pattern:$0x75316420] }
 0x356   : > { %v1613_v49 = vsel %vm1581_vm4, %v1605_v6, %v4438_v29  ;;  %v3513_v54 = vsel %vm1581_vm4, %v3505_v26, %v4439_v13 }
 0x357   : > { %2697 = vmatmul.f32.gmra.mxu1 %v1613_v49  ;;  %3633 = vmatmul.f32.gmra.mxu3 %v3513_v54 }
 0x358   : > { %v4452_v22 = vpop.permute.xlu2 %4451 }
 0x359   : > { %v4454_v43 = vunpack.i.h.bf16 %v4452_v22  ;;  %v4453_v50 = vunpack.i.l.bf16 %v4452_v22 }
 0x35e   : > { %v4432_v23 = vpop.permute.xlu1 %4431 }
 0x35f   : > { %v4434_v46 = vunpack.i.h.bf16 %v4432_v23  ;;  %v4433_v5 = vunpack.i.l.bf16 %v4432_v23  ;;  %4091 = vmatmul.msk.f32.vlgmr.msra.gmra.mxu1 %vm1563_vm2, %v5776_v14  ;;  %v2645_v14 = vpop.f32.mrf.mxu3 }
 0x361   : > { %v3482_v48 = vsel %vm1572_vm3, %v3474_v45, %v4433_v5  ;;  %v3506_v17 = vsel %vm1572_vm3, %v3498_v2, %v4434_v46  ;;  %v6014_v57 = vpop.f32.mrf.mxu1 }
 0x362   : > { %v3490_v4 = vsel %vm1581_vm4, %v3482_v48, %v4453_v50  ;;  %v3514_v53 = vsel %vm1581_vm4, %v3506_v17, %v4454_v43 }
 0x363   : > { %3595 = vmatmul.f32.gmra.mxu0 %v3490_v4  ;;  %3636 = vmatmul.f32.gmra.mxu3 %v3514_v53 }
 0x367   : > { %4092 = vmatmul.msk.f32.gmra.mxu1 %vm1563_vm2, %v3458_v12  ;;  %v2547_v32 = vpop.f32.mrf.mxu2  ;;  %v2648_v59 = vpop.f32.mrf.mxu3 }
 0x368   : > { %v2548_v38 = vadd.f32 %v2547_v32, %v5923_v42 }
 0x36a   : > { %v6018_v55 = vpop.f32.mrf.mxu1  ;;  %v2589_v51 = vadd.f32 %v5854_v31, %v2548_v38 }
 0x36c   : > { %v2646_v10 = vadd.f32 %v2645_v14, %v2589_v51 }
 0x36f   : > { %4093 = vmatmul.msk.f32.gmra.mxu1 %vm1563_vm2, %v3459_v1  ;;  %v2550_v16 = vpop.f32.mrf.mxu2  ;;  %v2651_v54 = vpop.f32.mrf.mxu3 }
 0x370   : > { %v2551_v30 = vadd.f32 %v2550_v16, %v5949_v20  ;;  %v4417_v35 = vpop.permute.xlu0 %4416 }
 0x371   : > { %v4419_v20 = vunpack.i.h.bf16 %v4417_v35  ;;  %v4418_v26 = vunpack.i.l.bf16 %v4417_v35 }
 0x372   : > { %v2592_v42 = vadd.f32 %v5886_v37, %v2551_v30  ;;  %v2885_v37 = vld [vmem:[#allocation2 + $0x102] sm:$0xf] }
 0x373   : > { %v2686_v47 = vpop.f32.mrf.mxu1  ;;  %v3475_v39 = vsel %vm1563_vm2, %v5391_v8, %v4418_v26  ;;  %v3499_v23 = vsel %vm1563_vm2, %v5676_v3, %v4419_v20  ;;  %3464 = vst [vmem:[#allocation1 + $0x20] ss:$2 sm:$0xff] %v2885_v37  ;;  %v6251_v37 = vld [vmem:[#allocation29_spill] sm:$0xff] }
 0x374   : > { %v6023_v19 = vadd.f32 %v2686_v47, %v2646_v10  ;;  %v2649_v13 = vadd.f32 %v2648_v59, %v2592_v42 }
 0x377   : > { %4094 = vmatmul.msk.f32.gmra.mxu1 %vm1563_vm2, %v3468_v56  ;;  %v2553_v44 = vpop.f32.mrf.mxu2  ;;  %v4457_v29 = vpop.permute.xlu2 %4456 }
 0x378   : > { %v2554_v34 = vadd.f32 %v2553_v44, %v5962_v52  ;;  %v4422_v49 = vpop.permute.xlu0 %4421  ;;  %v4459_v46 = vunpack.i.h.bf16 %v4457_v29  ;;  %v4458_v5 = vunpack.i.l.bf16 %v4457_v29  ;;  %v2654_v58 = vpop.f32.mrf.mxu3 }
 0x379   : > { %v4423_v4 = vunpack.i.l.bf16 %v4422_v49 }
 0x37a   : > { %v2595_v18 = vadd.f32 %v5928_v24, %v2554_v34  ;;  %v3470_v16 = vld.sshfl [vmem:[#allocation1 + $0x20] sm:$0xff pattern:$0x75316420]  ;;  %v2887_v34 = vld [vmem:[#allocation2 + $0x112] sm:$0xf] }
 0x37b   : > { %v3476_v51 = vsel %vm1563_vm2, %v5182_v41, %v4423_v4  ;;  %3466 = vst [vmem:[#allocation1 + $0x30] ss:$2 sm:$0xff] %v2887_v34  ;;  %v6253_v4 = vld [vmem:[#allocation15_spill] sm:$0xff] }
 0x37c   : > { %v2689_v31 = vpop.f32.mrf.mxu1  ;;  %v2652_v50 = vadd.f32 %v2651_v54, %v2595_v18 }
 0x37d   : > { %v6028_v6 = vadd.f32 %v2689_v31, %v2649_v13  ;;  %v4442_v36 = vpop.permute.xlu1 %4441  ;;  %v2888_v13 = vld [vmem:[#allocation2 + $0x11a] sm:$0xf] }
 0x37e   : > { %v4444_v22 = vunpack.i.h.bf16 %v4442_v36  ;;  %v4443_v52 = vunpack.i.l.bf16 %v4442_v36  ;;  %3467 = vst [vmem:[#allocation1 + $0x31] ss:$2 sm:$0xff] %v2888_v13 }
 0x37f   : > { %4095 = vmatmul.msk.f32.gmra.mxu1 %vm1563_vm2, %v3469_v25  ;;  %v2556_v27 = vpop.f32.mrf.mxu2  ;;  %v4462_v24 = vpop.permute.xlu2 %4461 }
 0x380   : > { %v2557_v43 = vadd.f32 %v2556_v27, %v5974_v60  ;;  %v3483_v45 = vsel %vm1572_vm3, %v3475_v39, %v4443_v52  ;;  %v3507_v2 = vsel %vm1572_vm3, %v3499_v23, %v4444_v22  ;;  %v4424_v60 = vunpack.i.h.bf16 %v4422_v49  ;;  %v4467_v53 = vpop.permute.xlu0 %4466  ;;  %v6250_v49 = vld [vmem:[#allocation37_spill] sm:$0xff]  ;;  %v2657_v18 = vpop.f32.mrf.mxu3 }
 0x381   : > { %v3491_v48 = vsel %vm1581_vm4, %v3483_v45, %v4458_v5  ;;  %v3515_v8 = vsel %vm1581_vm4, %v3507_v2, %v4459_v46  ;;  %v4464_v30 = vunpack.i.h.bf16 %v4462_v24  ;;  %v4468_v44 = vunpack.i.l.bf16 %v4467_v53 }
 0x382   : > { %v2598_v17 = vadd.f32 %v5954_v11, %v2557_v43  ;;  %3598 = vmatmul.f32.gmra.mxu0 %v3491_v48  ;;  %3639 = vmatmul.f32.gmra.mxu3 %v3515_v8  ;;  %v4463_v11 = vunpack.i.l.bf16 %v4462_v24  ;;  %v3500_v10 = vsel %vm1563_vm2, %v5549_v40, %v4424_v60  ;;  %v3727_v40 = vld [vmem:[%s6172_s7 + $0x18] sm:$0xff]  ;;  %v4469_v29 = vunpack.i.h.bf16 %v4467_v53  ;;  %v6252_v8 = vld [vmem:[#allocation38_spill] sm:$0xff] }
 0x383   : > { %4118 = vmatpush.msra.mxu2 %v3727_v40  ;;  %3768 = vmatpush.msrb.mxu0 %v3727_v40  ;;  %v3477_v54 = vsel %vm1563_vm2, %v6250_v49, %v4468_v44  ;;  %v3725_v40 = vld [vmem:[%s6172_s7 + $0x8] sm:$0xff]  ;;  %v2640_v49 = vadd.f32 %v5998_v15, %v5937_v61 }
 0x384   : > { %v2692_v63 = vpop.f32.mrf.mxu1  ;;  %v6044_v32 = vadd.f32 %v2654_v58, %v2598_v17  ;;  %v3501_v28 = vsel %vm1563_vm2, %v6251_v37, %v4469_v29 }
 0x385   : > { %v6042_v3 = vadd.f32 %v2692_v63, %v2652_v50  ;;  %v4447_v12 = vpop.permute.xlu1 %4446  ;;  %v3471_v45 = vld.sshfl [vmem:[#allocation1 + $0x30] sm:$0xff pattern:$0x75316420] }
 0x386   : > { %v4449_v38 = vunpack.i.h.bf16 %v4447_v12  ;;  %v4448_v1 = vunpack.i.l.bf16 %v4447_v12 }
 0x387   : > { %v2559_v14 = vpop.f32.mrf.mxu2  ;;  %4096 = vmatmul.msk.f32.gmra.mxu1 %vm1563_vm2, %v3470_v16  ;;  %v4477_v41 = vpop.permute.xlu2 %4476 }
 0x388   : > { %v2560_v59 = vadd.f32 %v2559_v14, %v5982_v33  ;;  %v3484_v35 = vsel %vm1572_vm3, %v3476_v51, %v4448_v1  ;;  %v3508_v47 = vsel %vm1572_vm3, %v3500_v10, %v4449_v38  ;;  %v4482_v31 = vpop.permute.xlu0 %4481  ;;  %v4479_v36 = vunpack.i.h.bf16 %v4477_v41  ;;  %v3726_v1 = vld [vmem:[%s6172_s7 + $0x10] sm:$0xff] }
 0x389   : > { %v3492_v56 = vsel %vm1581_vm4, %v3484_v35, %v4463_v11  ;;  %v3516_v42 = vsel %vm1581_vm4, %v3508_v47, %v4464_v30  ;;  %v4478_v27 = vunpack.i.l.bf16 %v4477_v41  ;;  %v4483_v46 = vunpack.i.l.bf16 %v4482_v31  ;;  %4119 = vmatpush.msra.mxu2 %v3726_v1  ;;  %3769 = vmatpush.msrb.mxu0 %v3726_v1  ;;  %v6254_v30 = vld [vmem:[#allocation35_spill] sm:$0xff] }
 0x38a   : > { %3601 = vmatmul.f32.gmra.mxu0 %v3492_v56  ;;  %3642 = vmatmul.f32.gmra.mxu3 %v3516_v42  ;;  %v2601_v33 = vadd.f32 %v5964_v0, %v2560_v59  ;;  %v4484_v0 = vunpack.i.h.bf16 %v4482_v31 }
 0x38b   : > { %v3478_v17 = vsel %vm1563_vm2, %v6252_v8, %v4483_v46  ;;  %4120 = vmatpush.msra.mxu2 %v3725_v40  ;;  %3770 = vmatpush.msrb.mxu0 %v3725_v40  ;;  %v3590_v29 = vpop.f32.mrf.mxu0 }
 0x38c   : > { %v2658_v52 = vadd.f32 %v2657_v18, %v2601_v33  ;;  %v3502_v60 = vsel %vm1563_vm2, %v6253_v4, %v4484_v0  ;;  %v6111_v0 = vld [vmem:[%s6171_s6] ss:$0 sm:$0xff] }
 0x38d   : > { %v4472_v25 = vpop.permute.xlu1 %4471 }
 0x38e   : > { %v4474_v20 = vunpack.i.h.bf16 %v4472_v25  ;;  %v4473_v26 = vunpack.i.l.bf16 %v4472_v25  ;;  %v6101_v25 = vpop.f32.mrf.mxu1 }
 0x38f   : > { %v2718_v22 = vpop.f32.mrf.mxu2  ;;  %v4497_v24 = vpop.permute.xlu2 %4496  ;;  %4097 = vmatmul.msk.f32.gmra.mxu1 %vm1563_vm2, %v3471_v45 }
 0x390   : > { %v3485_v39 = vsel %vm1572_vm3, %v3477_v54, %v4473_v26  ;;  %v3509_v23 = vsel %vm1572_vm3, %v3501_v28, %v4474_v20  ;;  %v6069_v50 = vadd.f32 %v2718_v22, %v5990_v21  ;;  %v4499_v63 = vunpack.i.h.bf16 %v4497_v24  ;;  %v4492_v12 = vpop.permute.xlu0 %4491 }
 0x391   : > { %v3493_v5 = vsel %vm1581_vm4, %v3485_v39, %v4478_v27  ;;  %v3517_v43 = vsel %vm1581_vm4, %v3509_v23, %v4479_v36  ;;  %v4498_v48 = vunpack.i.l.bf16 %v4497_v24  ;;  %v4493_v21 = vunpack.i.l.bf16 %v4492_v12 }
 0x392   : > { %3604 = vmatmul.f32.gmra.mxu0 %v3493_v5  ;;  %3645 = vmatmul.f32.gmra.mxu3 %v3517_v43  ;;  %v4494_v35 = vunpack.i.h.bf16 %v4492_v12  ;;  %v2681_v36 = vadd.f32 %v6014_v57, %v2640_v49  ;;  %v2684_v57 = vadd.f32 %v6018_v55, %v6012_v7 }
 0x393   : > { %v3479_v11 = vsel %vm1563_vm2, %v6254_v30, %v4493_v21 }
 0x394   : > { %v3503_v42 = vsel %vm1563_vm2, %v5707_v62, %v4494_v35  ;;  %v3724_v62 = vld [vmem:[%s6172_s7] sm:$0xff] }
 0x395   : > { %v4487_v2 = vpop.permute.xlu1 %4486  ;;  %4121 = vmatpush.msra.mxu2 %v3724_v62  ;;  %3771 = vmatpush.msrb.mxu0 %v3724_v62 }
 0x396   : > { %v4489_v53 = vunpack.i.h.bf16 %v4487_v2  ;;  %v4488_v58 = vunpack.i.l.bf16 %v4487_v2 }
 0x397   : > { %v3148_v10 = vpop.permute.xlu2 %3147  ;;  %v2721_v54 = vpop.f32.mrf.mxu2 }
 0x398   : > { %v3486_v14 = vsel %vm1572_vm3, %v3478_v17, %v4488_v58  ;;  %v3510_v38 = vsel %vm1572_vm3, %v3502_v60, %v4489_v53  ;;  %v3345_v44 = vpop.permute.xlu0 %3344  ;;  %v2722_v28 = vadd.f32 %v2721_v54, %v2681_v36 }
 0x399   : > { %v3494_v51 = vsel %vm1581_vm4, %v3486_v14, %v4498_v48  ;;  %v3518_v16 = vsel %vm1581_vm4, %v3510_v38, %v4499_v63  ;;  %v3511_v41 = vsel %vm1572_vm3, %v3503_v42, %v3345_v44 }
 0x39a   : > { %3607 = vmatmul.f32.gmra.mxu0 %v3494_v51  ;;  %3648 = vmatmul.f32.gmra.mxu3 %v3518_v16 }
 0x39d   : > { %v3077_v59 = vpop.permute.xlu1 %3076 }
 0x39e   : > { %v3487_v47 = vsel %vm1572_vm3, %v3479_v11, %v3077_v59 }
 0x39f   : > { %v3495_v56 = vsel %vm1581_vm4, %v3487_v47, %v3148_v10  ;;  %v2724_v46 = vpop.f32.mrf.mxu2 }
 0x3a0   : > { %v2725_v24 = vadd.f32 %v2724_v46, %v2684_v57 }
 0x3a2   : > { %3610 = vmatmul.f32.gmra.mxu0 %v3495_v56 }
 0x3a5   : > { %v3416_v34 = vpop.permute.xlu1 %3415 }
 0x3a6   : > { %v3519_v13 = vsel %vm1581_vm4, %v3511_v41, %v3416_v34 }
 0x3a7   : > { %3651 = vmatmul.f32.gmra.mxu3 %v3519_v13  ;;  %v2727_v8 = vpop.f32.mrf.mxu2 }
 0x3a8   : > { %v2728_v12 = vadd.f32 %v2727_v8, %v6023_v19 }
 0x3aa   : > { %4090 = vmatmul.msk.f32.vlgmr.msra.gmra.mxu0 %vm1563_vm2, %v5768_v9 }
 0x3af   : > { %v2730_v21 = vpop.f32.mrf.mxu2 }
 0x3b0   : > { %v2731_v11 = vadd.f32 %v2730_v21, %v6028_v6 }
 0x3b7   : > { %v2733_v59 = vpop.f32.mrf.mxu2 }
 0x3b8   : > { %v2734_v34 = vadd.f32 %v2733_v59, %v6042_v3 }
 0x3be   : > { %v3593_v9 = vpop.f32.mrf.mxu0 }
 0x3bf   : > { %v2736_v62 = vpop.f32.mrf.mxu2 }
 0x3c4   : > { %v3631_v33 = vpop.f32.mrf.mxu3 }
 0x3c5   : > { %v6099_v31 = vadd.f32 %v3631_v33, %v3590_v29 }
 0x3d4   : > { %v2698_v20 = vpop.f32.mrf.mxu1 }
 0x3d5   : > { %v6103_v26 = vadd.f32 %v2698_v20, %v2658_v52  ;;  %v2696_v20 = vadd.f32 %v6101_v25, %v6044_v32 }
 0x3da   : > { %v3634_v18 = vpop.f32.mrf.mxu3 }
 0x3db   : > { %v3635_v27 = vadd.f32 %v3634_v18, %v3593_v9  ;;  %v2737_v18 = vadd.f32 %v2736_v62, %v2696_v20 }
 0x3dc   : > { %v3675_v37 = vpop.f32.mrf.mxu1 }
 0x3dd   : > { %v3676_v22 = vadd.f32 %v3675_v37, %v3635_v27 }
 0x3df   : > { %v3697_v39 = vadd.f32 %v3676_v22, %v2722_v28 }
 0x3e0   : > { %v3596_v61 = vpop.f32.mrf.mxu0 }
 0x3e1   : > { %v3709_v52 = vadd.f32 %v6111_v0, %v3697_v39 }
 0x3e3   : > { %v3717_v23 = vmax.f32 %v3709_v52, 0.0 }
 0x3e4   : > { %v3678_v5 = vpop.f32.mrf.mxu1 }
 0x3e5   : > { %4099 = vmatmul.msk.f32.vlgmr.msra.gmra.mxu2 %vm1563_vm2, %v3717_v23  ;;  %v2739_v23 = vpop.f32.mrf.mxu2 }
 0x3e6   : > { %v3637_v15 = vpop.f32.mrf.mxu3 }
 0x3e7   : > { %v3638_v43 = vadd.f32 %v3637_v15, %v3596_v61  ;;  %v2740_v61 = vadd.f32 %v2739_v23, %v6103_v26  ;;  %v4502_v26 = vld [vmem:[%s6173_s8] ss:$0 sm:$0xff] }
 0x3e9   : > { %v3679_v45 = vadd.f32 %v3678_v5, %v3638_v43 }
 0x3eb   : > { %v3698_v2 = vadd.f32 %v3679_v45, %v2725_v24 }
 0x3ec   : > { %v3681_v4 = vpop.f32.mrf.mxu1 }
 0x3ed   : > { %v3710_v63 = vadd.f32 %v6111_v0, %v3698_v2 }
 0x3ef   : > { %v3718_v48 = vmax.f32 %v3710_v63, 0.0 }
 0x3f1   : > { %4100 = vmatmul.msk.f32.gmra.mxu2 %vm1563_vm2, %v3718_v48 }
 0x3f4   : > { %v3684_v7 = vpop.f32.mrf.mxu1 }
 0x3fc   : > { %v3687_v47 = vpop.f32.mrf.mxu1 }
 0x3ff   : > { %v3599_v17 = vpop.f32.mrf.mxu0 }
 0x404   : > { %v3690_v33 = vpop.f32.mrf.mxu1 }
 0x405   : > { %v3640_v60 = vpop.f32.mrf.mxu3 }
 0x406   : > { %v3641_v53 = vadd.f32 %v3640_v60, %v3599_v17 }
 0x407   : > { %v3602_v58 = vpop.f32.mrf.mxu0 }
 0x408   : > { %v3682_v14 = vadd.f32 %v3681_v4, %v3641_v53 }
 0x40a   : > { %v3699_v55 = vadd.f32 %v3682_v14, %v2728_v12 }
 0x40c   : > { %v3711_v38 = vadd.f32 %v6111_v0, %v3699_v55  ;;  %v3693_v25 = vpop.f32.mrf.mxu1 }
 0x40d   : > { %v3643_v1 = vpop.f32.mrf.mxu3 }
 0x40e   : > { %v3644_v51 = vadd.f32 %v3643_v1, %v3602_v58  ;;  %v3719_v16 = vmax.f32 %v3711_v38, 0.0 }
 0x40f   : > { %v3605_v30 = vpop.f32.mrf.mxu0 }
 0x410   : > { %v3685_v10 = vadd.f32 %v3684_v7, %v3644_v51  ;;  %4101 = vmatmul.msk.f32.gmra.mxu2 %vm1563_vm2, %v3719_v16 }
 0x412   : > { %v3700_v35 = vadd.f32 %v3685_v10, %v2731_v11 }
 0x414   : > { %v3712_v19 = vadd.f32 %v6111_v0, %v3700_v35 }
 0x415   : > { %v3646_v56 = vpop.f32.mrf.mxu3 }
 0x416   : > { %v3647_v42 = vadd.f32 %v3646_v56, %v3605_v30  ;;  %v3720_v44 = vmax.f32 %v3712_v19, 0.0 }
 0x417   : > { %v3608_v41 = vpop.f32.mrf.mxu0 }
 0x418   : > { %v3688_v13 = vadd.f32 %v3687_v47, %v3647_v42  ;;  %4102 = vmatmul.msk.f32.gmra.mxu2 %vm1563_vm2, %v3720_v44 }
 0x41a   : > { %v3701_v40 = vadd.f32 %v3688_v13, %v2734_v34 }
 0x41c   : > { %v3713_v6 = vadd.f32 %v6111_v0, %v3701_v40 }
 0x41d   : > { %v3649_v29 = vpop.f32.mrf.mxu3 }
 0x41e   : > { %v3650_v49 = vadd.f32 %v3649_v29, %v3608_v41  ;;  %v3721_v54 = vmax.f32 %v3713_v6, 0.0 }
 0x41f   : > { %v3611_v9 = vpop.f32.mrf.mxu0 }
 0x420   : > { %v3691_v36 = vadd.f32 %v3690_v33, %v3650_v49  ;;  %4103 = vmatmul.msk.f32.gmra.mxu2 %vm1563_vm2, %v3721_v54 }
 0x422   : > { %v3702_v3 = vadd.f32 %v3691_v36, %v2737_v18 }
 0x424   : > { %v3714_v27 = vadd.f32 %v6111_v0, %v3702_v3 }
 0x426   : > { %v3722_v37 = vmax.f32 %v3714_v27, 0.0 }
 0x427   : > { %v3672_v28 = vpop.f32.mrf.mxu0 }
 0x428   : > { %v3673_v22 = vadd.f32 %v3672_v28, %v6099_v31  ;;  %4104 = vmatmul.msk.f32.gmra.mxu2 %vm1563_vm2, %v3722_v37 }
 0x42a   : > { %v3696_v39 = vadd.f32 %v3673_v22, %v6069_v50  ;;  %v3652_v32 = vpop.f32.mrf.mxu3  ;;  %v6255_v50 = vmov 0.0  }
 0x42b   : > { %v3653_v52 = vadd.f32 %v3652_v32, %v3611_v9  ;;  %3801 = vst [vmem:[%s6142_s30] sm:$0x1] %v6255_v50 }
 0x42c   : > { %v3708_v46 = vadd.f32 %v6111_v0, %v3696_v39 }
 0x42d   : > { %v3694_v15 = vadd.f32 %v3693_v25, %v3653_v52 }
 0x42e   : > { %v3716_v5 = vmax.f32 %v3708_v46, 0.0 }
 0x42f   : > { %v3703_v57 = vadd.f32 %v3694_v15, %v2740_v61 }
 0x430   : > { %4098 = vmatmul.msk.f32.vlgmr.msrb.gmra.mxu0 %vm1563_vm2, %v3716_v5 }
 0x431   : > { %v3715_v31 = vadd.f32 %v6111_v0, %v3703_v57 }
 0x432   : > { %v3802_v56 = vld [vmem:[%s6142_s30] sm:$0x1] }
 0x433   : > { %v3723_v43 = vmax.f32 %v3715_v31, 0.0 }
 0x435   : > { %4105 = vmatmul.msk.f32.gmra.mxu2 %vm1563_vm2, %v3723_v43 }
 0x468   : > { %v3776_v0 = vpop.f32.mrf.mxu2 }
 0x469   : > { %v3777_v24 = vadd.f32 %v4502_v26, %v3776_v0 }
 0x46b   : > { %3819 = vst [vmem:[%s532_s17 + $0x8] sm:$0xff] %v3777_v24 }
 0x474   : > { %v3779_v45 = vpop.f32.mrf.mxu2 }
 0x475   : > { %v3780_v2 = vadd.f32 %v4502_v26, %v3779_v45 }
 0x477   : > { %3820 = vst [vmem:[%s532_s17 + $0x10] sm:$0xff] %v3780_v2 }
 0x493   : > { %v3782_v63 = vpop.f32.mrf.mxu2 }
 0x494   : > { %v3783_v48 = vadd.f32 %v4502_v26, %v3782_v63 }
 0x496   : > { %3821 = vst [vmem:[%s532_s17 + $0x18] sm:$0xff] %v3783_v48 }
 0x49b   : > { %v3785_v8 = vpop.f32.mrf.mxu2 }
 0x49c   : > { %v3786_v17 = vadd.f32 %v4502_v26, %v3785_v8 }
 0x49e   : > { %3822 = vst [vmem:[%s532_s17 + $0x20] sm:$0xff] %v3786_v17 }
 0x4a3   : > { %v3788_v4 = vpop.f32.mrf.mxu2 }
 0x4a4   : > { %v3789_v60 = vadd.f32 %v4502_v26, %v3788_v4 }
 0x4a6   : > { %3823 = vst [vmem:[%s532_s17 + $0x28] sm:$0xff] %v3789_v60 }
 0x4ab   : > { %v3791_v53 = vpop.f32.mrf.mxu2 }
 0x4ac   : > { %v3792_v58 = vadd.f32 %v4502_v26, %v3791_v53 }
 0x4ad   : > { %v3773_v12 = vpop.f32.mrf.mxu0 }
 0x4ae   : > { %3824 = vst [vmem:[%s532_s17 + $0x30] sm:$0xff] %v3792_v58  ;;  %v3774_v21 = vadd.f32 %v4502_v26, %v3773_v12 }
 0x4b0   : > { %v3803_v14 = vadd.f32 %v3777_v24, %v3774_v21  ;;  %3818 = vst [vmem:[%s532_s17] sm:$0xff] %v3774_v21 }
 0x4b2   : > { %v3804_v7 = vadd.f32 %v3803_v14, %v3780_v2 }
 0x4b4   : > { %v3805_v55 = vadd.f32 %v3804_v7, %v3783_v48 }
 0x4b6   : > { %v3806_v38 = vadd.f32 %v3805_v55, %v3786_v17 }
 0x4b8   : > { %v3794_v1 = vpop.f32.mrf.mxu2  ;;  %v3807_v51 = vadd.f32 %v3806_v38, %v3789_v60 }
 0x4b9   : > { %v3795_v16 = vadd.f32 %v4502_v26, %v3794_v1 }
 0x4ba   : > { %v3808_v30 = vadd.f32 %v3807_v51, %v3792_v58 }
 0x4bb   : > { %3825 = vst [vmem:[%s532_s17 + $0x38] sm:$0xff] %v3795_v16 }
 0x4bc   : > { %v3809_v11 = vadd.f32 %v3808_v30, %v3795_v16 }
 0x4be   : > { %v3810_v10 = vrot.slane %v3809_v11, 4 }
 0x4c0   : > { %v3811_v59 = vadd.f32 %v3810_v10, %v3809_v11 }
 0x4c2   : > { %v3812_v35 = vrot.slane %v3811_v59, 2 }
 0x4c4   : > { %v3813_v47 = vadd.f32 %v3812_v35, %v3811_v59 }
 0x4c6   : > { %v3814_v19 = vrot.slane %v3813_v47, 1 }
 0x4c8   : > { %v3815_v42 = vadd.f32 %v3814_v19, %v3813_v47 }
 0x4ca   : > { %v3816_v44 = vadd.f32 %v3815_v42, %v3802_v56 }
 0x4cc   : > { %3817 = vst [vmem:[%s6142_s30] sm:$0x1] %v3816_v44 }
 0x4cd PF: > { %s21_s15 = sadd.s32 1, %s4526_s15   ;;  %s6256_s13 = smov %s4522_s14 }
 0x4ce   : > { %p18_p5 = scmp.ge.s32.totalorder %s21_s15, 4   ;;  %s6257_s14 = smov %s6259_s16 }
 0x4d0   :  { %20 = sbr.rel (!%p18_p5) target bundleno = 2 (0x2), region = 324 }

</bundles_post_ra>
